<compile_context>
chip_gen: v5e
topology: v5e:2x2
jax: 0.10.0
libtpu: 0.0.40
codegen_flags: <defaults>
</compile_context>

<pallas_src>
import math
import functools

import jax
import jax.numpy as jnp
from jax.experimental import pallas as pl
from jax.experimental.pallas import tpu as pltpu


LN_EPS = 1e-5
LANE = 128          # lane width used to make detection-head outputs lane-dense
SCALE2PI = 2.0 * 3.141592653589793


def _default_vmem_limit():
    """Scoped-VMEM budget: generous on v5e/v6e (128 MiB), conservative on v7x."""
    try:
        cap = int(pltpu.get_tpu_info().vmem_capacity_bytes)
    except Exception:
        cap = 64 * 1024 * 1024
    return int(min(max(cap - 16 * 1024 * 1024, 32 * 1024 * 1024), 100 * 1024 * 1024))


VMEM_LIMIT = _default_vmem_limit()


# --------------------------------------------------------------------------
# BlockSpec helpers
# --------------------------------------------------------------------------

def _bact_spec(n, d):
    """[B, n, d] activation, one batch element per grid step (grid = (B, L))."""
    return pl.BlockSpec((None, n, d), lambda b, l: (b, 0, 0))


def _cact_spec(n, d):
    """[1, n, d] activation broadcast over batch and layers."""
    return pl.BlockSpec((None, n, d), lambda b, l: (0, 0, 0))


def _stacked_spec(shape):
    """Per-layer stacked weight [L, ...]; block = trailing dims, indexed by layer."""
    trailing = tuple(int(s) for s in shape[1:])
    nd = len(trailing)
    return pl.BlockSpec((None,) + trailing, lambda b, l, _n=nd: (l,) + (0,) * _n)


def _shared_spec(shape):
    """Weight shared by all grid steps of a (B, L) grid."""
    full = tuple(int(s) for s in shape)
    nd = len(full)
    return pl.BlockSpec(full, lambda b, l, _n=nd: (0,) * _n)


def _const_spec(shape):
    """Full-array block independent of a 1-D grid (adapt_pos2d weights)."""
    full = tuple(int(s) for s in shape)
    nd = len(full)
    return pl.BlockSpec(full, lambda *_, _n=nd: (0,) * _n)


def _row_tile(m):
    return m if m <= 512 else 512


# --------------------------------------------------------------------------
# In-kernel building blocks (operate on loaded values)
# --------------------------------------------------------------------------

def _ln(x, g, b, eps):
    """Layernorm over the last dim; statistics in f32."""
    mu = jnp.mean(x, axis=-1, keepdims=True)
    var = jnp.mean(jnp.square(x - mu), axis=-1, keepdims=True)
    return (x - mu) * jax.lax.rsqrt(var + eps) * g + b


def _ffn(x, w1, b1, w2, b2):
    """linear + ReLU + linear; bf16 operands, f32 accumulation."""
    h = jnp.dot(x.astype(jnp.bfloat16), w1, preferred_element_type=jnp.float32) + b1
    h = jnp.maximum(h, 0.0)
    return jnp.dot(h.astype(jnp.bfloat16), w2, preferred_element_type=jnp.float32) + b2


def _mha(x_q, x_k, x_v, wq, bq, wk, bk, wv, bv, wo, bo, num_heads, scale):
    """Multi-head attention with lane-dense full-D projections.

    wq/wk/wv/wo: [D, D] bf16, biases: [1, D] f32.  Q/K/V are computed with one
    [N,D]x[D,D] matmul each, heads are static lane slices, head outputs are
    lane-concatenated and projected with a single [N,D]x[D,D] matmul.
    """
    d = x_q.shape[-1]
    dh = d // num_heads
    q = jnp.dot(x_q.astype(jnp.bfloat16), wq, preferred_element_type=jnp.float32) + bq
    k = jnp.dot(x_k.astype(jnp.bfloat16), wk, preferred_element_type=jnp.float32) + bk
    v = jnp.dot(x_v.astype(jnp.bfloat16), wv, preferred_element_type=jnp.float32) + bv

    heads = []
    for h in range(num_heads):
        sl = slice(h * dh, (h + 1) * dh)
        qh = q[:, sl].astype(jnp.bfloat16)
        kh = k[:, sl].astype(jnp.bfloat16)
        vh = v[:, sl].astype(jnp.bfloat16)
        s = jax.lax.dot_general(qh, kh, (((1,), (1,)), ((), ())),
                                preferred_element_type=jnp.float32) * scale
        s = s - jnp.max(s, axis=-1, keepdims=True)
        p = jnp.exp(s)
        p = p * pl.reciprocal(jnp.sum(p, axis=-1, keepdims=True), approx=True)
        heads.append(jnp.dot(p.astype(jnp.bfloat16), vh,
                             preferred_element_type=jnp.float32))
    o = jnp.concatenate(heads, axis=-1)                       # [N, D] f32
    return jnp.dot(o.astype(jnp.bfloat16), wo, preferred_element_type=jnp.float32) + bo


# --------------------------------------------------------------------------
# Fused encoder stack: all layers in one pallas_call
# --------------------------------------------------------------------------

_ENC_KEYS = (
    "wq", "bq", "wk", "bk", "wv", "bv", "wo", "bo",
    "ln1_g", "ln1_b",
    "lin1_w", "lin1_b", "lin2_w", "lin2_b",
    "ln2_g", "ln2_b",
)


def _encoder_stack_kernel(src_ref, pos_ref,
                          wq, bq, wk, bk, wv, bv, wo, bo,
                          ln1_g, ln1_b,
                          lin1_w, lin1_b, lin2_w, lin2_b,
                          ln2_g, ln2_b,
                          out_ref, x_scr, *, num_heads, eps):
    l = pl.program_id(1)

    @pl.when(l == 0)
    def _():
        x_scr[...] = src_ref[...]

    x = x_scr[...]                                   # [N, D] f32 (VMEM-resident)
    pos = pos_ref[...]
    d = x.shape[-1]
    scale = 1.0 / math.sqrt(d // num_heads)

    q_in = x + pos                                   # q = k = src + pos, v = src
    attn = _mha(q_in, q_in, x,
                wq[...], bq[...], wk[...], bk[...], wv[...], bv[...],
                wo[...], bo[...], num_heads, scale)
    y = _ln(x + attn, ln1_g[...], ln1_b[...], eps)
    y = _ln(y + _ffn(y, lin1_w[...], lin1_b[...], lin2_w[...], lin2_b[...]),
            ln2_g[...], ln2_b[...], eps)
    x_scr[...] = y

    @pl.when(l == pl.num_programs(1) - 1)
    def _():
        out_ref[...] = y


def encoder_stack(ep, src_tok, pos_tok, num_heads):
    B, N, D = src_tok.shape
    L = int(ep["wq"].shape[0])
    weights = tuple(ep[k] for k in _ENC_KEYS)
    return pl.pallas_call(
        functools.partial(_encoder_stack_kernel, num_heads=num_heads, eps=LN_EPS),
        out_shape=jax.ShapeDtypeStruct((B, N, D), jnp.float32),
        grid=(B, L),
        in_specs=[_bact_spec(N, D), _cact_spec(N, D)]
                 + [_stacked_spec(w.shape) for w in weights],
        out_specs=_bact_spec(N, D),
        scratch_shapes=[pltpu.VMEM((N, D), jnp.float32)],
        compiler_params=pltpu.CompilerParams(
            dimension_semantics=("parallel", "arbitrary"),
            vmem_limit_bytes=VMEM_LIMIT),
    )(src_tok, pos_tok, *weights)


# --------------------------------------------------------------------------
# Fused decoder stack + detection head: all layers + heads in one pallas_call
# --------------------------------------------------------------------------

_DEC_KEYS = (
    "sa_wq", "sa_bq", "sa_wk", "sa_bk", "sa_wv", "sa_bv", "sa_wo", "sa_bo",
    "ln1_g", "ln1_b",
    "ca_wq", "ca_bq", "ca_wk", "ca_bk", "ca_wv", "ca_bv", "ca_wo", "ca_bo",
    "ln2_g", "ln2_b",
    "lin1_w", "lin1_b", "lin2_w", "lin2_b",
    "ln3_g", "ln3_b",
)


def _decoder_stack_kernel(tgt0_ref, qpos_ref, mem_ref, mpos_ref, refadd_ref,
                          sa_wq, sa_bq, sa_wk, sa_bk, sa_wv, sa_bv, sa_wo, sa_bo,
                          ln1_g, ln1_b,
                          ca_wq, ca_bq, ca_wk, ca_bk, ca_wv, ca_bv, ca_wo, ca_bo,
                          ln2_g, ln2_b,
                          lin1_w, lin1_b, lin2_w, lin2_b,
                          ln3_g, ln3_b,
                          cls_w, cls_b, bw1, bb1, bw2, bb2, bw3, bb3,
                          cls_ref, box_ref, tgt_scr, *, num_heads, eps):
    l = pl.program_id(1)

    @pl.when(l == 0)
    def _():
        tgt_scr[...] = tgt0_ref[...]

    tgt = tgt_scr[...]                               # [Nq, D] f32 (VMEM-resident)
    qpos = qpos_ref[...]
    mem = mem_ref[...]                               # [Nk, D]
    mpos = mpos_ref[...]
    d = tgt.shape[-1]
    scale = 1.0 / math.sqrt(d // num_heads)

    # self-attention (q = k = tgt + query_pos, v = tgt)
    q_in = tgt + qpos
    sa = _mha(q_in, q_in, tgt,
              sa_wq[...], sa_bq[...], sa_wk[...], sa_bk[...], sa_wv[...], sa_bv[...],
              sa_wo[...], sa_bo[...], num_heads, scale)
    x = _ln(tgt + sa, ln1_g[...], ln1_b[...], eps)

    # cross-attention (q = x + query_pos, k = mem + pos, v = mem)
    ca = _mha(x + qpos, mem + mpos, mem,
              ca_wq[...], ca_bq[...], ca_wk[...], ca_bk[...], ca_wv[...], ca_bv[...],
              ca_wo[...], ca_bo[...], num_heads, scale)
    x = _ln(x + ca, ln2_g[...], ln2_b[...], eps)

    # FFN + residual + LN
    x = _ln(x + _ffn(x, lin1_w[...], lin1_b[...], lin2_w[...], lin2_b[...]),
            ln3_g[...], ln3_b[...], eps)
    tgt_scr[...] = x

    # ---- fused detection head (shared weights, lane-dense padded outputs) ----
    x16 = x.astype(jnp.bfloat16)
    cls_ref[...] = jnp.dot(x16, cls_w[...],
                           preferred_element_type=jnp.float32) + cls_b[...]
    h = jnp.maximum(jnp.dot(x16, bw1[...],
                            preferred_element_type=jnp.float32) + bb1[...], 0.0)
    h = jnp.maximum(jnp.dot(h.astype(jnp.bfloat16), bw2[...],
                            preferred_element_type=jnp.float32) + bb2[...], 0.0)
    t = (jnp.dot(h.astype(jnp.bfloat16), bw3[...],
                 preferred_element_type=jnp.float32) + bb3[...] + refadd_ref[...])
    box_ref[...] = pl.reciprocal(1.0 + jnp.exp(-t), approx=True)   # sigmoid (EUP)


def decoder_stack(dp, head_w, tgt0, query_pos, mem, mem_pos, ref_add_pad,
                  num_heads, n_layers):
    B, Nq, D = tgt0.shape
    Nk = mem.shape[1]
    CP = int(head_w[0].shape[1])
    BP = int(head_w[6].shape[1])
    layer_w = tuple(dp[k] for k in _DEC_KEYS)
    return pl.pallas_call(
        functools.partial(_decoder_stack_kernel, num_heads=num_heads, eps=LN_EPS),
        out_shape=(jax.ShapeDtypeStruct((n_layers, B, Nq, CP), jnp.float32),
                   jax.ShapeDtypeStruct((n_layers, B, Nq, BP), jnp.float32)),
        grid=(B, n_layers),
        in_specs=[_bact_spec(Nq, D), _cact_spec(Nq, D),
                  _bact_spec(Nk, D), _cact_spec(Nk, D),
                  _cact_spec(Nq, LANE)]
                 + [_stacked_spec(w.shape) for w in layer_w]
                 + [_shared_spec(w.shape) for w in head_w],
        out_specs=(pl.BlockSpec((None, None, Nq, CP), lambda b, l: (l, b, 0, 0)),
                   pl.BlockSpec((None, None, Nq, BP), lambda b, l: (l, b, 0, 0))),
        scratch_shapes=[pltpu.VMEM((Nq, D), jnp.float32)],
        compiler_params=pltpu.CompilerParams(
            dimension_semantics=("parallel", "arbitrary"),
            vmem_limit_bytes=VMEM_LIMIT),
    )(tgt0, query_pos, mem, mem_pos, ref_add_pad, *layer_w, *head_w)


# --------------------------------------------------------------------------
# Fused 2-layer MLP (adapt_pos2d)
# --------------------------------------------------------------------------

def _mlp2_kernel(x_ref, w1, b1, w2, b2, o_ref):
    h = jnp.dot(x_ref[...].astype(jnp.bfloat16), w1[...],
                preferred_element_type=jnp.float32) + b1[...]
    h = jnp.maximum(h, 0.0)
    o_ref[...] = jnp.dot(h.astype(jnp.bfloat16), w2[...],
                         preferred_element_type=jnp.float32) + b2[...]


def adapt_pos2d(p, x):
    orig = x.shape
    D = orig[-1]
    M = int(math.prod(orig[:-1]))
    dout = p["w2"].shape[1]
    x2 = x.reshape(M, D).astype(jnp.float32)
    tile = _row_tile(M)
    out = pl.pallas_call(
        _mlp2_kernel,
        out_shape=jax.ShapeDtypeStruct((M, dout), jnp.float32),
        grid=(pl.cdiv(M, tile),),
        in_specs=[pl.BlockSpec((tile, D), lambda i: (i, 0)),
                  _const_spec(p["w1"].shape), _const_spec(p["b1"].shape),
                  _const_spec(p["w2"].shape), _const_spec(p["b2"].shape)],
        out_specs=pl.BlockSpec((tile, dout), lambda i: (i, 0)),
        compiler_params=pltpu.CompilerParams(
            dimension_semantics=("parallel",),
            vmem_limit_bytes=VMEM_LIMIT),
    )(x2, p["w1"], p["b1"], p["w2"], p["b2"])
    return out.reshape(orig[:-1] + (dout,))


# --------------------------------------------------------------------------
# Positional embeddings / misc (pure-JAX glue, elementwise only)
# --------------------------------------------------------------------------

def _interleave_sin_cos(p, npf):
    s = jnp.sin(p[..., 0::2])
    c = jnp.cos(p[..., 1::2])
    return jnp.stack([s, c], axis=-1).reshape(p.shape[:-1] + (npf,))


def generate_posembed(c, hs, ws, temperature=10000.0):
    npf = c // 2
    y = jnp.arange(1, hs + 1, dtype=jnp.float32)
    x = jnp.arange(1, ws + 1, dtype=jnp.float32)
    y_embed, x_embed = jnp.meshgrid(y, x, indexing="ij")
    y_embed = y_embed / (hs + 1e-6) * SCALE2PI
    x_embed = x_embed / (ws + 1e-6) * SCALE2PI
    dim_t = jnp.arange(npf, dtype=jnp.float32)
    dim_t = temperature ** (2.0 * (jnp.floor(dim_t / 2.0) / npf))
    pos_x = _interleave_sin_cos(x_embed[..., None] / dim_t, npf)
    pos_y = _interleave_sin_cos(y_embed[..., None] / dim_t, npf)
    pos = jnp.concatenate([pos_y, pos_x], axis=-1)            # [hs, ws, c]
    return pos.reshape(1, hs * ws, c)                         # token-major


def pos2posemb2d(pos, d_model, temperature=10000.0):
    npf = d_model // 2
    pos = pos * SCALE2PI
    dim_t = jnp.arange(npf, dtype=jnp.float32)
    dim_t = temperature ** (2.0 * (jnp.floor(dim_t / 2.0) / npf))
    pos_x = _interleave_sin_cos(pos[..., 0, None] / dim_t, npf)
    pos_y = _interleave_sin_cos(pos[..., 1, None] / dim_t, npf)
    return jnp.concatenate([pos_y, pos_x], axis=-1)


def inverse_sigmoid(x):
    x = jnp.clip(x, 0.0, 1.0)
    return jnp.log(jnp.maximum(x, 1e-5) / jnp.maximum(1.0 - x, 1e-5))


# --------------------------------------------------------------------------
# Parameter init (deterministic, in-script).  Matmul weights are stored bf16
# in lane-dense [din, dout] layout; biases / LN params stay f32.  Per-layer
# weights are stacked with a leading layer axis (streamed per grid step).
# --------------------------------------------------------------------------

def init_params(cfg, num_classes, key):
    D = round(cfg["d_model"] * cfg["width"])
    L_enc, L_dec = cfg["num_encoder"], cfg["num_decoder"]
    enc_h = D * cfg["encoder_mlp_ratio"]
    dec_h = D * cfg["decoder_mlp_ratio"]
    keys = iter(jax.random.split(key, 1024))

    def w(din, dout, scale=0.02):
        return (jax.random.normal(next(keys), (din, dout), jnp.float32)
                * scale).astype(jnp.bfloat16)

    def zb(dout):
        return jnp.zeros((1, dout), jnp.float32)

    def ones(dout):
        return jnp.ones((1, dout), jnp.float32)

    def enc_layer():
        return {"wq": w(D, D), "bq": zb(D), "wk": w(D, D), "bk": zb(D),
                "wv": w(D, D), "bv": zb(D), "wo": w(D, D), "bo": zb(D),
                "ln1_g": ones(D), "ln1_b": zb(D),
                "lin1_w": w(D, enc_h), "lin1_b": zb(enc_h),
                "lin2_w": w(enc_h, D), "lin2_b": zb(D),
                "ln2_g": ones(D), "ln2_b": zb(D)}

    def dec_layer():
        d = {}
        for pref in ("sa", "ca"):
            d.update({f"{pref}_wq": w(D, D), f"{pref}_bq": zb(D),
                      f"{pref}_wk": w(D, D), f"{pref}_bk": zb(D),
                      f"{pref}_wv": w(D, D), f"{pref}_bv": zb(D),
                      f"{pref}_wo": w(D, D), f"{pref}_bo": zb(D)})
        d.update({"ln1_g": ones(D), "ln1_b": zb(D),
                  "ln2_g": ones(D), "ln2_b": zb(D),
                  "lin1_w": w(D, dec_h), "lin1_b": zb(dec_h),
                  "lin2_w": w(dec_h, D), "lin2_b": zb(D),
                  "ln3_g": ones(D), "ln3_b": zb(D)})
        return d

    def stack_layers(make, n):
        layers = [make() for _ in range(n)]
        return {k: jnp.stack([lyr[k] for lyr in layers]) for k in layers[0]}

    prior_prob = 0.01
    bias_value = -math.log((1 - prior_prob) / prior_prob)
    class_embed = {"w": w(D, num_classes),
                   "b": jnp.full((1, num_classes), bias_value, jnp.float32)}
    # MLP(D, D, 4, 3): last layer weight = 0, bias[:2] = 0, bias[2:] = -2
    bbox_embed = [{"w": w(D, D), "b": zb(D)},
                  {"w": w(D, D), "b": zb(D)},
                  {"w": jnp.zeros((D, 4), jnp.bfloat16),
                   "b": jnp.array([[0.0, 0.0, -2.0, -2.0]], jnp.float32)}]

    return {
        "encoder": stack_layers(enc_layer, L_enc),
        "decoder": stack_layers(dec_layer, L_dec),
        "pattern": jax.random.normal(next(keys),
                                     (cfg["decoder_num_pattern"], D), jnp.float32),
        "position": jax.random.uniform(next(keys),
                                       (cfg["decoder_num_queries"], 2),
                                       jnp.float32, 0.0, 1.0),
        "adapt_pos2d": {"w1": w(D, D), "b1": zb(D), "w2": w(D, D), "b2": zb(D)},
        # class_embed / bbox_embed are SHARED across decoder layers (torch wraps
        # the same module in a ModuleList).
        "class_embed": class_embed,
        "bbox_embed": bbox_embed,
    }


# --------------------------------------------------------------------------
# Full forward pass
# --------------------------------------------------------------------------

def rtrdet_transformer_forward(params, cfg, src1, src2):
    D = round(cfg["d_model"] * cfg["width"])
    enc_heads = cfg["encoder_num_head"]
    dec_heads = cfg["decoder_num_head"]
    num_pattern = cfg["decoder_num_pattern"]
    num_queries = cfg["decoder_num_queries"]
    num_decoder = cfg["num_decoder"]
    stop_layer_id = num_decoder if cfg["stop_layer_id"] == -1 else cfg["stop_layer_id"]

    bs, c, h, w = src2.shape

    # ---- encoder on C5 (all layers fused in one pallas_call) ----
    pos2 = adapt_pos2d(params["adapt_pos2d"], generate_posembed(c, h, w))
    tok2 = jnp.transpose(src2.reshape(bs, c, h * w), (0, 2, 1))       # [bs, hw, c]
    tok2 = encoder_stack(params["encoder"], tok2, pos2, enc_heads)
    src2_map = jnp.transpose(tok2, (0, 2, 1)).reshape(bs, c, h, w)

    # ---- fuse with C4 (nearest upsample x2, plain XLA) ----
    if src1 is not None:
        src1_map = src1 + jnp.repeat(jnp.repeat(src2_map, 2, axis=2), 2, axis=3)
    else:
        src1_map = src2_map
    _, _, h1, w1 = src1_map.shape

    pos1 = adapt_pos2d(params["adapt_pos2d"], generate_posembed(c, h1, w1))
    mem = jnp.transpose(src1_map.reshape(bs, c, h1 * w1), (0, 2, 1))   # [bs, N1, c]

    # ---- queries ----
    Nq = num_pattern * num_queries
    tgt0 = jnp.tile(params["pattern"].reshape(1, num_pattern, 1, D),
                    (bs, 1, num_queries, 1)).reshape(bs, Nq, D)
    ref_pts = jnp.tile(params["position"], (num_pattern, 1))           # [Nq, 2]

    # reference_points never change across decoder layers in this module, so the
    # query positional embedding and the inverse-sigmoid offset are hoisted out
    # of the layer loop (identical every iteration in the reference).
    query_pos = adapt_pos2d(params["adapt_pos2d"],
                            pos2posemb2d(ref_pts, D))[None]            # [1, Nq, D]
    ref = inverse_sigmoid(ref_pts)                                     # [Nq, 2]
    ref_add_pad = jnp.zeros((1, Nq, LANE), jnp.float32).at[0, :, :2].set(ref)

    # ---- decoder stack + fused detection head ----
    C = int(params["class_embed"]["w"].shape[1])
    CP = max(LANE, ((C + LANE - 1) // LANE) * LANE)
    cls_w_pad = jnp.pad(params["class_embed"]["w"], ((0, 0), (0, CP - C)))
    cls_b_pad = jnp.pad(params["class_embed"]["b"], ((0, 0), (0, CP - C)))
    bw3_pad = jnp.pad(params["bbox_embed"][2]["w"], ((0, 0), (0, LANE - 4)))
    bb3_pad = jnp.pad(params["bbox_embed"][2]["b"], ((0, 0), (0, LANE - 4)))
    head_w = (cls_w_pad, cls_b_pad,
              params["bbox_embed"][0]["w"], params["bbox_embed"][0]["b"],
              params["bbox_embed"][1]["w"], params["bbox_embed"][1]["b"],
              bw3_pad, bb3_pad)

    # reference breaks AFTER appending layer `stop_layer_id`'s outputs
    n_run = min(num_decoder, stop_layer_id + 1)
    dec_p = {k: v[:n_run] for k, v in params["decoder"].items()}

    cls_pad, box_pad = decoder_stack(dec_p, head_w, tgt0, query_pos, mem, pos1,
                                     ref_add_pad, dec_heads, n_run)
    return cls_pad[..., :C], box_pad[..., :4]


# --------------------------------------------------------------------------
# Main
# --------------------------------------------------------------------------

if __name__ == "__main__":
    cfg = dict(
        d_model=64, width=1.0,
        num_encoder=1, num_decoder=2,
        decoder_num_queries=8, decoder_num_pattern=2, stop_layer_id=-1,
        encoder_num_head=4, encoder_mlp_ratio=2, encoder_dropout=0.0, encoder_act="relu",
        decoder_num_head=4, decoder_mlp_ratio=2, decoder_dropout=0.0, decoder_act="relu",
    )
    num_classes = 3

    key = jax.random.PRNGKey(0)
    k_params, k_src1, k_src2 = jax.random.split(key, 3)
    params = init_params(cfg, num_classes, k_params)

    # NCHW inputs: src1 = C4 feature [B, C, H4, W4], src2 = C5 feature [B, C, H5, W5]
    src1 = jax.random.normal(k_src1, (2, 64, 8, 8), jnp.float32)
    src2 = jax.random.normal(k_src2, (2, 64, 4, 4), jnp.float32)

    fwd = jax.jit(lambda p, s1, s2: rtrdet_transformer_forward(p, cfg, s1, s2))
    out_cls, out_box = fwd(params, src1, src2)
    out_cls = jax.block_until_ready(out_cls)
    out_box = jax.block_until_ready(out_box)

    Nq = cfg["decoder_num_pattern"] * cfg["decoder_num_queries"]
    assert out_cls.shape == (cfg["num_decoder"], 2, Nq, num_classes)
    assert out_box.shape == (cfg["num_decoder"], 2, Nq, 4)
    assert bool(jnp.all(jnp.isfinite(out_cls))) and bool(jnp.all(jnp.isfinite(out_box)))
    print("KERNEL_OK")
</pallas_src>

<mosaic_0001>
module attributes {stable_mosaic.version = 11 : i64} {
  func.func @_mlp2_kernel(%arg0: i32, %arg1: memref<16x64xf32, #tpu.memory_space<vmem>>, %arg2: memref<64x64xbf16, #tpu.memory_space<vmem>>, %arg3: memref<1x64xf32, #tpu.memory_space<vmem>>, %arg4: memref<64x64xbf16, #tpu.memory_space<vmem>>, %arg5: memref<1x64xf32, #tpu.memory_space<vmem>>, %arg6: memref<16x64xf32, #tpu.memory_space<vmem>>) attributes {dimension_semantics = [#tpu.dimension_semantics<parallel>], iteration_bounds = array<i64: 1>, scalar_prefetch = 0 : i64, scratch_operands = 0 : i64, tpu.core_type = #tpu.core_type<tc>, window_params = [{transform_indices = @transform_0, window_bounds = array<i64: 16, 64>}, {pipeline_mode = #tpu.pipeline_mode<synchronous>, transform_indices = @transform_1, window_bounds = array<i64: 64, 64>}, {pipeline_mode = #tpu.pipeline_mode<synchronous>, transform_indices = @transform_2, window_bounds = array<i64: 1, 64>}, {pipeline_mode = #tpu.pipeline_mode<synchronous>, transform_indices = @transform_3, window_bounds = array<i64: 64, 64>}, {pipeline_mode = #tpu.pipeline_mode<synchronous>, transform_indices = @transform_4, window_bounds = array<i64: 1, 64>}, {transform_indices = @transform_5, window_bounds = array<i64: 16, 64>}]} {
    %c0 = arith.constant 0 : index
    %c0_0 = arith.constant 0 : index
    %0 = vector.load %arg1[%c0, %c0_0] : memref<16x64xf32, #tpu.memory_space<vmem>>, vector<16x64xf32>
    %1 = arith.truncf %0 : vector<16x64xf32> to vector<16x64xbf16>
    %c0_1 = arith.constant 0 : index
    %c0_2 = arith.constant 0 : index
    %2 = vector.load %arg2[%c0_1, %c0_2] : memref<64x64xbf16, #tpu.memory_space<vmem>>, vector<64x64xbf16>
    %cst = arith.constant dense<0.000000e+00> : vector<16x64xf32>
    %3 = tpu.matmul %1, %2, %cst {dimension_numbers = #tpu.dot_dimension_numbers<[1], [0], [0], [1], [0, 0, 1, 1], [], []>} : vector<16x64xbf16>, vector<64x64xbf16>, vector<16x64xf32> -> vector<16x64xf32>
    %c0_3 = arith.constant 0 : index
    %c0_4 = arith.constant 0 : index
    %4 = vector.load %arg3[%c0_3, %c0_4] : memref<1x64xf32, #tpu.memory_space<vmem>>, vector<1x64xf32>
    %5 = vector.broadcast %4 : vector<1x64xf32> to vector<16x64xf32>
    %6 = arith.addf %3, %5 : vector<16x64xf32>
    %cst_5 = arith.constant 0.000000e+00 : f32
    %7 = vector.broadcast %cst_5 : f32 to vector<16x64xf32>
    %8 = arith.maximumf %6, %7 : vector<16x64xf32>
    %9 = arith.truncf %8 : vector<16x64xf32> to vector<16x64xbf16>
    %c0_6 = arith.constant 0 : index
    %c0_7 = arith.constant 0 : index
    %10 = vector.load %arg4[%c0_6, %c0_7] : memref<64x64xbf16, #tpu.memory_space<vmem>>, vector<64x64xbf16>
    %cst_8 = arith.constant dense<0.000000e+00> : vector<16x64xf32>
    %11 = tpu.matmul %9, %10, %cst_8 {dimension_numbers = #tpu.dot_dimension_numbers<[1], [0], [0], [1], [0, 0, 1, 1], [], []>} : vector<16x64xbf16>, vector<64x64xbf16>, vector<16x64xf32> -> vector<16x64xf32>
    %c0_9 = arith.constant 0 : index
    %c0_10 = arith.constant 0 : index
    %12 = vector.load %arg5[%c0_9, %c0_10] : memref<1x64xf32, #tpu.memory_space<vmem>>, vector<1x64xf32>
    %13 = vector.broadcast %12 : vector<1x64xf32> to vector<16x64xf32>
    %14 = arith.addf %11, %13 : vector<16x64xf32>
    %c0_11 = arith.constant 0 : index
    %c0_12 = arith.constant 0 : index
    %15 = vector.load %arg6[%c0_11, %c0_12] : memref<16x64xf32, #tpu.memory_space<vmem>>, vector<16x64xf32>
    tpu.vector_store %arg6[%c0_11, %c0_12], %14 {strides = array<i32>} : memref<16x64xf32, #tpu.memory_space<vmem>>, vector<16x64xf32>,
    return
  }
  func.func @transform_0(%arg0: i32) -> (i32, i32) {
    %c0_i32 = arith.constant 0 : i32
    %c0_i32_0 = arith.constant 0 : i32
    return %arg0, %c0_i32 : i32, i32
  }
  func.func @transform_1(%arg0: i32) -> (i32, i32) {
    %c0_i32 = arith.constant 0 : i32
    %c0_i32_0 = arith.constant 0 : i32
    %c0_i32_1 = arith.constant 0 : i32
    return %c0_i32, %c0_i32_0 : i32, i32
  }
  func.func @transform_2(%arg0: i32) -> (i32, i32) {
    %c0_i32 = arith.constant 0 : i32
    %c0_i32_0 = arith.constant 0 : i32
    %c0_i32_1 = arith.constant 0 : i32
    return %c0_i32, %c0_i32_0 : i32, i32
  }
  func.func @transform_3(%arg0: i32) -> (i32, i32) {
    %c0_i32 = arith.constant 0 : i32
    %c0_i32_0 = arith.constant 0 : i32
    %c0_i32_1 = arith.constant 0 : i32
    return %c0_i32, %c0_i32_0 : i32, i32
  }
  func.func @transform_4(%arg0: i32) -> (i32, i32) {
    %c0_i32 = arith.constant 0 : i32
    %c0_i32_0 = arith.constant 0 : i32
    %c0_i32_1 = arith.constant 0 : i32
    return %c0_i32, %c0_i32_0 : i32, i32
  }
  func.func @transform_5(%arg0: i32) -> (i32, i32) {
    %c0_i32 = arith.constant 0 : i32
    %c0_i32_0 = arith.constant 0 : i32
    return %arg0, %c0_i32 : i32, i32
  }
}

module attributes {stable_mosaic.version = 11 : i64} {
  func.func @_mlp2_kernel(%arg0: i32, %arg1: memref<64x64xf32, #tpu.memory_space<vmem>>, %arg2: memref<64x64xbf16, #tpu.memory_space<vmem>>, %arg3: memref<1x64xf32, #tpu.memory_space<vmem>>, %arg4: memref<64x64xbf16, #tpu.memory_space<vmem>>, %arg5: memref<1x64xf32, #tpu.memory_space<vmem>>, %arg6: memref<64x64xf32, #tpu.memory_space<vmem>>) attributes {dimension_semantics = [#tpu.dimension_semantics<parallel>], iteration_bounds = array<i64: 1>, scalar_prefetch = 0 : i64, scratch_operands = 0 : i64, tpu.core_type = #tpu.core_type<tc>, window_params = [{transform_indices = @transform_0, window_bounds = array<i64: 64, 64>}, {pipeline_mode = #tpu.pipeline_mode<synchronous>, transform_indices = @transform_1, window_bounds = array<i64: 64, 64>}, {pipeline_mode = #tpu.pipeline_mode<synchronous>, transform_indices = @transform_2, window_bounds = array<i64: 1, 64>}, {pipeline_mode = #tpu.pipeline_mode<synchronous>, transform_indices = @transform_3, window_bounds = array<i64: 64, 64>}, {pipeline_mode = #tpu.pipeline_mode<synchronous>, transform_indices = @transform_4, window_bounds = array<i64: 1, 64>}, {transform_indices = @transform_5, window_bounds = array<i64: 64, 64>}]} {
    %c0 = arith.constant 0 : index
    %c0_0 = arith.constant 0 : index
    %0 = vector.load %arg1[%c0, %c0_0] : memref<64x64xf32, #tpu.memory_space<vmem>>, vector<64x64xf32>
    %1 = arith.truncf %0 : vector<64x64xf32> to vector<64x64xbf16>
    %c0_1 = arith.constant 0 : index
    %c0_2 = arith.constant 0 : index
    %2 = vector.load %arg2[%c0_1, %c0_2] : memref<64x64xbf16, #tpu.memory_space<vmem>>, vector<64x64xbf16>
    %cst = arith.constant dense<0.000000e+00> : vector<64x64xf32>
    %3 = tpu.matmul %1, %2, %cst {dimension_numbers = #tpu.dot_dimension_numbers<[1], [0], [0], [1], [0, 0, 1, 1], [], []>} : vector<64x64xbf16>, vector<64x64xbf16>, vector<64x64xf32> -> vector<64x64xf32>
    %c0_3 = arith.constant 0 : index
    %c0_4 = arith.constant 0 : index
    %4 = vector.load %arg3[%c0_3, %c0_4] : memref<1x64xf32, #tpu.memory_space<vmem>>, vector<1x64xf32>
    %5 = vector.broadcast %4 : vector<1x64xf32> to vector<64x64xf32>
    %6 = arith.addf %3, %5 : vector<64x64xf32>
    %cst_5 = arith.constant 0.000000e+00 : f32
    %7 = vector.broadcast %cst_5 : f32 to vector<64x64xf32>
    %8 = arith.maximumf %6, %7 : vector<64x64xf32>
    %9 = arith.truncf %8 : vector<64x64xf32> to vector<64x64xbf16>
    %c0_6 = arith.constant 0 : index
    %c0_7 = arith.constant 0 : index
    %10 = vector.load %arg4[%c0_6, %c0_7] : memref<64x64xbf16, #tpu.memory_space<vmem>>, vector<64x64xbf16>
    %cst_8 = arith.constant dense<0.000000e+00> : vector<64x64xf32>
    %11 = tpu.matmul %9, %10, %cst_8 {dimension_numbers = #tpu.dot_dimension_numbers<[1], [0], [0], [1], [0, 0, 1, 1], [], []>} : vector<64x64xbf16>, vector<64x64xbf16>, vector<64x64xf32> -> vector<64x64xf32>
    %c0_9 = arith.constant 0 : index
    %c0_10 = arith.constant 0 : index
    %12 = vector.load %arg5[%c0_9, %c0_10] : memref<1x64xf32, #tpu.memory_space<vmem>>, vector<1x64xf32>
    %13 = vector.broadcast %12 : vector<1x64xf32> to vector<64x64xf32>
    %14 = arith.addf %11, %13 : vector<64x64xf32>
    %c0_11 = arith.constant 0 : index
    %c0_12 = arith.constant 0 : index
    %15 = vector.load %arg6[%c0_11, %c0_12] : memref<64x64xf32, #tpu.memory_space<vmem>>, vector<64x64xf32>
    tpu.vector_store %arg6[%c0_11, %c0_12], %14 {strides = array<i32>} : memref<64x64xf32, #tpu.memory_space<vmem>>, vector<64x64xf32>,
    return
  }
  func.func @transform_0(%arg0: i32) -> (i32, i32) {
    %c0_i32 = arith.constant 0 : i32
    %c0_i32_0 = arith.constant 0 : i32
    return %arg0, %c0_i32 : i32, i32
  }
  func.func @transform_1(%arg0: i32) -> (i32, i32) {
    %c0_i32 = arith.constant 0 : i32
    %c0_i32_0 = arith.constant 0 : i32
    %c0_i32_1 = arith.constant 0 : i32
    return %c0_i32, %c0_i32_0 : i32, i32
  }
  func.func @transform_2(%arg0: i32) -> (i32, i32) {
    %c0_i32 = arith.constant 0 : i32
    %c0_i32_0 = arith.constant 0 : i32
    %c0_i32_1 = arith.constant 0 : i32
    return %c0_i32, %c0_i32_0 : i32, i32
  }
  func.func @transform_3(%arg0: i32) -> (i32, i32) {
    %c0_i32 = arith.constant 0 : i32
    %c0_i32_0 = arith.constant 0 : i32
    %c0_i32_1 = arith.constant 0 : i32
    return %c0_i32, %c0_i32_0 : i32, i32
  }
  func.func @transform_4(%arg0: i32) -> (i32, i32) {
    %c0_i32 = arith.constant 0 : i32
    %c0_i32_0 = arith.constant 0 : i32
    %c0_i32_1 = arith.constant 0 : i32
    return %c0_i32, %c0_i32_0 : i32, i32
  }
  func.func @transform_5(%arg0: i32) -> (i32, i32) {
    %c0_i32 = arith.constant 0 : i32
    %c0_i32_0 = arith.constant 0 : i32
    return %arg0, %c0_i32 : i32, i32
  }
}

module attributes {stable_mosaic.version = 11 : i64} {
  func.func @_encoder_stack_kernel(%arg0: i32, %arg1: i32, %arg2: memref<1x16x64xf32, #tpu.memory_space<vmem>>, %arg3: memref<1x16x64xf32, #tpu.memory_space<vmem>>, %arg4: memref<1x64x64xbf16, #tpu.memory_space<vmem>>, %arg5: memref<1x1x64xf32, #tpu.memory_space<vmem>>, %arg6: memref<1x64x64xbf16, #tpu.memory_space<vmem>>, %arg7: memref<1x1x64xf32, #tpu.memory_space<vmem>>, %arg8: memref<1x64x64xbf16, #tpu.memory_space<vmem>>, %arg9: memref<1x1x64xf32, #tpu.memory_space<vmem>>, %arg10: memref<1x64x64xbf16, #tpu.memory_space<vmem>>, %arg11: memref<1x1x64xf32, #tpu.memory_space<vmem>>, %arg12: memref<1x1x64xf32, #tpu.memory_space<vmem>>, %arg13: memref<1x1x64xf32, #tpu.memory_space<vmem>>, %arg14: memref<1x64x128xbf16, #tpu.memory_space<vmem>>, %arg15: memref<1x1x128xf32, #tpu.memory_space<vmem>>, %arg16: memref<1x128x64xbf16, #tpu.memory_space<vmem>>, %arg17: memref<1x1x64xf32, #tpu.memory_space<vmem>>, %arg18: memref<1x1x64xf32, #tpu.memory_space<vmem>>, %arg19: memref<1x1x64xf32, #tpu.memory_space<vmem>>, %arg20: memref<1x16x64xf32, #tpu.memory_space<vmem>>, %arg21: memref<16x64xf32, #tpu.memory_space<vmem>>) attributes {dimension_semantics = [#tpu.dimension_semantics<parallel>, #tpu.dimension_semantics<arbitrary>], iteration_bounds = array<i64: 2, 1>, scalar_prefetch = 0 : i64, scratch_operands = 1 : i64, tpu.core_type = #tpu.core_type<tc>, window_params = [{transform_indices = @transform_0, window_bounds = array<i64: 1, 16, 64>}, {pipeline_mode = #tpu.pipeline_mode<synchronous>, transform_indices = @transform_1, window_bounds = array<i64: 1, 16, 64>}, {transform_indices = @transform_2, window_bounds = array<i64: 1, 64, 64>}, {transform_indices = @transform_3, window_bounds = array<i64: 1, 1, 64>}, {transform_indices = @transform_4, window_bounds = array<i64: 1, 64, 64>}, {transform_indices = @transform_5, window_bounds = array<i64: 1, 1, 64>}, {transform_indices = @transform_6, window_bounds = array<i64: 1, 64, 64>}, {transform_indices = @transform_7, window_bounds = array<i64: 1, 1, 64>}, {transform_indices = @transform_8, window_bounds = array<i64: 1, 64, 64>}, {transform_indices = @transform_9, window_bounds = array<i64: 1, 1, 64>}, {transform_indices = @transform_10, window_bounds = array<i64: 1, 1, 64>}, {transform_indices = @transform_11, window_bounds = array<i64: 1, 1, 64>}, {transform_indices = @transform_12, window_bounds = array<i64: 1, 64, 128>}, {transform_indices = @transform_13, window_bounds = array<i64: 1, 1, 128>}, {transform_indices = @transform_14, window_bounds = array<i64: 1, 128, 64>}, {transform_indices = @transform_15, window_bounds = array<i64: 1, 1, 64>}, {transform_indices = @transform_16, window_bounds = array<i64: 1, 1, 64>}, {transform_indices = @transform_17, window_bounds = array<i64: 1, 1, 64>}, {transform_indices = @transform_18, window_bounds = array<i64: 1, 16, 64>}]} {
    %c0_i32 = arith.constant 0 : i32
    %0 = arith.cmpi eq, %arg1, %c0_i32 : i32
    %1 = arith.extui %0 : i1 to i32
    %c0_i32_0 = arith.constant 0 : i32
    %2 = arith.cmpi ne, %1, %c0_i32_0 : i32
    scf.if %2 {
      %c0_93 = arith.constant 0 : index
      %c0_94 = arith.constant 0 : index
      %c0_95 = arith.constant 0 : index
      %200 = vector.load %arg2[%c0_93, %c0_94, %c0_95] : memref<1x16x64xf32, #tpu.memory_space<vmem>>, vector<1x16x64xf32>
      %201 = vector.shape_cast %200 : vector<1x16x64xf32> to vector<16x64xf32>
      %c0_96 = arith.constant 0 : index
      %c0_97 = arith.constant 0 : index
      %202 = vector.load %arg21[%c0_96, %c0_97] : memref<16x64xf32, #tpu.memory_space<vmem>>, vector<16x64xf32>
      tpu.vector_store %arg21[%c0_96, %c0_97], %201 {strides = array<i32>} : memref<16x64xf32, #tpu.memory_space<vmem>>, vector<16x64xf32>,
    } else {
    }
    %c0 = arith.constant 0 : index
    %c0_1 = arith.constant 0 : index
    %3 = vector.load %arg21[%c0, %c0_1] : memref<16x64xf32, #tpu.memory_space<vmem>>, vector<16x64xf32>
    %c0_2 = arith.constant 0 : index
    %c0_3 = arith.constant 0 : index
    %c0_4 = arith.constant 0 : index
    %4 = vector.load %arg3[%c0_2, %c0_3, %c0_4] : memref<1x16x64xf32, #tpu.memory_space<vmem>>, vector<1x16x64xf32>
    %5 = vector.shape_cast %4 : vector<1x16x64xf32> to vector<16x64xf32>
    %6 = arith.addf %3, %5 : vector<16x64xf32>
    %c0_5 = arith.constant 0 : index
    %c0_6 = arith.constant 0 : index
    %c0_7 = arith.constant 0 : index
    %7 = vector.load %arg4[%c0_5, %c0_6, %c0_7] : memref<1x64x64xbf16, #tpu.memory_space<vmem>>, vector<1x64x64xbf16>
    %8 = vector.shape_cast %7 : vector<1x64x64xbf16> to vector<64x64xbf16>
    %c0_8 = arith.constant 0 : index
    %c0_9 = arith.constant 0 : index
    %c0_10 = arith.constant 0 : index
    %9 = vector.load %arg5[%c0_8, %c0_9, %c0_10] : memref<1x1x64xf32, #tpu.memory_space<vmem>>, vector<1x1x64xf32>
    %10 = vector.shape_cast %9 : vector<1x1x64xf32> to vector<1x64xf32>
    %c0_11 = arith.constant 0 : index
    %c0_12 = arith.constant 0 : index
    %c0_13 = arith.constant 0 : index
    %11 = vector.load %arg6[%c0_11, %c0_12, %c0_13] : memref<1x64x64xbf16, #tpu.memory_space<vmem>>, vector<1x64x64xbf16>
    %12 = vector.shape_cast %11 : vector<1x64x64xbf16> to vector<64x64xbf16>
    %c0_14 = arith.constant 0 : index
    %c0_15 = arith.constant 0 : index
    %c0_16 = arith.constant 0 : index
    %13 = vector.load %arg7[%c0_14, %c0_15, %c0_16] : memref<1x1x64xf32, #tpu.memory_space<vmem>>, vector<1x1x64xf32>
    %14 = vector.shape_cast %13 : vector<1x1x64xf32> to vector<1x64xf32>
    %c0_17 = arith.constant 0 : index
    %c0_18 = arith.constant 0 : index
    %c0_19 = arith.constant 0 : index
    %15 = vector.load %arg8[%c0_17, %c0_18, %c0_19] : memref<1x64x64xbf16, #tpu.memory_space<vmem>>, vector<1x64x64xbf16>
    %16 = vector.shape_cast %15 : vector<1x64x64xbf16> to vector<64x64xbf16>
    %c0_20 = arith.constant 0 : index
    %c0_21 = arith.constant 0 : index
    %c0_22 = arith.constant 0 : index
    %17 = vector.load %arg9[%c0_20, %c0_21, %c0_22] : memref<1x1x64xf32, #tpu.memory_space<vmem>>, vector<1x1x64xf32>
    %18 = vector.shape_cast %17 : vector<1x1x64xf32> to vector<1x64xf32>
    %c0_23 = arith.constant 0 : index
    %c0_24 = arith.constant 0 : index
    %c0_25 = arith.constant 0 : index
    %19 = vector.load %arg10[%c0_23, %c0_24, %c0_25] : memref<1x64x64xbf16, #tpu.memory_space<vmem>>, vector<1x64x64xbf16>
    %20 = vector.shape_cast %19 : vector<1x64x64xbf16> to vector<64x64xbf16>
    %c0_26 = arith.constant 0 : index
    %c0_27 = arith.constant 0 : index
    %c0_28 = arith.constant 0 : index
    %21 = vector.load %arg11[%c0_26, %c0_27, %c0_28] : memref<1x1x64xf32, #tpu.memory_space<vmem>>, vector<1x1x64xf32>
    %22 = vector.shape_cast %21 : vector<1x1x64xf32> to vector<1x64xf32>
    %23 = arith.truncf %6 : vector<16x64xf32> to vector<16x64xbf16>
    %cst = arith.constant dense<0.000000e+00> : vector<16x64xf32>
    %24 = tpu.matmul %23, %8, %cst {dimension_numbers = #tpu.dot_dimension_numbers<[1], [0], [0], [1], [0, 0, 1, 1], [], []>} : vector<16x64xbf16>, vector<64x64xbf16>, vector<16x64xf32> -> vector<16x64xf32>
    %25 = vector.broadcast %10 : vector<1x64xf32> to vector<16x64xf32>
    %26 = arith.addf %24, %25 : vector<16x64xf32>
    %27 = arith.truncf %6 : vector<16x64xf32> to vector<16x64xbf16>
    %cst_29 = arith.constant dense<0.000000e+00> : vector<16x64xf32>
    %28 = tpu.matmul %27, %12, %cst_29 {dimension_numbers = #tpu.dot_dimension_numbers<[1], [0], [0], [1], [0, 0, 1, 1], [], []>} : vector<16x64xbf16>, vector<64x64xbf16>, vector<16x64xf32> -> vector<16x64xf32>
    %29 = vector.broadcast %14 : vector<1x64xf32> to vector<16x64xf32>
    %30 = arith.addf %28, %29 : vector<16x64xf32>
    %31 = arith.truncf %3 : vector<16x64xf32> to vector<16x64xbf16>
    %cst_30 = arith.constant dense<0.000000e+00> : vector<16x64xf32>
    %32 = tpu.matmul %31, %16, %cst_30 {dimension_numbers = #tpu.dot_dimension_numbers<[1], [0], [0], [1], [0, 0, 1, 1], [], []>} : vector<16x64xbf16>, vector<64x64xbf16>, vector<16x64xf32> -> vector<16x64xf32>
    %33 = vector.broadcast %18 : vector<1x64xf32> to vector<16x64xf32>
    %34 = arith.addf %32, %33 : vector<16x64xf32>
    %35 = vector.extract_strided_slice %26 {offsets = [0, 0], sizes = [16, 16], strides = [1, 1]} : vector<16x64xf32> to vector<16x16xf32>
    %36 = arith.truncf %35 : vector<16x16xf32> to vector<16x16xbf16>
    %37 = vector.extract_strided_slice %30 {offsets = [0, 0], sizes = [16, 16], strides = [1, 1]} : vector<16x64xf32> to vector<16x16xf32>
    %38 = arith.truncf %37 : vector<16x16xf32> to vector<16x16xbf16>
    %39 = vector.extract_strided_slice %34 {offsets = [0, 0], sizes = [16, 16], strides = [1, 1]} : vector<16x64xf32> to vector<16x16xf32>
    %40 = arith.truncf %39 : vector<16x16xf32> to vector<16x16xbf16>
    %cst_31 = arith.constant dense<0.000000e+00> : vector<16x16xf32>
    %41 = tpu.matmul %36, %38, %cst_31 {dimension_numbers = #tpu.dot_dimension_numbers<[1], [1], [0], [0], [0, 0, 1, 0], [], []>} : vector<16x16xbf16>, vector<16x16xbf16>, vector<16x16xf32> -> vector<16x16xf32>
    %cst_32 = arith.constant 2.500000e-01 : f32
    %42 = vector.broadcast %cst_32 : f32 to vector<16x16xf32>
    %43 = arith.mulf %41, %42 : vector<16x16xf32>
    %cst_33 = arith.constant dense<0xFF800000> : vector<16xf32>
    %44 = vector.multi_reduction <maximumf>, %43, %cst_33 [1] : vector<16x16xf32> to vector<16xf32>
    %45 = vector.shape_cast %44 : vector<16xf32> to vector<16x1xf32>
    %46 = vector.broadcast %45 : vector<16x1xf32> to vector<16x16xf32>
    %47 = arith.subf %43, %46 : vector<16x16xf32>
    %48 = math.exp %47 : vector<16x16xf32>
    %cst_34 = arith.constant dense<0.000000e+00> : vector<16xf32>
    %49 = vector.multi_reduction <add>, %48, %cst_34 [1] : vector<16x16xf32> to vector<16xf32>
    %50 = vector.shape_cast %49 : vector<16xf32> to vector<16x1xf32>
    %51 = tpu.reciprocal %50 {approx = true} : vector<16x1xf32> -> vector<16x1xf32>
    %52 = vector.broadcast %51 : vector<16x1xf32> to vector<16x16xf32>
    %53 = arith.mulf %48, %52 : vector<16x16xf32>
    %54 = arith.truncf %53 : vector<16x16xf32> to vector<16x16xbf16>
    %cst_35 = arith.constant dense<0.000000e+00> : vector<16x16xf32>
    %55 = tpu.matmul %54, %40, %cst_35 {dimension_numbers = #tpu.dot_dimension_numbers<[1], [0], [0], [1], [0, 0, 1, 1], [], []>} : vector<16x16xbf16>, vector<16x16xbf16>, vector<16x16xf32> -> vector<16x16xf32>
    %56 = vector.extract_strided_slice %26 {offsets = [0, 16], sizes = [16, 16], strides = [1, 1]} : vector<16x64xf32> to vector<16x16xf32>
    %57 = arith.truncf %56 : vector<16x16xf32> to vector<16x16xbf16>
    %58 = vector.extract_strided_slice %30 {offsets = [0, 16], sizes = [16, 16], strides = [1, 1]} : vector<16x64xf32> to vector<16x16xf32>
    %59 = arith.truncf %58 : vector<16x16xf32> to vector<16x16xbf16>
    %60 = vector.extract_strided_slice %34 {offsets = [0, 16], sizes = [16, 16], strides = [1, 1]} : vector<16x64xf32> to vector<16x16xf32>
    %61 = arith.truncf %60 : vector<16x16xf32> to vector<16x16xbf16>
    %cst_36 = arith.constant dense<0.000000e+00> : vector<16x16xf32>
    %62 = tpu.matmul %57, %59, %cst_36 {dimension_numbers = #tpu.dot_dimension_numbers<[1], [1], [0], [0], [0, 0, 1, 0], [], []>} : vector<16x16xbf16>, vector<16x16xbf16>, vector<16x16xf32> -> vector<16x16xf32>
    %cst_37 = arith.constant 2.500000e-01 : f32
    %63 = vector.broadcast %cst_37 : f32 to vector<16x16xf32>
    %64 = arith.mulf %62, %63 : vector<16x16xf32>
    %cst_38 = arith.constant dense<0xFF800000> : vector<16xf32>
    %65 = vector.multi_reduction <maximumf>, %64, %cst_38 [1] : vector<16x16xf32> to vector<16xf32>
    %66 = vector.shape_cast %65 : vector<16xf32> to vector<16x1xf32>
    %67 = vector.broadcast %66 : vector<16x1xf32> to vector<16x16xf32>
    %68 = arith.subf %64, %67 : vector<16x16xf32>
    %69 = math.exp %68 : vector<16x16xf32>
    %cst_39 = arith.constant dense<0.000000e+00> : vector<16xf32>
    %70 = vector.multi_reduction <add>, %69, %cst_39 [1] : vector<16x16xf32> to vector<16xf32>
    %71 = vector.shape_cast %70 : vector<16xf32> to vector<16x1xf32>
    %72 = tpu.reciprocal %71 {approx = true} : vector<16x1xf32> -> vector<16x1xf32>
    %73 = vector.broadcast %72 : vector<16x1xf32> to vector<16x16xf32>
    %74 = arith.mulf %69, %73 : vector<16x16xf32>
    %75 = arith.truncf %74 : vector<16x16xf32> to vector<16x16xbf16>
    %cst_40 = arith.constant dense<0.000000e+00> : vector<16x16xf32>
    %76 = tpu.matmul %75, %61, %cst_40 {dimension_numbers = #tpu.dot_dimension_numbers<[1], [0], [0], [1], [0, 0, 1, 1], [], []>} : vector<16x16xbf16>, vector<16x16xbf16>, vector<16x16xf32> -> vector<16x16xf32>
    %77 = vector.extract_strided_slice %26 {offsets = [0, 32], sizes = [16, 16], strides = [1, 1]} : vector<16x64xf32> to vector<16x16xf32>
    %78 = arith.truncf %77 : vector<16x16xf32> to vector<16x16xbf16>
    %79 = vector.extract_strided_slice %30 {offsets = [0, 32], sizes = [16, 16], strides = [1, 1]} : vector<16x64xf32> to vector<16x16xf32>
    %80 = arith.truncf %79 : vector<16x16xf32> to vector<16x16xbf16>
    %81 = vector.extract_strided_slice %34 {offsets = [0, 32], sizes = [16, 16], strides = [1, 1]} : vector<16x64xf32> to vector<16x16xf32>
    %82 = arith.truncf %81 : vector<16x16xf32> to vector<16x16xbf16>
    %cst_41 = arith.constant dense<0.000000e+00> : vector<16x16xf32>
    %83 = tpu.matmul %78, %80, %cst_41 {dimension_numbers = #tpu.dot_dimension_numbers<[1], [1], [0], [0], [0, 0, 1, 0], [], []>} : vector<16x16xbf16>, vector<16x16xbf16>, vector<16x16xf32> -> vector<16x16xf32>
    %cst_42 = arith.constant 2.500000e-01 : f32
    %84 = vector.broadcast %cst_42 : f32 to vector<16x16xf32>
    %85 = arith.mulf %83, %84 : vector<16x16xf32>
    %cst_43 = arith.constant dense<0xFF800000> : vector<16xf32>
    %86 = vector.multi_reduction <maximumf>, %85, %cst_43 [1] : vector<16x16xf32> to vector<16xf32>
    %87 = vector.shape_cast %86 : vector<16xf32> to vector<16x1xf32>
    %88 = vector.broadcast %87 : vector<16x1xf32> to vector<16x16xf32>
    %89 = arith.subf %85, %88 : vector<16x16xf32>
    %90 = math.exp %89 : vector<16x16xf32>
    %cst_44 = arith.constant dense<0.000000e+00> : vector<16xf32>
    %91 = vector.multi_reduction <add>, %90, %cst_44 [1] : vector<16x16xf32> to vector<16xf32>
    %92 = vector.shape_cast %91 : vector<16xf32> to vector<16x1xf32>
    %93 = tpu.reciprocal %92 {approx = true} : vector<16x1xf32> -> vector<16x1xf32>
    %94 = vector.broadcast %93 : vector<16x1xf32> to vector<16x16xf32>
    %95 = arith.mulf %90, %94 : vector<16x16xf32>
    %96 = arith.truncf %95 : vector<16x16xf32> to vector<16x16xbf16>
    %cst_45 = arith.constant dense<0.000000e+00> : vector<16x16xf32>
    %97 = tpu.matmul %96, %82, %cst_45 {dimension_numbers = #tpu.dot_dimension_numbers<[1], [0], [0], [1], [0, 0, 1, 1], [], []>} : vector<16x16xbf16>, vector<16x16xbf16>, vector<16x16xf32> -> vector<16x16xf32>
    %98 = vector.extract_strided_slice %26 {offsets = [0, 48], sizes = [16, 16], strides = [1, 1]} : vector<16x64xf32> to vector<16x16xf32>
    %99 = arith.truncf %98 : vector<16x16xf32> to vector<16x16xbf16>
    %100 = vector.extract_strided_slice %30 {offsets = [0, 48], sizes = [16, 16], strides = [1, 1]} : vector<16x64xf32> to vector<16x16xf32>
    %101 = arith.truncf %100 : vector<16x16xf32> to vector<16x16xbf16>
    %102 = vector.extract_strided_slice %34 {offsets = [0, 48], sizes = [16, 16], strides = [1, 1]} : vector<16x64xf32> to vector<16x16xf32>
    %103 = arith.truncf %102 : vector<16x16xf32> to vector<16x16xbf16>
    %cst_46 = arith.constant dense<0.000000e+00> : vector<16x16xf32>
    %104 = tpu.matmul %99, %101, %cst_46 {dimension_numbers = #tpu.dot_dimension_numbers<[1], [1], [0], [0], [0, 0, 1, 0], [], []>} : vector<16x16xbf16>, vector<16x16xbf16>, vector<16x16xf32> -> vector<16x16xf32>
    %cst_47 = arith.constant 2.500000e-01 : f32
    %105 = vector.broadcast %cst_47 : f32 to vector<16x16xf32>
    %106 = arith.mulf %104, %105 : vector<16x16xf32>
    %cst_48 = arith.constant dense<0xFF800000> : vector<16xf32>
    %107 = vector.multi_reduction <maximumf>, %106, %cst_48 [1] : vector<16x16xf32> to vector<16xf32>
    %108 = vector.shape_cast %107 : vector<16xf32> to vector<16x1xf32>
    %109 = vector.broadcast %108 : vector<16x1xf32> to vector<16x16xf32>
    %110 = arith.subf %106, %109 : vector<16x16xf32>
    %111 = math.exp %110 : vector<16x16xf32>
    %cst_49 = arith.constant dense<0.000000e+00> : vector<16xf32>
    %112 = vector.multi_reduction <add>, %111, %cst_49 [1] : vector<16x16xf32> to vector<16xf32>
    %113 = vector.shape_cast %112 : vector<16xf32> to vector<16x1xf32>
    %114 = tpu.reciprocal %113 {approx = true} : vector<16x1xf32> -> vector<16x1xf32>
    %115 = vector.broadcast %114 : vector<16x1xf32> to vector<16x16xf32>
    %116 = arith.mulf %111, %115 : vector<16x16xf32>
    %117 = arith.truncf %116 : vector<16x16xf32> to vector<16x16xbf16>
    %cst_50 = arith.constant dense<0.000000e+00> : vector<16x16xf32>
    %118 = tpu.matmul %117, %103, %cst_50 {dimension_numbers = #tpu.dot_dimension_numbers<[1], [0], [0], [1], [0, 0, 1, 1], [], []>} : vector<16x16xbf16>, vector<16x16xbf16>, vector<16x16xf32> -> vector<16x16xf32>
    %119 = tpu.concatenate %55, %76, %97, %118 in 1 : vector<16x16xf32>, vector<16x16xf32>, vector<16x16xf32>, vector<16x16xf32> -> vector<16x64xf32>
    %120 = arith.truncf %119 : vector<16x64xf32> to vector<16x64xbf16>
    %cst_51 = arith.constant dense<0.000000e+00> : vector<16x64xf32>
    %121 = tpu.matmul %120, %20, %cst_51 {dimension_numbers = #tpu.dot_dimension_numbers<[1], [0], [0], [1], [0, 0, 1, 1], [], []>} : vector<16x64xbf16>, vector<64x64xbf16>, vector<16x64xf32> -> vector<16x64xf32>
    %122 = vector.broadcast %22 : vector<1x64xf32> to vector<16x64xf32>
    %123 = arith.addf %121, %122 : vector<16x64xf32>
    %124 = arith.addf %3, %123 : vector<16x64xf32>
    %c0_52 = arith.constant 0 : index
    %c0_53 = arith.constant 0 : index
    %c0_54 = arith.constant 0 : index
    %125 = vector.load %arg12[%c0_52, %c0_53, %c0_54] : memref<1x1x64xf32, #tpu.memory_space<vmem>>, vector<1x1x64xf32>
    %126 = vector.shape_cast %125 : vector<1x1x64xf32> to vector<1x64xf32>
    %c0_55 = arith.constant 0 : index
    %c0_56 = arith.constant 0 : index
    %c0_57 = arith.constant 0 : index
    %127 = vector.load %arg13[%c0_55, %c0_56, %c0_57] : memref<1x1x64xf32, #tpu.memory_space<vmem>>, vector<1x1x64xf32>
    %128 = vector.shape_cast %127 : vector<1x1x64xf32> to vector<1x64xf32>
    %cst_58 = arith.constant dense<0.000000e+00> : vector<16xf32>
    %129 = vector.multi_reduction <add>, %124, %cst_58 [1] : vector<16x64xf32> to vector<16xf32>
    %130 = vector.shape_cast %129 : vector<16xf32> to vector<16x1xf32>
    %cst_59 = arith.constant 6.400000e+01 : f32
    %131 = vector.broadcast %cst_59 : f32 to vector<16x1xf32>
    %132 = arith.divf %130, %131 : vector<16x1xf32>
    %133 = vector.broadcast %132 : vector<16x1xf32> to vector<16x64xf32>
    %134 = arith.subf %124, %133 : vector<16x64xf32>
    %135 = arith.mulf %134, %134 : vector<16x64xf32>
    %cst_60 = arith.constant dense<0.000000e+00> : vector<16xf32>
    %136 = vector.multi_reduction <add>, %135, %cst_60 [1] : vector<16x64xf32> to vector<16xf32>
    %137 = vector.shape_cast %136 : vector<16xf32> to vector<16x1xf32>
    %cst_61 = arith.constant 6.400000e+01 : f32
    %138 = vector.broadcast %cst_61 : f32 to vector<16x1xf32>
    %139 = arith.divf %137, %138 : vector<16x1xf32>
    %140 = vector.broadcast %132 : vector<16x1xf32> to vector<16x64xf32>
    %141 = arith.subf %124, %140 : vector<16x64xf32>
    %cst_62 = arith.constant 9.99999974E-6 : f32
    %142 = vector.broadcast %cst_62 : f32 to vector<16x1xf32>
    %143 = arith.addf %139, %142 : vector<16x1xf32>
    %144 = math.rsqrt %143 : vector<16x1xf32>
    %145 = vector.broadcast %144 : vector<16x1xf32> to vector<16x64xf32>
    %146 = arith.mulf %141, %145 : vector<16x64xf32>
    %147 = vector.broadcast %126 : vector<1x64xf32> to vector<16x64xf32>
    %148 = arith.mulf %146, %147 : vector<16x64xf32>
    %149 = vector.broadcast %128 : vector<1x64xf32> to vector<16x64xf32>
    %150 = arith.addf %148, %149 : vector<16x64xf32>
    %c0_63 = arith.constant 0 : index
    %c0_64 = arith.constant 0 : index
    %c0_65 = arith.constant 0 : index
    %151 = vector.load %arg14[%c0_63, %c0_64, %c0_65] : memref<1x64x128xbf16, #tpu.memory_space<vmem>>, vector<1x64x128xbf16>
    %152 = vector.shape_cast %151 : vector<1x64x128xbf16> to vector<64x128xbf16>
    %c0_66 = arith.constant 0 : index
    %c0_67 = arith.constant 0 : index
    %c0_68 = arith.constant 0 : index
    %153 = vector.load %arg15[%c0_66, %c0_67, %c0_68] : memref<1x1x128xf32, #tpu.memory_space<vmem>>, vector<1x1x128xf32>
    %154 = vector.shape_cast %153 : vector<1x1x128xf32> to vector<1x128xf32>
    %c0_69 = arith.constant 0 : index
    %c0_70 = arith.constant 0 : index
    %c0_71 = arith.constant 0 : index
    %155 = vector.load %arg16[%c0_69, %c0_70, %c0_71] : memref<1x128x64xbf16, #tpu.memory_space<vmem>>, vector<1x128x64xbf16>
    %156 = vector.shape_cast %155 : vector<1x128x64xbf16> to vector<128x64xbf16>
    %c0_72 = arith.constant 0 : index
    %c0_73 = arith.constant 0 : index
    %c0_74 = arith.constant 0 : index
    %157 = vector.load %arg17[%c0_72, %c0_73, %c0_74] : memref<1x1x64xf32, #tpu.memory_space<vmem>>, vector<1x1x64xf32>
    %158 = vector.shape_cast %157 : vector<1x1x64xf32> to vector<1x64xf32>
    %159 = arith.truncf %150 : vector<16x64xf32> to vector<16x64xbf16>
    %cst_75 = arith.constant dense<0.000000e+00> : vector<16x128xf32>
    %160 = tpu.matmul %159, %152, %cst_75 {dimension_numbers = #tpu.dot_dimension_numbers<[1], [0], [0], [1], [0, 0, 1, 1], [], []>} : vector<16x64xbf16>, vector<64x128xbf16>, vector<16x128xf32> -> vector<16x128xf32>
    %161 = vector.broadcast %154 : vector<1x128xf32> to vector<16x128xf32>
    %162 = arith.addf %160, %161 : vector<16x128xf32>
    %cst_76 = arith.constant 0.000000e+00 : f32
    %163 = vector.broadcast %cst_76 : f32 to vector<16x128xf32>
    %164 = arith.maximumf %162, %163 : vector<16x128xf32>
    %165 = arith.truncf %164 : vector<16x128xf32> to vector<16x128xbf16>
    %cst_77 = arith.constant dense<0.000000e+00> : vector<16x64xf32>
    %166 = tpu.matmul %165, %156, %cst_77 {dimension_numbers = #tpu.dot_dimension_numbers<[1], [0], [0], [1], [0, 0, 1, 1], [], []>} : vector<16x128xbf16>, vector<128x64xbf16>, vector<16x64xf32> -> vector<16x64xf32>
    %167 = vector.broadcast %158 : vector<1x64xf32> to vector<16x64xf32>
    %168 = arith.addf %166, %167 : vector<16x64xf32>
    %169 = arith.addf %150, %168 : vector<16x64xf32>
    %c0_78 = arith.constant 0 : index
    %c0_79 = arith.constant 0 : index
    %c0_80 = arith.constant 0 : index
    %170 = vector.load %arg18[%c0_78, %c0_79, %c0_80] : memref<1x1x64xf32, #tpu.memory_space<vmem>>, vector<1x1x64xf32>
    %171 = vector.shape_cast %170 : vector<1x1x64xf32> to vector<1x64xf32>
    %c0_81 = arith.constant 0 : index
    %c0_82 = arith.constant 0 : index
    %c0_83 = arith.constant 0 : index
    %172 = vector.load %arg19[%c0_81, %c0_82, %c0_83] : memref<1x1x64xf32, #tpu.memory_space<vmem>>, vector<1x1x64xf32>
    %173 = vector.shape_cast %172 : vector<1x1x64xf32> to vector<1x64xf32>
    %cst_84 = arith.constant dense<0.000000e+00> : vector<16xf32>
    %174 = vector.multi_reduction <add>, %169, %cst_84 [1] : vector<16x64xf32> to vector<16xf32>
    %175 = vector.shape_cast %174 : vector<16xf32> to vector<16x1xf32>
    %cst_85 = arith.constant 6.400000e+01 : f32
    %176 = vector.broadcast %cst_85 : f32 to vector<16x1xf32>
    %177 = arith.divf %175, %176 : vector<16x1xf32>
    %178 = vector.broadcast %177 : vector<16x1xf32> to vector<16x64xf32>
    %179 = arith.subf %169, %178 : vector<16x64xf32>
    %180 = arith.mulf %179, %179 : vector<16x64xf32>
    %cst_86 = arith.constant dense<0.000000e+00> : vector<16xf32>
    %181 = vector.multi_reduction <add>, %180, %cst_86 [1] : vector<16x64xf32> to vector<16xf32>
    %182 = vector.shape_cast %181 : vector<16xf32> to vector<16x1xf32>
    %cst_87 = arith.constant 6.400000e+01 : f32
    %183 = vector.broadcast %cst_87 : f32 to vector<16x1xf32>
    %184 = arith.divf %182, %183 : vector<16x1xf32>
    %185 = vector.broadcast %177 : vector<16x1xf32> to vector<16x64xf32>
    %186 = arith.subf %169, %185 : vector<16x64xf32>
    %cst_88 = arith.constant 9.99999974E-6 : f32
    %187 = vector.broadcast %cst_88 : f32 to vector<16x1xf32>
    %188 = arith.addf %184, %187 : vector<16x1xf32>
    %189 = math.rsqrt %188 : vector<16x1xf32>
    %190 = vector.broadcast %189 : vector<16x1xf32> to vector<16x64xf32>
    %191 = arith.mulf %186, %190 : vector<16x64xf32>
    %192 = vector.broadcast %171 : vector<1x64xf32> to vector<16x64xf32>
    %193 = arith.mulf %191, %192 : vector<16x64xf32>
    %194 = vector.broadcast %173 : vector<1x64xf32> to vector<16x64xf32>
    %195 = arith.addf %193, %194 : vector<16x64xf32>
    %c0_89 = arith.constant 0 : index
    %c0_90 = arith.constant 0 : index
    %196 = vector.load %arg21[%c0_89, %c0_90] : memref<16x64xf32, #tpu.memory_space<vmem>>, vector<16x64xf32>
    tpu.vector_store %arg21[%c0_89, %c0_90], %195 {strides = array<i32>} : memref<16x64xf32, #tpu.memory_space<vmem>>, vector<16x64xf32>,
    %c0_i32_91 = arith.constant 0 : i32
    %197 = arith.cmpi eq, %arg1, %c0_i32_91 : i32
    %198 = arith.extui %197 : i1 to i32
    %c0_i32_92 = arith.constant 0 : i32
    %199 = arith.cmpi ne, %198, %c0_i32_92 : i32
    scf.if %199 {
      %c0_93 = arith.constant 0 : index
      %c0_94 = arith.constant 0 : index
      %c0_95 = arith.constant 0 : index
      %200 = vector.load %arg20[%c0_93, %c0_94, %c0_95] : memref<1x16x64xf32, #tpu.memory_space<vmem>>, vector<1x16x64xf32>
      %201 = vector.shape_cast %200 : vector<1x16x64xf32> to vector<16x64xf32>
      %202 = vector.shape_cast %195 : vector<16x64xf32> to vector<1x16x64xf32>
      tpu.vector_store %arg20[%c0_93, %c0_94, %c0_95], %202 {strides = array<i32>} : memref<1x16x64xf32, #tpu.memory_space<vmem>>, vector<1x16x64xf32>,
    } else {
    }
    return
  }
  func.func @transform_0(%arg0: i32, %arg1: i32) -> (i32, i32, i32) {
    %c0_i32 = arith.constant 0 : i32
    %c0_i32_0 = arith.constant 0 : i32
    %c0_i32_1 = arith.constant 0 : i32
    return %arg0, %c0_i32, %c0_i32_0 : i32, i32, i32
  }
  func.func @transform_1(%arg0: i32, %arg1: i32) -> (i32, i32, i32) {
    %c0_i32 = arith.constant 0 : i32
    %c0_i32_0 = arith.constant 0 : i32
    %c0_i32_1 = arith.constant 0 : i32
    %c0_i32_2 = arith.constant 0 : i32
    return %c0_i32, %c0_i32_0, %c0_i32_1 : i32, i32, i32
  }
  func.func @transform_2(%arg0: i32, %arg1: i32) -> (i32, i32, i32) {
    %c0_i32 = arith.constant 0 : i32
    %c0_i32_0 = arith.constant 0 : i32
    %c0_i32_1 = arith.constant 0 : i32
    return %arg1, %c0_i32, %c0_i32_0 : i32, i32, i32
  }
  func.func @transform_3(%arg0: i32, %arg1: i32) -> (i32, i32, i32) {
    %c0_i32 = arith.constant 0 : i32
    %c0_i32_0 = arith.constant 0 : i32
    %c0_i32_1 = arith.constant 0 : i32
    return %arg1, %c0_i32, %c0_i32_0 : i32, i32, i32
  }
  func.func @transform_4(%arg0: i32, %arg1: i32) -> (i32, i32, i32) {
    %c0_i32 = arith.constant 0 : i32
    %c0_i32_0 = arith.constant 0 : i32
    %c0_i32_1 = arith.constant 0 : i32
    return %arg1, %c0_i32, %c0_i32_0 : i32, i32, i32
  }
  func.func @transform_5(%arg0: i32, %arg1: i32) -> (i32, i32, i32) {
    %c0_i32 = arith.constant 0 : i32
    %c0_i32_0 = arith.constant 0 : i32
    %c0_i32_1 = arith.constant 0 : i32
    return %arg1, %c0_i32, %c0_i32_0 : i32, i32, i32
  }
  func.func @transform_6(%arg0: i32, %arg1: i32) -> (i32, i32, i32) {
    %c0_i32 = arith.constant 0 : i32
    %c0_i32_0 = arith.constant 0 : i32
    %c0_i32_1 = arith.constant 0 : i32
    return %arg1, %c0_i32, %c0_i32_0 : i32, i32, i32
  }
  func.func @transform_7(%arg0: i32, %arg1: i32) -> (i32, i32, i32) {
    %c0_i32 = arith.constant 0 : i32
    %c0_i32_0 = arith.constant 0 : i32
    %c0_i32_1 = arith.constant 0 : i32
    return %arg1, %c0_i32, %c0_i32_0 : i32, i32, i32
  }
  func.func @transform_8(%arg0: i32, %arg1: i32) -> (i32, i32, i32) {
    %c0_i32 = arith.constant 0 : i32
    %c0_i32_0 = arith.constant 0 : i32
    %c0_i32_1 = arith.constant 0 : i32
    return %arg1, %c0_i32, %c0_i32_0 : i32, i32, i32
  }
  func.func @transform_9(%arg0: i32, %arg1: i32) -> (i32, i32, i32) {
    %c0_i32 = arith.constant 0 : i32
    %c0_i32_0 = arith.constant 0 : i32
    %c0_i32_1 = arith.constant 0 : i32
    return %arg1, %c0_i32, %c0_i32_0 : i32, i32, i32
  }
  func.func @transform_10(%arg0: i32, %arg1: i32) -> (i32, i32, i32) {
    %c0_i32 = arith.constant 0 : i32
    %c0_i32_0 = arith.constant 0 : i32
    %c0_i32_1 = arith.constant 0 : i32
    return %arg1, %c0_i32, %c0_i32_0 : i32, i32, i32
  }
  func.func @transform_11(%arg0: i32, %arg1: i32) -> (i32, i32, i32) {
    %c0_i32 = arith.constant 0 : i32
    %c0_i32_0 = arith.constant 0 : i32
    %c0_i32_1 = arith.constant 0 : i32
    return %arg1, %c0_i32, %c0_i32_0 : i32, i32, i32
  }
  func.func @transform_12(%arg0: i32, %arg1: i32) -> (i32, i32, i32) {
    %c0_i32 = arith.constant 0 : i32
    %c0_i32_0 = arith.constant 0 : i32
    %c0_i32_1 = arith.constant 0 : i32
    return %arg1, %c0_i32, %c0_i32_0 : i32, i32, i32
  }
  func.func @transform_13(%arg0: i32, %arg1: i32) -> (i32, i32, i32) {
    %c0_i32 = arith.constant 0 : i32
    %c0_i32_0 = arith.constant 0 : i32
    %c0_i32_1 = arith.constant 0 : i32
    return %arg1, %c0_i32, %c0_i32_0 : i32, i32, i32
  }
  func.func @transform_14(%arg0: i32, %arg1: i32) -> (i32, i32, i32) {
    %c0_i32 = arith.constant 0 : i32
    %c0_i32_0 = arith.constant 0 : i32
    %c0_i32_1 = arith.constant 0 : i32
    return %arg1, %c0_i32, %c0_i32_0 : i32, i32, i32
  }
  func.func @transform_15(%arg0: i32, %arg1: i32) -> (i32, i32, i32) {
    %c0_i32 = arith.constant 0 : i32
    %c0_i32_0 = arith.constant 0 : i32
    %c0_i32_1 = arith.constant 0 : i32
    return %arg1, %c0_i32, %c0_i32_0 : i32, i32, i32
  }
  func.func @transform_16(%arg0: i32, %arg1: i32) -> (i32, i32, i32) {
    %c0_i32 = arith.constant 0 : i32
    %c0_i32_0 = arith.constant 0 : i32
    %c0_i32_1 = arith.constant 0 : i32
    return %arg1, %c0_i32, %c0_i32_0 : i32, i32, i32
  }
  func.func @transform_17(%arg0: i32, %arg1: i32) -> (i32, i32, i32) {
    %c0_i32 = arith.constant 0 : i32
    %c0_i32_0 = arith.constant 0 : i32
    %c0_i32_1 = arith.constant 0 : i32
    return %arg1, %c0_i32, %c0_i32_0 : i32, i32, i32
  }
  func.func @transform_18(%arg0: i32, %arg1: i32) -> (i32, i32, i32) {
    %c0_i32 = arith.constant 0 : i32
    %c0_i32_0 = arith.constant 0 : i32
    %c0_i32_1 = arith.constant 0 : i32
    return %arg0, %c0_i32, %c0_i32_0 : i32, i32, i32
  }
}

module attributes {stable_mosaic.version = 11 : i64} {
  func.func @_decoder_stack_kernel(%arg0: i32, %arg1: i32, %arg2: memref<1x16x64xf32, #tpu.memory_space<vmem>>, %arg3: memref<1x16x64xf32, #tpu.memory_space<vmem>>, %arg4: memref<1x64x64xf32, #tpu.memory_space<vmem>>, %arg5: memref<1x64x64xf32, #tpu.memory_space<vmem>>, %arg6: memref<1x16x128xf32, #tpu.memory_space<vmem>>, %arg7: memref<1x64x64xbf16, #tpu.memory_space<vmem>>, %arg8: memref<1x1x64xf32, #tpu.memory_space<vmem>>, %arg9: memref<1x64x64xbf16, #tpu.memory_space<vmem>>, %arg10: memref<1x1x64xf32, #tpu.memory_space<vmem>>, %arg11: memref<1x64x64xbf16, #tpu.memory_space<vmem>>, %arg12: memref<1x1x64xf32, #tpu.memory_space<vmem>>, %arg13: memref<1x64x64xbf16, #tpu.memory_space<vmem>>, %arg14: memref<1x1x64xf32, #tpu.memory_space<vmem>>, %arg15: memref<1x1x64xf32, #tpu.memory_space<vmem>>, %arg16: memref<1x1x64xf32, #tpu.memory_space<vmem>>, %arg17: memref<1x64x64xbf16, #tpu.memory_space<vmem>>, %arg18: memref<1x1x64xf32, #tpu.memory_space<vmem>>, %arg19: memref<1x64x64xbf16, #tpu.memory_space<vmem>>, %arg20: memref<1x1x64xf32, #tpu.memory_space<vmem>>, %arg21: memref<1x64x64xbf16, #tpu.memory_space<vmem>>, %arg22: memref<1x1x64xf32, #tpu.memory_space<vmem>>, %arg23: memref<1x64x64xbf16, #tpu.memory_space<vmem>>, %arg24: memref<1x1x64xf32, #tpu.memory_space<vmem>>, %arg25: memref<1x1x64xf32, #tpu.memory_space<vmem>>, %arg26: memref<1x1x64xf32, #tpu.memory_space<vmem>>, %arg27: memref<1x64x128xbf16, #tpu.memory_space<vmem>>, %arg28: memref<1x1x128xf32, #tpu.memory_space<vmem>>, %arg29: memref<1x128x64xbf16, #tpu.memory_space<vmem>>, %arg30: memref<1x1x64xf32, #tpu.memory_space<vmem>>, %arg31: memref<1x1x64xf32, #tpu.memory_space<vmem>>, %arg32: memref<1x1x64xf32, #tpu.memory_space<vmem>>, %arg33: memref<64x128xbf16, #tpu.memory_space<vmem>>, %arg34: memref<1x128xf32, #tpu.memory_space<vmem>>, %arg35: memref<64x64xbf16, #tpu.memory_space<vmem>>, %arg36: memref<1x64xf32, #tpu.memory_space<vmem>>, %arg37: memref<64x64xbf16, #tpu.memory_space<vmem>>, %arg38: memref<1x64xf32, #tpu.memory_space<vmem>>, %arg39: memref<64x128xbf16, #tpu.memory_space<vmem>>, %arg40: memref<1x128xf32, #tpu.memory_space<vmem>>, %arg41: memref<1x1x16x128xf32, #tpu.memory_space<vmem>>, %arg42: memref<1x1x16x128xf32, #tpu.memory_space<vmem>>, %arg43: memref<16x64xf32, #tpu.memory_space<vmem>>) attributes {dimension_semantics = [#tpu.dimension_semantics<parallel>, #tpu.dimension_semantics<arbitrary>], iteration_bounds = array<i64: 2, 2>, scalar_prefetch = 0 : i64, scratch_operands = 1 : i64, tpu.core_type = #tpu.core_type<tc>, window_params = [{transform_indices = @transform_0, window_bounds = array<i64: 1, 16, 64>}, {pipeline_mode = #tpu.pipeline_mode<synchronous>, transform_indices = @transform_1, window_bounds = array<i64: 1, 16, 64>}, {transform_indices = @transform_2, window_bounds = array<i64: 1, 64, 64>}, {pipeline_mode = #tpu.pipeline_mode<synchronous>, transform_indices = @transform_3, window_bounds = array<i64: 1, 64, 64>}, {pipeline_mode = #tpu.pipeline_mode<synchronous>, transform_indices = @transform_4, window_bounds = array<i64: 1, 16, 128>}, {transform_indices = @transform_5, window_bounds = array<i64: 1, 64, 64>}, {transform_indices = @transform_6, window_bounds = array<i64: 1, 1, 64>}, {transform_indices = @transform_7, window_bounds = array<i64: 1, 64, 64>}, {transform_indices = @transform_8, window_bounds = array<i64: 1, 1, 64>}, {transform_indices = @transform_9, window_bounds = array<i64: 1, 64, 64>}, {transform_indices = @transform_10, window_bounds = array<i64: 1, 1, 64>}, {transform_indices = @transform_11, window_bounds = array<i64: 1, 64, 64>}, {transform_indices = @transform_12, window_bounds = array<i64: 1, 1, 64>}, {transform_indices = @transform_13, window_bounds = array<i64: 1, 1, 64>}, {transform_indices = @transform_14, window_bounds = array<i64: 1, 1, 64>}, {transform_indices = @transform_15, window_bounds = array<i64: 1, 64, 64>}, {transform_indices = @transform_16, window_bounds = array<i64: 1, 1, 64>}, {transform_indices = @transform_17, window_bounds = array<i64: 1, 64, 64>}, {transform_indices = @transform_18, window_bounds = array<i64: 1, 1, 64>}, {transform_indices = @transform_19, window_bounds = array<i64: 1, 64, 64>}, {transform_indices = @transform_20, window_bounds = array<i64: 1, 1, 64>}, {transform_indices = @transform_21, window_bounds = array<i64: 1, 64, 64>}, {transform_indices = @transform_22, window_bounds = array<i64: 1, 1, 64>}, {transform_indices = @transform_23, window_bounds = array<i64: 1, 1, 64>}, {transform_indices = @transform_24, window_bounds = array<i64: 1, 1, 64>}, {transform_indices = @transform_25, window_bounds = array<i64: 1, 64, 128>}, {transform_indices = @transform_26, window_bounds = array<i64: 1, 1, 128>}, {transform_indices = @transform_27, window_bounds = array<i64: 1, 128, 64>}, {transform_indices = @transform_28, window_bounds = array<i64: 1, 1, 64>}, {transform_indices = @transform_29, window_bounds = array<i64: 1, 1, 64>}, {transform_indices = @transform_30, window_bounds = array<i64: 1, 1, 64>}, {pipeline_mode = #tpu.pipeline_mode<synchronous>, transform_indices = @transform_31, window_bounds = array<i64: 64, 128>}, {pipeline_mode = #tpu.pipeline_mode<synchronous>, transform_indices = @transform_32, window_bounds = array<i64: 1, 128>}, {pipeline_mode = #tpu.pipeline_mode<synchronous>, transform_indices = @transform_33, window_bounds = array<i64: 64, 64>}, {pipeline_mode = #tpu.pipeline_mode<synchronous>, transform_indices = @transform_34, window_bounds = array<i64: 1, 64>}, {pipeline_mode = #tpu.pipeline_mode<synchronous>, transform_indices = @transform_35, window_bounds = array<i64: 64, 64>}, {pipeline_mode = #tpu.pipeline_mode<synchronous>, transform_indices = @transform_36, window_bounds = array<i64: 1, 64>}, {pipeline_mode = #tpu.pipeline_mode<synchronous>, transform_indices = @transform_37, window_bounds = array<i64: 64, 128>}, {pipeline_mode = #tpu.pipeline_mode<synchronous>, transform_indices = @transform_38, window_bounds = array<i64: 1, 128>}, {transform_indices = @transform_39, window_bounds = array<i64: 1, 1, 16, 128>}, {transform_indices = @transform_40, window_bounds = array<i64: 1, 1, 16, 128>}]} {
    %c0_i32 = arith.constant 0 : i32
    %0 = arith.cmpi eq, %arg1, %c0_i32 : i32
    %1 = arith.extui %0 : i1 to i32
    %c0_i32_0 = arith.constant 0 : i32
    %2 = arith.cmpi ne, %1, %c0_i32_0 : i32
    scf.if %2 {
      %c0_191 = arith.constant 0 : index
      %c0_192 = arith.constant 0 : index
      %c0_193 = arith.constant 0 : index
      %389 = vector.load %arg2[%c0_191, %c0_192, %c0_193] : memref<1x16x64xf32, #tpu.memory_space<vmem>>, vector<1x16x64xf32>
      %390 = vector.shape_cast %389 : vector<1x16x64xf32> to vector<16x64xf32>
      %c0_194 = arith.constant 0 : index
      %c0_195 = arith.constant 0 : index
      %391 = vector.load %arg43[%c0_194, %c0_195] : memref<16x64xf32, #tpu.memory_space<vmem>>, vector<16x64xf32>
      tpu.vector_store %arg43[%c0_194, %c0_195], %390 {strides = array<i32>} : memref<16x64xf32, #tpu.memory_space<vmem>>, vector<16x64xf32>,
    } else {
    }
    %c0 = arith.constant 0 : index
    %c0_1 = arith.constant 0 : index
    %3 = vector.load %arg43[%c0, %c0_1] : memref<16x64xf32, #tpu.memory_space<vmem>>, vector<16x64xf32>
    %c0_2 = arith.constant 0 : index
    %c0_3 = arith.constant 0 : index
    %c0_4 = arith.constant 0 : index
    %4 = vector.load %arg3[%c0_2, %c0_3, %c0_4] : memref<1x16x64xf32, #tpu.memory_space<vmem>>, vector<1x16x64xf32>
    %5 = vector.shape_cast %4 : vector<1x16x64xf32> to vector<16x64xf32>
    %c0_5 = arith.constant 0 : index
    %c0_6 = arith.constant 0 : index
    %c0_7 = arith.constant 0 : index
    %6 = vector.load %arg4[%c0_5, %c0_6, %c0_7] : memref<1x64x64xf32, #tpu.memory_space<vmem>>, vector<1x64x64xf32>
    %7 = vector.shape_cast %6 : vector<1x64x64xf32> to vector<64x64xf32>
    %c0_8 = arith.constant 0 : index
    %c0_9 = arith.constant 0 : index
    %c0_10 = arith.constant 0 : index
    %8 = vector.load %arg5[%c0_8, %c0_9, %c0_10] : memref<1x64x64xf32, #tpu.memory_space<vmem>>, vector<1x64x64xf32>
    %9 = vector.shape_cast %8 : vector<1x64x64xf32> to vector<64x64xf32>
    %10 = arith.addf %3, %5 : vector<16x64xf32>
    %c0_11 = arith.constant 0 : index
    %c0_12 = arith.constant 0 : index
    %c0_13 = arith.constant 0 : index
    %11 = vector.load %arg7[%c0_11, %c0_12, %c0_13] : memref<1x64x64xbf16, #tpu.memory_space<vmem>>, vector<1x64x64xbf16>
    %12 = vector.shape_cast %11 : vector<1x64x64xbf16> to vector<64x64xbf16>
    %c0_14 = arith.constant 0 : index
    %c0_15 = arith.constant 0 : index
    %c0_16 = arith.constant 0 : index
    %13 = vector.load %arg8[%c0_14, %c0_15, %c0_16] : memref<1x1x64xf32, #tpu.memory_space<vmem>>, vector<1x1x64xf32>
    %14 = vector.shape_cast %13 : vector<1x1x64xf32> to vector<1x64xf32>
    %c0_17 = arith.constant 0 : index
    %c0_18 = arith.constant 0 : index
    %c0_19 = arith.constant 0 : index
    %15 = vector.load %arg9[%c0_17, %c0_18, %c0_19] : memref<1x64x64xbf16, #tpu.memory_space<vmem>>, vector<1x64x64xbf16>
    %16 = vector.shape_cast %15 : vector<1x64x64xbf16> to vector<64x64xbf16>
    %c0_20 = arith.constant 0 : index
    %c0_21 = arith.constant 0 : index
    %c0_22 = arith.constant 0 : index
    %17 = vector.load %arg10[%c0_20, %c0_21, %c0_22] : memref<1x1x64xf32, #tpu.memory_space<vmem>>, vector<1x1x64xf32>
    %18 = vector.shape_cast %17 : vector<1x1x64xf32> to vector<1x64xf32>
    %c0_23 = arith.constant 0 : index
    %c0_24 = arith.constant 0 : index
    %c0_25 = arith.constant 0 : index
    %19 = vector.load %arg11[%c0_23, %c0_24, %c0_25] : memref<1x64x64xbf16, #tpu.memory_space<vmem>>, vector<1x64x64xbf16>
    %20 = vector.shape_cast %19 : vector<1x64x64xbf16> to vector<64x64xbf16>
    %c0_26 = arith.constant 0 : index
    %c0_27 = arith.constant 0 : index
    %c0_28 = arith.constant 0 : index
    %21 = vector.load %arg12[%c0_26, %c0_27, %c0_28] : memref<1x1x64xf32, #tpu.memory_space<vmem>>, vector<1x1x64xf32>
    %22 = vector.shape_cast %21 : vector<1x1x64xf32> to vector<1x64xf32>
    %c0_29 = arith.constant 0 : index
    %c0_30 = arith.constant 0 : index
    %c0_31 = arith.constant 0 : index
    %23 = vector.load %arg13[%c0_29, %c0_30, %c0_31] : memref<1x64x64xbf16, #tpu.memory_space<vmem>>, vector<1x64x64xbf16>
    %24 = vector.shape_cast %23 : vector<1x64x64xbf16> to vector<64x64xbf16>
    %c0_32 = arith.constant 0 : index
    %c0_33 = arith.constant 0 : index
    %c0_34 = arith.constant 0 : index
    %25 = vector.load %arg14[%c0_32, %c0_33, %c0_34] : memref<1x1x64xf32, #tpu.memory_space<vmem>>, vector<1x1x64xf32>
    %26 = vector.shape_cast %25 : vector<1x1x64xf32> to vector<1x64xf32>
    %27 = arith.truncf %10 : vector<16x64xf32> to vector<16x64xbf16>
    %cst = arith.constant dense<0.000000e+00> : vector<16x64xf32>
    %28 = tpu.matmul %27, %12, %cst {dimension_numbers = #tpu.dot_dimension_numbers<[1], [0], [0], [1], [0, 0, 1, 1], [], []>} : vector<16x64xbf16>, vector<64x64xbf16>, vector<16x64xf32> -> vector<16x64xf32>
    %29 = vector.broadcast %14 : vector<1x64xf32> to vector<16x64xf32>
    %30 = arith.addf %28, %29 : vector<16x64xf32>
    %31 = arith.truncf %10 : vector<16x64xf32> to vector<16x64xbf16>
    %cst_35 = arith.constant dense<0.000000e+00> : vector<16x64xf32>
    %32 = tpu.matmul %31, %16, %cst_35 {dimension_numbers = #tpu.dot_dimension_numbers<[1], [0], [0], [1], [0, 0, 1, 1], [], []>} : vector<16x64xbf16>, vector<64x64xbf16>, vector<16x64xf32> -> vector<16x64xf32>
    %33 = vector.broadcast %18 : vector<1x64xf32> to vector<16x64xf32>
    %34 = arith.addf %32, %33 : vector<16x64xf32>
    %35 = arith.truncf %3 : vector<16x64xf32> to vector<16x64xbf16>
    %cst_36 = arith.constant dense<0.000000e+00> : vector<16x64xf32>
    %36 = tpu.matmul %35, %20, %cst_36 {dimension_numbers = #tpu.dot_dimension_numbers<[1], [0], [0], [1], [0, 0, 1, 1], [], []>} : vector<16x64xbf16>, vector<64x64xbf16>, vector<16x64xf32> -> vector<16x64xf32>
    %37 = vector.broadcast %22 : vector<1x64xf32> to vector<16x64xf32>
    %38 = arith.addf %36, %37 : vector<16x64xf32>
    %39 = vector.extract_strided_slice %30 {offsets = [0, 0], sizes = [16, 16], strides = [1, 1]} : vector<16x64xf32> to vector<16x16xf32>
    %40 = arith.truncf %39 : vector<16x16xf32> to vector<16x16xbf16>
    %41 = vector.extract_strided_slice %34 {offsets = [0, 0], sizes = [16, 16], strides = [1, 1]} : vector<16x64xf32> to vector<16x16xf32>
    %42 = arith.truncf %41 : vector<16x16xf32> to vector<16x16xbf16>
    %43 = vector.extract_strided_slice %38 {offsets = [0, 0], sizes = [16, 16], strides = [1, 1]} : vector<16x64xf32> to vector<16x16xf32>
    %44 = arith.truncf %43 : vector<16x16xf32> to vector<16x16xbf16>
    %cst_37 = arith.constant dense<0.000000e+00> : vector<16x16xf32>
    %45 = tpu.matmul %40, %42, %cst_37 {dimension_numbers = #tpu.dot_dimension_numbers<[1], [1], [0], [0], [0, 0, 1, 0], [], []>} : vector<16x16xbf16>, vector<16x16xbf16>, vector<16x16xf32> -> vector<16x16xf32>
    %cst_38 = arith.constant 2.500000e-01 : f32
    %46 = vector.broadcast %cst_38 : f32 to vector<16x16xf32>
    %47 = arith.mulf %45, %46 : vector<16x16xf32>
    %cst_39 = arith.constant dense<0xFF800000> : vector<16xf32>
    %48 = vector.multi_reduction <maximumf>, %47, %cst_39 [1] : vector<16x16xf32> to vector<16xf32>
    %49 = vector.shape_cast %48 : vector<16xf32> to vector<16x1xf32>
    %50 = vector.broadcast %49 : vector<16x1xf32> to vector<16x16xf32>
    %51 = arith.subf %47, %50 : vector<16x16xf32>
    %52 = math.exp %51 : vector<16x16xf32>
    %cst_40 = arith.constant dense<0.000000e+00> : vector<16xf32>
    %53 = vector.multi_reduction <add>, %52, %cst_40 [1] : vector<16x16xf32> to vector<16xf32>
    %54 = vector.shape_cast %53 : vector<16xf32> to vector<16x1xf32>
    %55 = tpu.reciprocal %54 {approx = true} : vector<16x1xf32> -> vector<16x1xf32>
    %56 = vector.broadcast %55 : vector<16x1xf32> to vector<16x16xf32>
    %57 = arith.mulf %52, %56 : vector<16x16xf32>
    %58 = arith.truncf %57 : vector<16x16xf32> to vector<16x16xbf16>
    %cst_41 = arith.constant dense<0.000000e+00> : vector<16x16xf32>
    %59 = tpu.matmul %58, %44, %cst_41 {dimension_numbers = #tpu.dot_dimension_numbers<[1], [0], [0], [1], [0, 0, 1, 1], [], []>} : vector<16x16xbf16>, vector<16x16xbf16>, vector<16x16xf32> -> vector<16x16xf32>
    %60 = vector.extract_strided_slice %30 {offsets = [0, 16], sizes = [16, 16], strides = [1, 1]} : vector<16x64xf32> to vector<16x16xf32>
    %61 = arith.truncf %60 : vector<16x16xf32> to vector<16x16xbf16>
    %62 = vector.extract_strided_slice %34 {offsets = [0, 16], sizes = [16, 16], strides = [1, 1]} : vector<16x64xf32> to vector<16x16xf32>
    %63 = arith.truncf %62 : vector<16x16xf32> to vector<16x16xbf16>
    %64 = vector.extract_strided_slice %38 {offsets = [0, 16], sizes = [16, 16], strides = [1, 1]} : vector<16x64xf32> to vector<16x16xf32>
    %65 = arith.truncf %64 : vector<16x16xf32> to vector<16x16xbf16>
    %cst_42 = arith.constant dense<0.000000e+00> : vector<16x16xf32>
    %66 = tpu.matmul %61, %63, %cst_42 {dimension_numbers = #tpu.dot_dimension_numbers<[1], [1], [0], [0], [0, 0, 1, 0], [], []>} : vector<16x16xbf16>, vector<16x16xbf16>, vector<16x16xf32> -> vector<16x16xf32>
    %cst_43 = arith.constant 2.500000e-01 : f32
    %67 = vector.broadcast %cst_43 : f32 to vector<16x16xf32>
    %68 = arith.mulf %66, %67 : vector<16x16xf32>
    %cst_44 = arith.constant dense<0xFF800000> : vector<16xf32>
    %69 = vector.multi_reduction <maximumf>, %68, %cst_44 [1] : vector<16x16xf32> to vector<16xf32>
    %70 = vector.shape_cast %69 : vector<16xf32> to vector<16x1xf32>
    %71 = vector.broadcast %70 : vector<16x1xf32> to vector<16x16xf32>
    %72 = arith.subf %68, %71 : vector<16x16xf32>
    %73 = math.exp %72 : vector<16x16xf32>
    %cst_45 = arith.constant dense<0.000000e+00> : vector<16xf32>
    %74 = vector.multi_reduction <add>, %73, %cst_45 [1] : vector<16x16xf32> to vector<16xf32>
    %75 = vector.shape_cast %74 : vector<16xf32> to vector<16x1xf32>
    %76 = tpu.reciprocal %75 {approx = true} : vector<16x1xf32> -> vector<16x1xf32>
    %77 = vector.broadcast %76 : vector<16x1xf32> to vector<16x16xf32>
    %78 = arith.mulf %73, %77 : vector<16x16xf32>
    %79 = arith.truncf %78 : vector<16x16xf32> to vector<16x16xbf16>
    %cst_46 = arith.constant dense<0.000000e+00> : vector<16x16xf32>
    %80 = tpu.matmul %79, %65, %cst_46 {dimension_numbers = #tpu.dot_dimension_numbers<[1], [0], [0], [1], [0, 0, 1, 1], [], []>} : vector<16x16xbf16>, vector<16x16xbf16>, vector<16x16xf32> -> vector<16x16xf32>
    %81 = vector.extract_strided_slice %30 {offsets = [0, 32], sizes = [16, 16], strides = [1, 1]} : vector<16x64xf32> to vector<16x16xf32>
    %82 = arith.truncf %81 : vector<16x16xf32> to vector<16x16xbf16>
    %83 = vector.extract_strided_slice %34 {offsets = [0, 32], sizes = [16, 16], strides = [1, 1]} : vector<16x64xf32> to vector<16x16xf32>
    %84 = arith.truncf %83 : vector<16x16xf32> to vector<16x16xbf16>
    %85 = vector.extract_strided_slice %38 {offsets = [0, 32], sizes = [16, 16], strides = [1, 1]} : vector<16x64xf32> to vector<16x16xf32>
    %86 = arith.truncf %85 : vector<16x16xf32> to vector<16x16xbf16>
    %cst_47 = arith.constant dense<0.000000e+00> : vector<16x16xf32>
    %87 = tpu.matmul %82, %84, %cst_47 {dimension_numbers = #tpu.dot_dimension_numbers<[1], [1], [0], [0], [0, 0, 1, 0], [], []>} : vector<16x16xbf16>, vector<16x16xbf16>, vector<16x16xf32> -> vector<16x16xf32>
    %cst_48 = arith.constant 2.500000e-01 : f32
    %88 = vector.broadcast %cst_48 : f32 to vector<16x16xf32>
    %89 = arith.mulf %87, %88 : vector<16x16xf32>
    %cst_49 = arith.constant dense<0xFF800000> : vector<16xf32>
    %90 = vector.multi_reduction <maximumf>, %89, %cst_49 [1] : vector<16x16xf32> to vector<16xf32>
    %91 = vector.shape_cast %90 : vector<16xf32> to vector<16x1xf32>
    %92 = vector.broadcast %91 : vector<16x1xf32> to vector<16x16xf32>
    %93 = arith.subf %89, %92 : vector<16x16xf32>
    %94 = math.exp %93 : vector<16x16xf32>
    %cst_50 = arith.constant dense<0.000000e+00> : vector<16xf32>
    %95 = vector.multi_reduction <add>, %94, %cst_50 [1] : vector<16x16xf32> to vector<16xf32>
    %96 = vector.shape_cast %95 : vector<16xf32> to vector<16x1xf32>
    %97 = tpu.reciprocal %96 {approx = true} : vector<16x1xf32> -> vector<16x1xf32>
    %98 = vector.broadcast %97 : vector<16x1xf32> to vector<16x16xf32>
    %99 = arith.mulf %94, %98 : vector<16x16xf32>
    %100 = arith.truncf %99 : vector<16x16xf32> to vector<16x16xbf16>
    %cst_51 = arith.constant dense<0.000000e+00> : vector<16x16xf32>
    %101 = tpu.matmul %100, %86, %cst_51 {dimension_numbers = #tpu.dot_dimension_numbers<[1], [0], [0], [1], [0, 0, 1, 1], [], []>} : vector<16x16xbf16>, vector<16x16xbf16>, vector<16x16xf32> -> vector<16x16xf32>
    %102 = vector.extract_strided_slice %30 {offsets = [0, 48], sizes = [16, 16], strides = [1, 1]} : vector<16x64xf32> to vector<16x16xf32>
    %103 = arith.truncf %102 : vector<16x16xf32> to vector<16x16xbf16>
    %104 = vector.extract_strided_slice %34 {offsets = [0, 48], sizes = [16, 16], strides = [1, 1]} : vector<16x64xf32> to vector<16x16xf32>
    %105 = arith.truncf %104 : vector<16x16xf32> to vector<16x16xbf16>
    %106 = vector.extract_strided_slice %38 {offsets = [0, 48], sizes = [16, 16], strides = [1, 1]} : vector<16x64xf32> to vector<16x16xf32>
    %107 = arith.truncf %106 : vector<16x16xf32> to vector<16x16xbf16>
    %cst_52 = arith.constant dense<0.000000e+00> : vector<16x16xf32>
    %108 = tpu.matmul %103, %105, %cst_52 {dimension_numbers = #tpu.dot_dimension_numbers<[1], [1], [0], [0], [0, 0, 1, 0], [], []>} : vector<16x16xbf16>, vector<16x16xbf16>, vector<16x16xf32> -> vector<16x16xf32>
    %cst_53 = arith.constant 2.500000e-01 : f32
    %109 = vector.broadcast %cst_53 : f32 to vector<16x16xf32>
    %110 = arith.mulf %108, %109 : vector<16x16xf32>
    %cst_54 = arith.constant dense<0xFF800000> : vector<16xf32>
    %111 = vector.multi_reduction <maximumf>, %110, %cst_54 [1] : vector<16x16xf32> to vector<16xf32>
    %112 = vector.shape_cast %111 : vector<16xf32> to vector<16x1xf32>
    %113 = vector.broadcast %112 : vector<16x1xf32> to vector<16x16xf32>
    %114 = arith.subf %110, %113 : vector<16x16xf32>
    %115 = math.exp %114 : vector<16x16xf32>
    %cst_55 = arith.constant dense<0.000000e+00> : vector<16xf32>
    %116 = vector.multi_reduction <add>, %115, %cst_55 [1] : vector<16x16xf32> to vector<16xf32>
    %117 = vector.shape_cast %116 : vector<16xf32> to vector<16x1xf32>
    %118 = tpu.reciprocal %117 {approx = true} : vector<16x1xf32> -> vector<16x1xf32>
    %119 = vector.broadcast %118 : vector<16x1xf32> to vector<16x16xf32>
    %120 = arith.mulf %115, %119 : vector<16x16xf32>
    %121 = arith.truncf %120 : vector<16x16xf32> to vector<16x16xbf16>
    %cst_56 = arith.constant dense<0.000000e+00> : vector<16x16xf32>
    %122 = tpu.matmul %121, %107, %cst_56 {dimension_numbers = #tpu.dot_dimension_numbers<[1], [0], [0], [1], [0, 0, 1, 1], [], []>} : vector<16x16xbf16>, vector<16x16xbf16>, vector<16x16xf32> -> vector<16x16xf32>
    %123 = tpu.concatenate %59, %80, %101, %122 in 1 : vector<16x16xf32>, vector<16x16xf32>, vector<16x16xf32>, vector<16x16xf32> -> vector<16x64xf32>
    %124 = arith.truncf %123 : vector<16x64xf32> to vector<16x64xbf16>
    %cst_57 = arith.constant dense<0.000000e+00> : vector<16x64xf32>
    %125 = tpu.matmul %124, %24, %cst_57 {dimension_numbers = #tpu.dot_dimension_numbers<[1], [0], [0], [1], [0, 0, 1, 1], [], []>} : vector<16x64xbf16>, vector<64x64xbf16>, vector<16x64xf32> -> vector<16x64xf32>
    %126 = vector.broadcast %26 : vector<1x64xf32> to vector<16x64xf32>
    %127 = arith.addf %125, %126 : vector<16x64xf32>
    %128 = arith.addf %3, %127 : vector<16x64xf32>
    %c0_58 = arith.constant 0 : index
    %c0_59 = arith.constant 0 : index
    %c0_60 = arith.constant 0 : index
    %129 = vector.load %arg15[%c0_58, %c0_59, %c0_60] : memref<1x1x64xf32, #tpu.memory_space<vmem>>, vector<1x1x64xf32>
    %130 = vector.shape_cast %129 : vector<1x1x64xf32> to vector<1x64xf32>
    %c0_61 = arith.constant 0 : index
    %c0_62 = arith.constant 0 : index
    %c0_63 = arith.constant 0 : index
    %131 = vector.load %arg16[%c0_61, %c0_62, %c0_63] : memref<1x1x64xf32, #tpu.memory_space<vmem>>, vector<1x1x64xf32>
    %132 = vector.shape_cast %131 : vector<1x1x64xf32> to vector<1x64xf32>
    %cst_64 = arith.constant dense<0.000000e+00> : vector<16xf32>
    %133 = vector.multi_reduction <add>, %128, %cst_64 [1] : vector<16x64xf32> to vector<16xf32>
    %134 = vector.shape_cast %133 : vector<16xf32> to vector<16x1xf32>
    %cst_65 = arith.constant 6.400000e+01 : f32
    %135 = vector.broadcast %cst_65 : f32 to vector<16x1xf32>
    %136 = arith.divf %134, %135 : vector<16x1xf32>
    %137 = vector.broadcast %136 : vector<16x1xf32> to vector<16x64xf32>
    %138 = arith.subf %128, %137 : vector<16x64xf32>
    %139 = arith.mulf %138, %138 : vector<16x64xf32>
    %cst_66 = arith.constant dense<0.000000e+00> : vector<16xf32>
    %140 = vector.multi_reduction <add>, %139, %cst_66 [1] : vector<16x64xf32> to vector<16xf32>
    %141 = vector.shape_cast %140 : vector<16xf32> to vector<16x1xf32>
    %cst_67 = arith.constant 6.400000e+01 : f32
    %142 = vector.broadcast %cst_67 : f32 to vector<16x1xf32>
    %143 = arith.divf %141, %142 : vector<16x1xf32>
    %144 = vector.broadcast %136 : vector<16x1xf32> to vector<16x64xf32>
    %145 = arith.subf %128, %144 : vector<16x64xf32>
    %cst_68 = arith.constant 9.99999974E-6 : f32
    %146 = vector.broadcast %cst_68 : f32 to vector<16x1xf32>
    %147 = arith.addf %143, %146 : vector<16x1xf32>
    %148 = math.rsqrt %147 : vector<16x1xf32>
    %149 = vector.broadcast %148 : vector<16x1xf32> to vector<16x64xf32>
    %150 = arith.mulf %145, %149 : vector<16x64xf32>
    %151 = vector.broadcast %130 : vector<1x64xf32> to vector<16x64xf32>
    %152 = arith.mulf %150, %151 : vector<16x64xf32>
    %153 = vector.broadcast %132 : vector<1x64xf32> to vector<16x64xf32>
    %154 = arith.addf %152, %153 : vector<16x64xf32>
    %155 = arith.addf %154, %5 : vector<16x64xf32>
    %156 = arith.addf %7, %9 : vector<64x64xf32>
    %c0_69 = arith.constant 0 : index
    %c0_70 = arith.constant 0 : index
    %c0_71 = arith.constant 0 : index
    %157 = vector.load %arg17[%c0_69, %c0_70, %c0_71] : memref<1x64x64xbf16, #tpu.memory_space<vmem>>, vector<1x64x64xbf16>
    %158 = vector.shape_cast %157 : vector<1x64x64xbf16> to vector<64x64xbf16>
    %c0_72 = arith.constant 0 : index
    %c0_73 = arith.constant 0 : index
    %c0_74 = arith.constant 0 : index
    %159 = vector.load %arg18[%c0_72, %c0_73, %c0_74] : memref<1x1x64xf32, #tpu.memory_space<vmem>>, vector<1x1x64xf32>
    %160 = vector.shape_cast %159 : vector<1x1x64xf32> to vector<1x64xf32>
    %c0_75 = arith.constant 0 : index
    %c0_76 = arith.constant 0 : index
    %c0_77 = arith.constant 0 : index
    %161 = vector.load %arg19[%c0_75, %c0_76, %c0_77] : memref<1x64x64xbf16, #tpu.memory_space<vmem>>, vector<1x64x64xbf16>
    %162 = vector.shape_cast %161 : vector<1x64x64xbf16> to vector<64x64xbf16>
    %c0_78 = arith.constant 0 : index
    %c0_79 = arith.constant 0 : index
    %c0_80 = arith.constant 0 : index
    %163 = vector.load %arg20[%c0_78, %c0_79, %c0_80] : memref<1x1x64xf32, #tpu.memory_space<vmem>>, vector<1x1x64xf32>
    %164 = vector.shape_cast %163 : vector<1x1x64xf32> to vector<1x64xf32>
    %c0_81 = arith.constant 0 : index
    %c0_82 = arith.constant 0 : index
    %c0_83 = arith.constant 0 : index
    %165 = vector.load %arg21[%c0_81, %c0_82, %c0_83] : memref<1x64x64xbf16, #tpu.memory_space<vmem>>, vector<1x64x64xbf16>
    %166 = vector.shape_cast %165 : vector<1x64x64xbf16> to vector<64x64xbf16>
    %c0_84 = arith.constant 0 : index
    %c0_85 = arith.constant 0 : index
    %c0_86 = arith.constant 0 : index
    %167 = vector.load %arg22[%c0_84, %c0_85, %c0_86] : memref<1x1x64xf32, #tpu.memory_space<vmem>>, vector<1x1x64xf32>
    %168 = vector.shape_cast %167 : vector<1x1x64xf32> to vector<1x64xf32>
    %c0_87 = arith.constant 0 : index
    %c0_88 = arith.constant 0 : index
    %c0_89 = arith.constant 0 : index
    %169 = vector.load %arg23[%c0_87, %c0_88, %c0_89] : memref<1x64x64xbf16, #tpu.memory_space<vmem>>, vector<1x64x64xbf16>
    %170 = vector.shape_cast %169 : vector<1x64x64xbf16> to vector<64x64xbf16>
    %c0_90 = arith.constant 0 : index
    %c0_91 = arith.constant 0 : index
    %c0_92 = arith.constant 0 : index
    %171 = vector.load %arg24[%c0_90, %c0_91, %c0_92] : memref<1x1x64xf32, #tpu.memory_space<vmem>>, vector<1x1x64xf32>
    %172 = vector.shape_cast %171 : vector<1x1x64xf32> to vector<1x64xf32>
    %173 = arith.truncf %155 : vector<16x64xf32> to vector<16x64xbf16>
    %cst_93 = arith.constant dense<0.000000e+00> : vector<16x64xf32>
    %174 = tpu.matmul %173, %158, %cst_93 {dimension_numbers = #tpu.dot_dimension_numbers<[1], [0], [0], [1], [0, 0, 1, 1], [], []>} : vector<16x64xbf16>, vector<64x64xbf16>, vector<16x64xf32> -> vector<16x64xf32>
    %175 = vector.broadcast %160 : vector<1x64xf32> to vector<16x64xf32>
    %176 = arith.addf %174, %175 : vector<16x64xf32>
    %177 = arith.truncf %156 : vector<64x64xf32> to vector<64x64xbf16>
    %cst_94 = arith.constant dense<0.000000e+00> : vector<64x64xf32>
    %178 = tpu.matmul %177, %162, %cst_94 {dimension_numbers = #tpu.dot_dimension_numbers<[1], [0], [0], [1], [0, 0, 1, 1], [], []>} : vector<64x64xbf16>, vector<64x64xbf16>, vector<64x64xf32> -> vector<64x64xf32>
    %179 = vector.broadcast %164 : vector<1x64xf32> to vector<64x64xf32>
    %180 = arith.addf %178, %179 : vector<64x64xf32>
    %181 = arith.truncf %7 : vector<64x64xf32> to vector<64x64xbf16>
    %cst_95 = arith.constant dense<0.000000e+00> : vector<64x64xf32>
    %182 = tpu.matmul %181, %166, %cst_95 {dimension_numbers = #tpu.dot_dimension_numbers<[1], [0], [0], [1], [0, 0, 1, 1], [], []>} : vector<64x64xbf16>, vector<64x64xbf16>, vector<64x64xf32> -> vector<64x64xf32>
    %183 = vector.broadcast %168 : vector<1x64xf32> to vector<64x64xf32>
    %184 = arith.addf %182, %183 : vector<64x64xf32>
    %185 = vector.extract_strided_slice %176 {offsets = [0, 0], sizes = [16, 16], strides = [1, 1]} : vector<16x64xf32> to vector<16x16xf32>
    %186 = arith.truncf %185 : vector<16x16xf32> to vector<16x16xbf16>
    %187 = vector.extract_strided_slice %180 {offsets = [0, 0], sizes = [64, 16], strides = [1, 1]} : vector<64x64xf32> to vector<64x16xf32>
    %188 = arith.truncf %187 : vector<64x16xf32> to vector<64x16xbf16>
    %189 = vector.extract_strided_slice %184 {offsets = [0, 0], sizes = [64, 16], strides = [1, 1]} : vector<64x64xf32> to vector<64x16xf32>
    %190 = arith.truncf %189 : vector<64x16xf32> to vector<64x16xbf16>
    %cst_96 = arith.constant dense<0.000000e+00> : vector<16x64xf32>
    %191 = tpu.matmul %186, %188, %cst_96 {dimension_numbers = #tpu.dot_dimension_numbers<[1], [1], [0], [0], [0, 0, 1, 0], [], []>} : vector<16x16xbf16>, vector<64x16xbf16>, vector<16x64xf32> -> vector<16x64xf32>
    %cst_97 = arith.constant 2.500000e-01 : f32
    %192 = vector.broadcast %cst_97 : f32 to vector<16x64xf32>
    %193 = arith.mulf %191, %192 : vector<16x64xf32>
    %cst_98 = arith.constant dense<0xFF800000> : vector<16xf32>
    %194 = vector.multi_reduction <maximumf>, %193, %cst_98 [1] : vector<16x64xf32> to vector<16xf32>
    %195 = vector.shape_cast %194 : vector<16xf32> to vector<16x1xf32>
    %196 = vector.broadcast %195 : vector<16x1xf32> to vector<16x64xf32>
    %197 = arith.subf %193, %196 : vector<16x64xf32>
    %198 = math.exp %197 : vector<16x64xf32>
    %cst_99 = arith.constant dense<0.000000e+00> : vector<16xf32>
    %199 = vector.multi_reduction <add>, %198, %cst_99 [1] : vector<16x64xf32> to vector<16xf32>
    %200 = vector.shape_cast %199 : vector<16xf32> to vector<16x1xf32>
    %201 = tpu.reciprocal %200 {approx = true} : vector<16x1xf32> -> vector<16x1xf32>
    %202 = vector.broadcast %201 : vector<16x1xf32> to vector<16x64xf32>
    %203 = arith.mulf %198, %202 : vector<16x64xf32>
    %204 = arith.truncf %203 : vector<16x64xf32> to vector<16x64xbf16>
    %cst_100 = arith.constant dense<0.000000e+00> : vector<16x16xf32>
    %205 = tpu.matmul %204, %190, %cst_100 {dimension_numbers = #tpu.dot_dimension_numbers<[1], [0], [0], [1], [0, 0, 1, 1], [], []>} : vector<16x64xbf16>, vector<64x16xbf16>, vector<16x16xf32> -> vector<16x16xf32>
    %206 = vector.extract_strided_slice %176 {offsets = [0, 16], sizes = [16, 16], strides = [1, 1]} : vector<16x64xf32> to vector<16x16xf32>
    %207 = arith.truncf %206 : vector<16x16xf32> to vector<16x16xbf16>
    %208 = vector.extract_strided_slice %180 {offsets = [0, 16], sizes = [64, 16], strides = [1, 1]} : vector<64x64xf32> to vector<64x16xf32>
    %209 = arith.truncf %208 : vector<64x16xf32> to vector<64x16xbf16>
    %210 = vector.extract_strided_slice %184 {offsets = [0, 16], sizes = [64, 16], strides = [1, 1]} : vector<64x64xf32> to vector<64x16xf32>
    %211 = arith.truncf %210 : vector<64x16xf32> to vector<64x16xbf16>
    %cst_101 = arith.constant dense<0.000000e+00> : vector<16x64xf32>
    %212 = tpu.matmul %207, %209, %cst_101 {dimension_numbers = #tpu.dot_dimension_numbers<[1], [1], [0], [0], [0, 0, 1, 0], [], []>} : vector<16x16xbf16>, vector<64x16xbf16>, vector<16x64xf32> -> vector<16x64xf32>
    %cst_102 = arith.constant 2.500000e-01 : f32
    %213 = vector.broadcast %cst_102 : f32 to vector<16x64xf32>
    %214 = arith.mulf %212, %213 : vector<16x64xf32>
    %cst_103 = arith.constant dense<0xFF800000> : vector<16xf32>
    %215 = vector.multi_reduction <maximumf>, %214, %cst_103 [1] : vector<16x64xf32> to vector<16xf32>
    %216 = vector.shape_cast %215 : vector<16xf32> to vector<16x1xf32>
    %217 = vector.broadcast %216 : vector<16x1xf32> to vector<16x64xf32>
    %218 = arith.subf %214, %217 : vector<16x64xf32>
    %219 = math.exp %218 : vector<16x64xf32>
    %cst_104 = arith.constant dense<0.000000e+00> : vector<16xf32>
    %220 = vector.multi_reduction <add>, %219, %cst_104 [1] : vector<16x64xf32> to vector<16xf32>
    %221 = vector.shape_cast %220 : vector<16xf32> to vector<16x1xf32>
    %222 = tpu.reciprocal %221 {approx = true} : vector<16x1xf32> -> vector<16x1xf32>
    %223 = vector.broadcast %222 : vector<16x1xf32> to vector<16x64xf32>
    %224 = arith.mulf %219, %223 : vector<16x64xf32>
    %225 = arith.truncf %224 : vector<16x64xf32> to vector<16x64xbf16>
    %cst_105 = arith.constant dense<0.000000e+00> : vector<16x16xf32>
    %226 = tpu.matmul %225, %211, %cst_105 {dimension_numbers = #tpu.dot_dimension_numbers<[1], [0], [0], [1], [0, 0, 1, 1], [], []>} : vector<16x64xbf16>, vector<64x16xbf16>, vector<16x16xf32> -> vector<16x16xf32>
    %227 = vector.extract_strided_slice %176 {offsets = [0, 32], sizes = [16, 16], strides = [1, 1]} : vector<16x64xf32> to vector<16x16xf32>
    %228 = arith.truncf %227 : vector<16x16xf32> to vector<16x16xbf16>
    %229 = vector.extract_strided_slice %180 {offsets = [0, 32], sizes = [64, 16], strides = [1, 1]} : vector<64x64xf32> to vector<64x16xf32>
    %230 = arith.truncf %229 : vector<64x16xf32> to vector<64x16xbf16>
    %231 = vector.extract_strided_slice %184 {offsets = [0, 32], sizes = [64, 16], strides = [1, 1]} : vector<64x64xf32> to vector<64x16xf32>
    %232 = arith.truncf %231 : vector<64x16xf32> to vector<64x16xbf16>
    %cst_106 = arith.constant dense<0.000000e+00> : vector<16x64xf32>
    %233 = tpu.matmul %228, %230, %cst_106 {dimension_numbers = #tpu.dot_dimension_numbers<[1], [1], [0], [0], [0, 0, 1, 0], [], []>} : vector<16x16xbf16>, vector<64x16xbf16>, vector<16x64xf32> -> vector<16x64xf32>
    %cst_107 = arith.constant 2.500000e-01 : f32
    %234 = vector.broadcast %cst_107 : f32 to vector<16x64xf32>
    %235 = arith.mulf %233, %234 : vector<16x64xf32>
    %cst_108 = arith.constant dense<0xFF800000> : vector<16xf32>
    %236 = vector.multi_reduction <maximumf>, %235, %cst_108 [1] : vector<16x64xf32> to vector<16xf32>
    %237 = vector.shape_cast %236 : vector<16xf32> to vector<16x1xf32>
    %238 = vector.broadcast %237 : vector<16x1xf32> to vector<16x64xf32>
    %239 = arith.subf %235, %238 : vector<16x64xf32>
    %240 = math.exp %239 : vector<16x64xf32>
    %cst_109 = arith.constant dense<0.000000e+00> : vector<16xf32>
    %241 = vector.multi_reduction <add>, %240, %cst_109 [1] : vector<16x64xf32> to vector<16xf32>
    %242 = vector.shape_cast %241 : vector<16xf32> to vector<16x1xf32>
    %243 = tpu.reciprocal %242 {approx = true} : vector<16x1xf32> -> vector<16x1xf32>
    %244 = vector.broadcast %243 : vector<16x1xf32> to vector<16x64xf32>
    %245 = arith.mulf %240, %244 : vector<16x64xf32>
    %246 = arith.truncf %245 : vector<16x64xf32> to vector<16x64xbf16>
    %cst_110 = arith.constant dense<0.000000e+00> : vector<16x16xf32>
    %247 = tpu.matmul %246, %232, %cst_110 {dimension_numbers = #tpu.dot_dimension_numbers<[1], [0], [0], [1], [0, 0, 1, 1], [], []>} : vector<16x64xbf16>, vector<64x16xbf16>, vector<16x16xf32> -> vector<16x16xf32>
    %248 = vector.extract_strided_slice %176 {offsets = [0, 48], sizes = [16, 16], strides = [1, 1]} : vector<16x64xf32> to vector<16x16xf32>
    %249 = arith.truncf %248 : vector<16x16xf32> to vector<16x16xbf16>
    %250 = vector.extract_strided_slice %180 {offsets = [0, 48], sizes = [64, 16], strides = [1, 1]} : vector<64x64xf32> to vector<64x16xf32>
    %251 = arith.truncf %250 : vector<64x16xf32> to vector<64x16xbf16>
    %252 = vector.extract_strided_slice %184 {offsets = [0, 48], sizes = [64, 16], strides = [1, 1]} : vector<64x64xf32> to vector<64x16xf32>
    %253 = arith.truncf %252 : vector<64x16xf32> to vector<64x16xbf16>
    %cst_111 = arith.constant dense<0.000000e+00> : vector<16x64xf32>
    %254 = tpu.matmul %249, %251, %cst_111 {dimension_numbers = #tpu.dot_dimension_numbers<[1], [1], [0], [0], [0, 0, 1, 0], [], []>} : vector<16x16xbf16>, vector<64x16xbf16>, vector<16x64xf32> -> vector<16x64xf32>
    %cst_112 = arith.constant 2.500000e-01 : f32
    %255 = vector.broadcast %cst_112 : f32 to vector<16x64xf32>
    %256 = arith.mulf %254, %255 : vector<16x64xf32>
    %cst_113 = arith.constant dense<0xFF800000> : vector<16xf32>
    %257 = vector.multi_reduction <maximumf>, %256, %cst_113 [1] : vector<16x64xf32> to vector<16xf32>
    %258 = vector.shape_cast %257 : vector<16xf32> to vector<16x1xf32>
    %259 = vector.broadcast %258 : vector<16x1xf32> to vector<16x64xf32>
    %260 = arith.subf %256, %259 : vector<16x64xf32>
    %261 = math.exp %260 : vector<16x64xf32>
    %cst_114 = arith.constant dense<0.000000e+00> : vector<16xf32>
    %262 = vector.multi_reduction <add>, %261, %cst_114 [1] : vector<16x64xf32> to vector<16xf32>
    %263 = vector.shape_cast %262 : vector<16xf32> to vector<16x1xf32>
    %264 = tpu.reciprocal %263 {approx = true} : vector<16x1xf32> -> vector<16x1xf32>
    %265 = vector.broadcast %264 : vector<16x1xf32> to vector<16x64xf32>
    %266 = arith.mulf %261, %265 : vector<16x64xf32>
    %267 = arith.truncf %266 : vector<16x64xf32> to vector<16x64xbf16>
    %cst_115 = arith.constant dense<0.000000e+00> : vector<16x16xf32>
    %268 = tpu.matmul %267, %253, %cst_115 {dimension_numbers = #tpu.dot_dimension_numbers<[1], [0], [0], [1], [0, 0, 1, 1], [], []>} : vector<16x64xbf16>, vector<64x16xbf16>, vector<16x16xf32> -> vector<16x16xf32>
    %269 = tpu.concatenate %205, %226, %247, %268 in 1 : vector<16x16xf32>, vector<16x16xf32>, vector<16x16xf32>, vector<16x16xf32> -> vector<16x64xf32>
    %270 = arith.truncf %269 : vector<16x64xf32> to vector<16x64xbf16>
    %cst_116 = arith.constant dense<0.000000e+00> : vector<16x64xf32>
    %271 = tpu.matmul %270, %170, %cst_116 {dimension_numbers = #tpu.dot_dimension_numbers<[1], [0], [0], [1], [0, 0, 1, 1], [], []>} : vector<16x64xbf16>, vector<64x64xbf16>, vector<16x64xf32> -> vector<16x64xf32>
    %272 = vector.broadcast %172 : vector<1x64xf32> to vector<16x64xf32>
    %273 = arith.addf %271, %272 : vector<16x64xf32>
    %274 = arith.addf %154, %273 : vector<16x64xf32>
    %c0_117 = arith.constant 0 : index
    %c0_118 = arith.constant 0 : index
    %c0_119 = arith.constant 0 : index
    %275 = vector.load %arg25[%c0_117, %c0_118, %c0_119] : memref<1x1x64xf32, #tpu.memory_space<vmem>>, vector<1x1x64xf32>
    %276 = vector.shape_cast %275 : vector<1x1x64xf32> to vector<1x64xf32>
    %c0_120 = arith.constant 0 : index
    %c0_121 = arith.constant 0 : index
    %c0_122 = arith.constant 0 : index
    %277 = vector.load %arg26[%c0_120, %c0_121, %c0_122] : memref<1x1x64xf32, #tpu.memory_space<vmem>>, vector<1x1x64xf32>
    %278 = vector.shape_cast %277 : vector<1x1x64xf32> to vector<1x64xf32>
    %cst_123 = arith.constant dense<0.000000e+00> : vector<16xf32>
    %279 = vector.multi_reduction <add>, %274, %cst_123 [1] : vector<16x64xf32> to vector<16xf32>
    %280 = vector.shape_cast %279 : vector<16xf32> to vector<16x1xf32>
    %cst_124 = arith.constant 6.400000e+01 : f32
    %281 = vector.broadcast %cst_124 : f32 to vector<16x1xf32>
    %282 = arith.divf %280, %281 : vector<16x1xf32>
    %283 = vector.broadcast %282 : vector<16x1xf32> to vector<16x64xf32>
    %284 = arith.subf %274, %283 : vector<16x64xf32>
    %285 = arith.mulf %284, %284 : vector<16x64xf32>
    %cst_125 = arith.constant dense<0.000000e+00> : vector<16xf32>
    %286 = vector.multi_reduction <add>, %285, %cst_125 [1] : vector<16x64xf32> to vector<16xf32>
    %287 = vector.shape_cast %286 : vector<16xf32> to vector<16x1xf32>
    %cst_126 = arith.constant 6.400000e+01 : f32
    %288 = vector.broadcast %cst_126 : f32 to vector<16x1xf32>
    %289 = arith.divf %287, %288 : vector<16x1xf32>
    %290 = vector.broadcast %282 : vector<16x1xf32> to vector<16x64xf32>
    %291 = arith.subf %274, %290 : vector<16x64xf32>
    %cst_127 = arith.constant 9.99999974E-6 : f32
    %292 = vector.broadcast %cst_127 : f32 to vector<16x1xf32>
    %293 = arith.addf %289, %292 : vector<16x1xf32>
    %294 = math.rsqrt %293 : vector<16x1xf32>
    %295 = vector.broadcast %294 : vector<16x1xf32> to vector<16x64xf32>
    %296 = arith.mulf %291, %295 : vector<16x64xf32>
    %297 = vector.broadcast %276 : vector<1x64xf32> to vector<16x64xf32>
    %298 = arith.mulf %296, %297 : vector<16x64xf32>
    %299 = vector.broadcast %278 : vector<1x64xf32> to vector<16x64xf32>
    %300 = arith.addf %298, %299 : vector<16x64xf32>
    %c0_128 = arith.constant 0 : index
    %c0_129 = arith.constant 0 : index
    %c0_130 = arith.constant 0 : index
    %301 = vector.load %arg27[%c0_128, %c0_129, %c0_130] : memref<1x64x128xbf16, #tpu.memory_space<vmem>>, vector<1x64x128xbf16>
    %302 = vector.shape_cast %301 : vector<1x64x128xbf16> to vector<64x128xbf16>
    %c0_131 = arith.constant 0 : index
    %c0_132 = arith.constant 0 : index
    %c0_133 = arith.constant 0 : index
    %303 = vector.load %arg28[%c0_131, %c0_132, %c0_133] : memref<1x1x128xf32, #tpu.memory_space<vmem>>, vector<1x1x128xf32>
    %304 = vector.shape_cast %303 : vector<1x1x128xf32> to vector<1x128xf32>
    %c0_134 = arith.constant 0 : index
    %c0_135 = arith.constant 0 : index
    %c0_136 = arith.constant 0 : index
    %305 = vector.load %arg29[%c0_134, %c0_135, %c0_136] : memref<1x128x64xbf16, #tpu.memory_space<vmem>>, vector<1x128x64xbf16>
    %306 = vector.shape_cast %305 : vector<1x128x64xbf16> to vector<128x64xbf16>
    %c0_137 = arith.constant 0 : index
    %c0_138 = arith.constant 0 : index
    %c0_139 = arith.constant 0 : index
    %307 = vector.load %arg30[%c0_137, %c0_138, %c0_139] : memref<1x1x64xf32, #tpu.memory_space<vmem>>, vector<1x1x64xf32>
    %308 = vector.shape_cast %307 : vector<1x1x64xf32> to vector<1x64xf32>
    %309 = arith.truncf %300 : vector<16x64xf32> to vector<16x64xbf16>
    %cst_140 = arith.constant dense<0.000000e+00> : vector<16x128xf32>
    %310 = tpu.matmul %309, %302, %cst_140 {dimension_numbers = #tpu.dot_dimension_numbers<[1], [0], [0], [1], [0, 0, 1, 1], [], []>} : vector<16x64xbf16>, vector<64x128xbf16>, vector<16x128xf32> -> vector<16x128xf32>
    %311 = vector.broadcast %304 : vector<1x128xf32> to vector<16x128xf32>
    %312 = arith.addf %310, %311 : vector<16x128xf32>
    %cst_141 = arith.constant 0.000000e+00 : f32
    %313 = vector.broadcast %cst_141 : f32 to vector<16x128xf32>
    %314 = arith.maximumf %312, %313 : vector<16x128xf32>
    %315 = arith.truncf %314 : vector<16x128xf32> to vector<16x128xbf16>
    %cst_142 = arith.constant dense<0.000000e+00> : vector<16x64xf32>
    %316 = tpu.matmul %315, %306, %cst_142 {dimension_numbers = #tpu.dot_dimension_numbers<[1], [0], [0], [1], [0, 0, 1, 1], [], []>} : vector<16x128xbf16>, vector<128x64xbf16>, vector<16x64xf32> -> vector<16x64xf32>
    %317 = vector.broadcast %308 : vector<1x64xf32> to vector<16x64xf32>
    %318 = arith.addf %316, %317 : vector<16x64xf32>
    %319 = arith.addf %300, %318 : vector<16x64xf32>
    %c0_143 = arith.constant 0 : index
    %c0_144 = arith.constant 0 : index
    %c0_145 = arith.constant 0 : index
    %320 = vector.load %arg31[%c0_143, %c0_144, %c0_145] : memref<1x1x64xf32, #tpu.memory_space<vmem>>, vector<1x1x64xf32>
    %321 = vector.shape_cast %320 : vector<1x1x64xf32> to vector<1x64xf32>
    %c0_146 = arith.constant 0 : index
    %c0_147 = arith.constant 0 : index
    %c0_148 = arith.constant 0 : index
    %322 = vector.load %arg32[%c0_146, %c0_147, %c0_148] : memref<1x1x64xf32, #tpu.memory_space<vmem>>, vector<1x1x64xf32>
    %323 = vector.shape_cast %322 : vector<1x1x64xf32> to vector<1x64xf32>
    %cst_149 = arith.constant dense<0.000000e+00> : vector<16xf32>
    %324 = vector.multi_reduction <add>, %319, %cst_149 [1] : vector<16x64xf32> to vector<16xf32>
    %325 = vector.shape_cast %324 : vector<16xf32> to vector<16x1xf32>
    %cst_150 = arith.constant 6.400000e+01 : f32
    %326 = vector.broadcast %cst_150 : f32 to vector<16x1xf32>
    %327 = arith.divf %325, %326 : vector<16x1xf32>
    %328 = vector.broadcast %327 : vector<16x1xf32> to vector<16x64xf32>
    %329 = arith.subf %319, %328 : vector<16x64xf32>
    %330 = arith.mulf %329, %329 : vector<16x64xf32>
    %cst_151 = arith.constant dense<0.000000e+00> : vector<16xf32>
    %331 = vector.multi_reduction <add>, %330, %cst_151 [1] : vector<16x64xf32> to vector<16xf32>
    %332 = vector.shape_cast %331 : vector<16xf32> to vector<16x1xf32>
    %cst_152 = arith.constant 6.400000e+01 : f32
    %333 = vector.broadcast %cst_152 : f32 to vector<16x1xf32>
    %334 = arith.divf %332, %333 : vector<16x1xf32>
    %335 = vector.broadcast %327 : vector<16x1xf32> to vector<16x64xf32>
    %336 = arith.subf %319, %335 : vector<16x64xf32>
    %cst_153 = arith.constant 9.99999974E-6 : f32
    %337 = vector.broadcast %cst_153 : f32 to vector<16x1xf32>
    %338 = arith.addf %334, %337 : vector<16x1xf32>
    %339 = math.rsqrt %338 : vector<16x1xf32>
    %340 = vector.broadcast %339 : vector<16x1xf32> to vector<16x64xf32>
    %341 = arith.mulf %336, %340 : vector<16x64xf32>
    %342 = vector.broadcast %321 : vector<1x64xf32> to vector<16x64xf32>
    %343 = arith.mulf %341, %342 : vector<16x64xf32>
    %344 = vector.broadcast %323 : vector<1x64xf32> to vector<16x64xf32>
    %345 = arith.addf %343, %344 : vector<16x64xf32>
    %c0_154 = arith.constant 0 : index
    %c0_155 = arith.constant 0 : index
    %346 = vector.load %arg43[%c0_154, %c0_155] : memref<16x64xf32, #tpu.memory_space<vmem>>, vector<16x64xf32>
    tpu.vector_store %arg43[%c0_154, %c0_155], %345 {strides = array<i32>} : memref<16x64xf32, #tpu.memory_space<vmem>>, vector<16x64xf32>,
    %347 = arith.truncf %345 : vector<16x64xf32> to vector<16x64xbf16>
    %c0_156 = arith.constant 0 : index
    %c0_157 = arith.constant 0 : index
    %348 = vector.load %arg33[%c0_156, %c0_157] : memref<64x128xbf16, #tpu.memory_space<vmem>>, vector<64x128xbf16>
    %cst_158 = arith.constant dense<0.000000e+00> : vector<16x128xf32>
    %349 = tpu.matmul %347, %348, %cst_158 {dimension_numbers = #tpu.dot_dimension_numbers<[1], [0], [0], [1], [0, 0, 1, 1], [], []>} : vector<16x64xbf16>, vector<64x128xbf16>, vector<16x128xf32> -> vector<16x128xf32>
    %c0_159 = arith.constant 0 : index
    %c0_160 = arith.constant 0 : index
    %350 = vector.load %arg34[%c0_159, %c0_160] : memref<1x128xf32, #tpu.memory_space<vmem>>, vector<1x128xf32>
    %351 = vector.broadcast %350 : vector<1x128xf32> to vector<16x128xf32>
    %352 = arith.addf %349, %351 : vector<16x128xf32>
    %c0_161 = arith.constant 0 : index
    %c0_162 = arith.constant 0 : index
    %c0_163 = arith.constant 0 : index
    %c0_164 = arith.constant 0 : index
    %353 = vector.load %arg41[%c0_161, %c0_162, %c0_163, %c0_164] : memref<1x1x16x128xf32, #tpu.memory_space<vmem>>, vector<1x1x16x128xf32>
    %354 = vector.shape_cast %353 : vector<1x1x16x128xf32> to vector<16x128xf32>
    %355 = vector.shape_cast %352 : vector<16x128xf32> to vector<1x1x16x128xf32>
    tpu.vector_store %arg41[%c0_161, %c0_162, %c0_163, %c0_164], %355 {strides = array<i32>} : memref<1x1x16x128xf32, #tpu.memory_space<vmem>>, vector<1x1x16x128xf32>,
    %c0_165 = arith.constant 0 : index
    %c0_166 = arith.constant 0 : index
    %356 = vector.load %arg35[%c0_165, %c0_166] : memref<64x64xbf16, #tpu.memory_space<vmem>>, vector<64x64xbf16>
    %cst_167 = arith.constant dense<0.000000e+00> : vector<16x64xf32>
    %357 = tpu.matmul %347, %356, %cst_167 {dimension_numbers = #tpu.dot_dimension_numbers<[1], [0], [0], [1], [0, 0, 1, 1], [], []>} : vector<16x64xbf16>, vector<64x64xbf16>, vector<16x64xf32> -> vector<16x64xf32>
    %c0_168 = arith.constant 0 : index
    %c0_169 = arith.constant 0 : index
    %358 = vector.load %arg36[%c0_168, %c0_169] : memref<1x64xf32, #tpu.memory_space<vmem>>, vector<1x64xf32>
    %359 = vector.broadcast %358 : vector<1x64xf32> to vector<16x64xf32>
    %360 = arith.addf %357, %359 : vector<16x64xf32>
    %cst_170 = arith.constant 0.000000e+00 : f32
    %361 = vector.broadcast %cst_170 : f32 to vector<16x64xf32>
    %362 = arith.maximumf %360, %361 : vector<16x64xf32>
    %363 = arith.truncf %362 : vector<16x64xf32> to vector<16x64xbf16>
    %c0_171 = arith.constant 0 : index
    %c0_172 = arith.constant 0 : index
    %364 = vector.load %arg37[%c0_171, %c0_172] : memref<64x64xbf16, #tpu.memory_space<vmem>>, vector<64x64xbf16>
    %cst_173 = arith.constant dense<0.000000e+00> : vector<16x64xf32>
    %365 = tpu.matmul %363, %364, %cst_173 {dimension_numbers = #tpu.dot_dimension_numbers<[1], [0], [0], [1], [0, 0, 1, 1], [], []>} : vector<16x64xbf16>, vector<64x64xbf16>, vector<16x64xf32> -> vector<16x64xf32>
    %c0_174 = arith.constant 0 : index
    %c0_175 = arith.constant 0 : index
    %366 = vector.load %arg38[%c0_174, %c0_175] : memref<1x64xf32, #tpu.memory_space<vmem>>, vector<1x64xf32>
    %367 = vector.broadcast %366 : vector<1x64xf32> to vector<16x64xf32>
    %368 = arith.addf %365, %367 : vector<16x64xf32>
    %cst_176 = arith.constant 0.000000e+00 : f32
    %369 = vector.broadcast %cst_176 : f32 to vector<16x64xf32>
    %370 = arith.maximumf %368, %369 : vector<16x64xf32>
    %371 = arith.truncf %370 : vector<16x64xf32> to vector<16x64xbf16>
    %c0_177 = arith.constant 0 : index
    %c0_178 = arith.constant 0 : index
    %372 = vector.load %arg39[%c0_177, %c0_178] : memref<64x128xbf16, #tpu.memory_space<vmem>>, vector<64x128xbf16>
    %cst_179 = arith.constant dense<0.000000e+00> : vector<16x128xf32>
    %373 = tpu.matmul %371, %372, %cst_179 {dimension_numbers = #tpu.dot_dimension_numbers<[1], [0], [0], [1], [0, 0, 1, 1], [], []>} : vector<16x64xbf16>, vector<64x128xbf16>, vector<16x128xf32> -> vector<16x128xf32>
    %c0_180 = arith.constant 0 : index
    %c0_181 = arith.constant 0 : index
    %374 = vector.load %arg40[%c0_180, %c0_181] : memref<1x128xf32, #tpu.memory_space<vmem>>, vector<1x128xf32>
    %375 = vector.broadcast %374 : vector<1x128xf32> to vector<16x128xf32>
    %376 = arith.addf %373, %375 : vector<16x128xf32>
    %c0_182 = arith.constant 0 : index
    %c0_183 = arith.constant 0 : index
    %c0_184 = arith.constant 0 : index
    %377 = vector.load %arg6[%c0_182, %c0_183, %c0_184] : memref<1x16x128xf32, #tpu.memory_space<vmem>>, vector<1x16x128xf32>
    %378 = vector.shape_cast %377 : vector<1x16x128xf32> to vector<16x128xf32>
    %379 = arith.addf %376, %378 : vector<16x128xf32>
    %cst_185 = arith.constant 0.000000e+00 : f32
    %380 = vector.broadcast %cst_185 : f32 to vector<16x128xf32>
    %381 = arith.subf %380, %379 : vector<16x128xf32>
    %382 = math.exp %381 : vector<16x128xf32>
    %cst_186 = arith.constant 1.000000e+00 : f32
    %383 = vector.broadcast %cst_186 : f32 to vector<16x128xf32>
    %384 = arith.addf %383, %382 : vector<16x128xf32>
    %385 = tpu.reciprocal %384 {approx = true} : vector<16x128xf32> -> vector<16x128xf32>
    %c0_187 = arith.constant 0 : index
    %c0_188 = arith.constant 0 : index
    %c0_189 = arith.constant 0 : index
    %c0_190 = arith.constant 0 : index
    %386 = vector.load %arg42[%c0_187, %c0_188, %c0_189, %c0_190] : memref<1x1x16x128xf32, #tpu.memory_space<vmem>>, vector<1x1x16x128xf32>
    %387 = vector.shape_cast %386 : vector<1x1x16x128xf32> to vector<16x128xf32>
    %388 = vector.shape_cast %385 : vector<16x128xf32> to vector<1x1x16x128xf32>
    tpu.vector_store %arg42[%c0_187, %c0_188, %c0_189, %c0_190], %388 {strides = array<i32>} : memref<1x1x16x128xf32, #tpu.memory_space<vmem>>, vector<1x1x16x128xf32>,
    return
  }
  func.func @transform_0(%arg0: i32, %arg1: i32) -> (i32, i32, i32) {
    %c0_i32 = arith.constant 0 : i32
    %c0_i32_0 = arith.constant 0 : i32
    %c0_i32_1 = arith.constant 0 : i32
    return %arg0, %c0_i32, %c0_i32_0 : i32, i32, i32
  }
  func.func @transform_1(%arg0: i32, %arg1: i32) -> (i32, i32, i32) {
    %c0_i32 = arith.constant 0 : i32
    %c0_i32_0 = arith.constant 0 : i32
    %c0_i32_1 = arith.constant 0 : i32
    %c0_i32_2 = arith.constant 0 : i32
    return %c0_i32, %c0_i32_0, %c0_i32_1 : i32, i32, i32
  }
  func.func @transform_2(%arg0: i32, %arg1: i32) -> (i32, i32, i32) {
    %c0_i32 = arith.constant 0 : i32
    %c0_i32_0 = arith.constant 0 : i32
    %c0_i32_1 = arith.constant 0 : i32
    return %arg0, %c0_i32, %c0_i32_0 : i32, i32, i32
  }
  func.func @transform_3(%arg0: i32, %arg1: i32) -> (i32, i32, i32) {
    %c0_i32 = arith.constant 0 : i32
    %c0_i32_0 = arith.constant 0 : i32
    %c0_i32_1 = arith.constant 0 : i32
    %c0_i32_2 = arith.constant 0 : i32
    return %c0_i32, %c0_i32_0, %c0_i32_1 : i32, i32, i32
  }
  func.func @transform_4(%arg0: i32, %arg1: i32) -> (i32, i32, i32) {
    %c0_i32 = arith.constant 0 : i32
    %c0_i32_0 = arith.constant 0 : i32
    %c0_i32_1 = arith.constant 0 : i32
    %c0_i32_2 = arith.constant 0 : i32
    return %c0_i32, %c0_i32_0, %c0_i32_1 : i32, i32, i32
  }
  func.func @transform_5(%arg0: i32, %arg1: i32) -> (i32, i32, i32) {
    %c0_i32 = arith.constant 0 : i32
    %c0_i32_0 = arith.constant 0 : i32
    %c0_i32_1 = arith.constant 0 : i32
    return %arg1, %c0_i32, %c0_i32_0 : i32, i32, i32
  }
  func.func @transform_6(%arg0: i32, %arg1: i32) -> (i32, i32, i32) {
    %c0_i32 = arith.constant 0 : i32
    %c0_i32_0 = arith.constant 0 : i32
    %c0_i32_1 = arith.constant 0 : i32
    return %arg1, %c0_i32, %c0_i32_0 : i32, i32, i32
  }
  func.func @transform_7(%arg0: i32, %arg1: i32) -> (i32, i32, i32) {
    %c0_i32 = arith.constant 0 : i32
    %c0_i32_0 = arith.constant 0 : i32
    %c0_i32_1 = arith.constant 0 : i32
    return %arg1, %c0_i32, %c0_i32_0 : i32, i32, i32
  }
  func.func @transform_8(%arg0: i32, %arg1: i32) -> (i32, i32, i32) {
    %c0_i32 = arith.constant 0 : i32
    %c0_i32_0 = arith.constant 0 : i32
    %c0_i32_1 = arith.constant 0 : i32
    return %arg1, %c0_i32, %c0_i32_0 : i32, i32, i32
  }
  func.func @transform_9(%arg0: i32, %arg1: i32) -> (i32, i32, i32) {
    %c0_i32 = arith.constant 0 : i32
    %c0_i32_0 = arith.constant 0 : i32
    %c0_i32_1 = arith.constant 0 : i32
    return %arg1, %c0_i32, %c0_i32_0 : i32, i32, i32
  }
  func.func @transform_10(%arg0: i32, %arg1: i32) -> (i32, i32, i32) {
    %c0_i32 = arith.constant 0 : i32
    %c0_i32_0 = arith.constant 0 : i32
    %c0_i32_1 = arith.constant 0 : i32
    return %arg1, %c0_i32, %c0_i32_0 : i32, i32, i32
  }
  func.func @transform_11(%arg0: i32, %arg1: i32) -> (i32, i32, i32) {
    %c0_i32 = arith.constant 0 : i32
    %c0_i32_0 = arith.constant 0 : i32
    %c0_i32_1 = arith.constant 0 : i32
    return %arg1, %c0_i32, %c0_i32_0 : i32, i32, i32
  }
  func.func @transform_12(%arg0: i32, %arg1: i32) -> (i32, i32, i32) {
    %c0_i32 = arith.constant 0 : i32
    %c0_i32_0 = arith.constant 0 : i32
    %c0_i32_1 = arith.constant 0 : i32
    return %arg1, %c0_i32, %c0_i32_0 : i32, i32, i32
  }
  func.func @transform_13(%arg0: i32, %arg1: i32) -> (i32, i32, i32) {
    %c0_i32 = arith.constant 0 : i32
    %c0_i32_0 = arith.constant 0 : i32
    %c0_i32_1 = arith.constant 0 : i32
    return %arg1, %c0_i32, %c0_i32_0 : i32, i32, i32
  }
  func.func @transform_14(%arg0: i32, %arg1: i32) -> (i32, i32, i32) {
    %c0_i32 = arith.constant 0 : i32
    %c0_i32_0 = arith.constant 0 : i32
    %c0_i32_1 = arith.constant 0 : i32
    return %arg1, %c0_i32, %c0_i32_0 : i32, i32, i32
  }
  func.func @transform_15(%arg0: i32, %arg1: i32) -> (i32, i32, i32) {
    %c0_i32 = arith.constant 0 : i32
    %c0_i32_0 = arith.constant 0 : i32
    %c0_i32_1 = arith.constant 0 : i32
    return %arg1, %c0_i32, %c0_i32_0 : i32, i32, i32
  }
  func.func @transform_16(%arg0: i32, %arg1: i32) -> (i32, i32, i32) {
    %c0_i32 = arith.constant 0 : i32
    %c0_i32_0 = arith.constant 0 : i32
    %c0_i32_1 = arith.constant 0 : i32
    return %arg1, %c0_i32, %c0_i32_0 : i32, i32, i32
  }
  func.func @transform_17(%arg0: i32, %arg1: i32) -> (i32, i32, i32) {
    %c0_i32 = arith.constant 0 : i32
    %c0_i32_0 = arith.constant 0 : i32
    %c0_i32_1 = arith.constant 0 : i32
    return %arg1, %c0_i32, %c0_i32_0 : i32, i32, i32
  }
  func.func @transform_18(%arg0: i32, %arg1: i32) -> (i32, i32, i32) {
    %c0_i32 = arith.constant 0 : i32
    %c0_i32_0 = arith.constant 0 : i32
    %c0_i32_1 = arith.constant 0 : i32
    return %arg1, %c0_i32, %c0_i32_0 : i32, i32, i32
  }
  func.func @transform_19(%arg0: i32, %arg1: i32) -> (i32, i32, i32) {
    %c0_i32 = arith.constant 0 : i32
    %c0_i32_0 = arith.constant 0 : i32
    %c0_i32_1 = arith.constant 0 : i32
    return %arg1, %c0_i32, %c0_i32_0 : i32, i32, i32
  }
  func.func @transform_20(%arg0: i32, %arg1: i32) -> (i32, i32, i32) {
    %c0_i32 = arith.constant 0 : i32
    %c0_i32_0 = arith.constant 0 : i32
    %c0_i32_1 = arith.constant 0 : i32
    return %arg1, %c0_i32, %c0_i32_0 : i32, i32, i32
  }
  func.func @transform_21(%arg0: i32, %arg1: i32) -> (i32, i32, i32) {
    %c0_i32 = arith.constant 0 : i32
    %c0_i32_0 = arith.constant 0 : i32
    %c0_i32_1 = arith.constant 0 : i32
    return %arg1, %c0_i32, %c0_i32_0 : i32, i32, i32
  }
  func.func @transform_22(%arg0: i32, %arg1: i32) -> (i32, i32, i32) {
    %c0_i32 = arith.constant 0 : i32
    %c0_i32_0 = arith.constant 0 : i32
    %c0_i32_1 = arith.constant 0 : i32
    return %arg1, %c0_i32, %c0_i32_0 : i32, i32, i32
  }
  func.func @transform_23(%arg0: i32, %arg1: i32) -> (i32, i32, i32) {
    %c0_i32 = arith.constant 0 : i32
    %c0_i32_0 = arith.constant 0 : i32
    %c0_i32_1 = arith.constant 0 : i32
    return %arg1, %c0_i32, %c0_i32_0 : i32, i32, i32
  }
  func.func @transform_24(%arg0: i32, %arg1: i32) -> (i32, i32, i32) {
    %c0_i32 = arith.constant 0 : i32
    %c0_i32_0 = arith.constant 0 : i32
    %c0_i32_1 = arith.constant 0 : i32
    return %arg1, %c0_i32, %c0_i32_0 : i32, i32, i32
  }
  func.func @transform_25(%arg0: i32, %arg1: i32) -> (i32, i32, i32) {
    %c0_i32 = arith.constant 0 : i32
    %c0_i32_0 = arith.constant 0 : i32
    %c0_i32_1 = arith.constant 0 : i32
    return %arg1, %c0_i32, %c0_i32_0 : i32, i32, i32
  }
  func.func @transform_26(%arg0: i32, %arg1: i32) -> (i32, i32, i32) {
    %c0_i32 = arith.constant 0 : i32
    %c0_i32_0 = arith.constant 0 : i32
    %c0_i32_1 = arith.constant 0 : i32
    return %arg1, %c0_i32, %c0_i32_0 : i32, i32, i32
  }
  func.func @transform_27(%arg0: i32, %arg1: i32) -> (i32, i32, i32) {
    %c0_i32 = arith.constant 0 : i32
    %c0_i32_0 = arith.constant 0 : i32
    %c0_i32_1 = arith.constant 0 : i32
    return %arg1, %c0_i32, %c0_i32_0 : i32, i32, i32
  }
  func.func @transform_28(%arg0: i32, %arg1: i32) -> (i32, i32, i32) {
    %c0_i32 = arith.constant 0 : i32
    %c0_i32_0 = arith.constant 0 : i32
    %c0_i32_1 = arith.constant 0 : i32
    return %arg1, %c0_i32, %c0_i32_0 : i32, i32, i32
  }
  func.func @transform_29(%arg0: i32, %arg1: i32) -> (i32, i32, i32) {
    %c0_i32 = arith.constant 0 : i32
    %c0_i32_0 = arith.constant 0 : i32
    %c0_i32_1 = arith.constant 0 : i32
    return %arg1, %c0_i32, %c0_i32_0 : i32, i32, i32
  }
  func.func @transform_30(%arg0: i32, %arg1: i32) -> (i32, i32, i32) {
    %c0_i32 = arith.constant 0 : i32
    %c0_i32_0 = arith.constant 0 : i32
    %c0_i32_1 = arith.constant 0 : i32
    return %arg1, %c0_i32, %c0_i32_0 : i32, i32, i32
  }
  func.func @transform_31(%arg0: i32, %arg1: i32) -> (i32, i32) {
    %c0_i32 = arith.constant 0 : i32
    %c0_i32_0 = arith.constant 0 : i32
    %c0_i32_1 = arith.constant 0 : i32
    return %c0_i32, %c0_i32_0 : i32, i32
  }
  func.func @transform_32(%arg0: i32, %arg1: i32) -> (i32, i32) {
    %c0_i32 = arith.constant 0 : i32
    %c0_i32_0 = arith.constant 0 : i32
    %c0_i32_1 = arith.constant 0 : i32
    return %c0_i32, %c0_i32_0 : i32, i32
  }
  func.func @transform_33(%arg0: i32, %arg1: i32) -> (i32, i32) {
    %c0_i32 = arith.constant 0 : i32
    %c0_i32_0 = arith.constant 0 : i32
    %c0_i32_1 = arith.constant 0 : i32
    return %c0_i32, %c0_i32_0 : i32, i32
  }
  func.func @transform_34(%arg0: i32, %arg1: i32) -> (i32, i32) {
    %c0_i32 = arith.constant 0 : i32
    %c0_i32_0 = arith.constant 0 : i32
    %c0_i32_1 = arith.constant 0 : i32
    return %c0_i32, %c0_i32_0 : i32, i32
  }
  func.func @transform_35(%arg0: i32, %arg1: i32) -> (i32, i32) {
    %c0_i32 = arith.constant 0 : i32
    %c0_i32_0 = arith.constant 0 : i32
    %c0_i32_1 = arith.constant 0 : i32
    return %c0_i32, %c0_i32_0 : i32, i32
  }
  func.func @transform_36(%arg0: i32, %arg1: i32) -> (i32, i32) {
    %c0_i32 = arith.constant 0 : i32
    %c0_i32_0 = arith.constant 0 : i32
    %c0_i32_1 = arith.constant 0 : i32
    return %c0_i32, %c0_i32_0 : i32, i32
  }
  func.func @transform_37(%arg0: i32, %arg1: i32) -> (i32, i32) {
    %c0_i32 = arith.constant 0 : i32
    %c0_i32_0 = arith.constant 0 : i32
    %c0_i32_1 = arith.constant 0 : i32
    return %c0_i32, %c0_i32_0 : i32, i32
  }
  func.func @transform_38(%arg0: i32, %arg1: i32) -> (i32, i32) {
    %c0_i32 = arith.constant 0 : i32
    %c0_i32_0 = arith.constant 0 : i32
    %c0_i32_1 = arith.constant 0 : i32
    return %c0_i32, %c0_i32_0 : i32, i32
  }
  func.func @transform_39(%arg0: i32, %arg1: i32) -> (i32, i32, i32, i32) {
    %c0_i32 = arith.constant 0 : i32
    %c0_i32_0 = arith.constant 0 : i32
    %c0_i32_1 = arith.constant 0 : i32
    return %arg1, %arg0, %c0_i32, %c0_i32_0 : i32, i32, i32, i32
  }
  func.func @transform_40(%arg0: i32, %arg1: i32) -> (i32, i32, i32, i32) {
    %c0_i32 = arith.constant 0 : i32
    %c0_i32_0 = arith.constant 0 : i32
    %c0_i32_1 = arith.constant 0 : i32
    return %arg1, %arg0, %c0_i32, %c0_i32_0 : i32, i32, i32, i32
  }
}

</mosaic_0001>

<bundles_post_ra>
// kernel: _lambda_.8
= control target key start
LH: loop header
LB: loop body
LE: loop exit
PB: predicated region body
PF: predicated region fallthrough
CT: control target
= control target key end

     0   :  { %vm60_vm0 = vcmask 523264   ;;  %s260_s1 = inlined_call_operand.vmem [shape: bf16[64,64], index: 1, kind: input, shape index: {}]   ;;  %s261_s2 = inlined_call_operand.vmem [shape: f32[1,64], index: 2, kind: input, shape index: {}]   ;;  %s262_s0 = inlined_call_operand.vmem [shape: f32[16,64], index: 0, kind: input, shape index: {}]   ;;  %s263_s4 = inlined_call_operand.vmem [shape: f32[1,64], index: 4, kind: input, shape index: {}]   ;;  %s264_s3 = inlined_call_operand.vmem [shape: bf16[64,64], index: 3, kind: input, shape index: {}]   ;;  %s265_s5 = inlined_call_operand.vmem [shape: f32[16,64], index: 5, kind: output, shape index: {}]  }
   0x1   :  { %v177_v0 = vld [vmem:[%s260_s1 + $0x18] sm:$0xff]  ;;  %v176_v1 = vld [vmem:[%s260_s1 + $0x10] sm:$0xff]  ;;  %v175_v2 = vld [vmem:[%s260_s1 + $0x8] sm:$0xff] }
   0x2   :  { %68 = vmatpush.bf16.msra.mxu0 %v177_v0  ;;  %v174_v3 = vld [vmem:[%s260_s1] sm:$0xff]  ;;  %v22_v5 = vld [vmem:[%s262_s0 + $0x8] sm:$0xff]  ;;  %v181_v7 = vld [vmem:[%s264_s3 + $0x18] sm:$0xff] }
   0x3   :  { %v21_v4 = vld [vmem:[%s262_s0] sm:$0xff]  ;;  %124 = vmatpush.bf16.msra.mxu1 %v181_v7  ;;  %v180_v8 = vld [vmem:[%s264_s3 + $0x10] sm:$0xff]  ;;  %v179_v9 = vld [vmem:[%s264_s3 + $0x8] sm:$0xff] }
   0x4   :  { %v23_v6 = vpack.c.bf16 %v22_v5, %v21_v4  ;;  %v178_v10 = vld [vmem:[%s264_s3] sm:$0xff] }
   0x5   :  { %v182_v12 = vld [vmem:[%s261_s2] ss:$0 sm:$0xff] }
   0x6   :  { %69 = vmatpush.bf16.msra.mxu0 %v176_v1  ;;  %v183_v19 = vld [vmem:[%s263_s4] ss:$0 sm:$0xff] }
   0x7   :  { %125 = vmatpush.bf16.msra.mxu1 %v180_v8 }
   0xa   :  { %70 = vmatpush.bf16.msra.mxu0 %v175_v2 }
   0xb   :  { %126 = vmatpush.bf16.msra.mxu1 %v179_v9 }
   0xe   :  { %71 = vmatpush.bf16.msra.mxu0 %v174_v3 }
   0xf   :  { %127 = vmatpush.bf16.msra.mxu1 %v178_v10 }
  0x11   :  { %156 = vmatmul.msk.bf16.vlgmr.msra.gmra.mxu0 %vm60_vm0, %v23_v6 }
  0x8e   :  { %v73_v11 = vpop.f32.mrf.mxu0 }
  0x8f   :  { %v74_v13 = vadd.f32 %v182_v12, %v73_v11 }
  0x91   :  { %v78_v16 = vmax.f32 %v74_v13, 0.0 }
  0x96   :  { %v75_v14 = vpop.f32.mrf.mxu0 }
  0x97   :  { %v76_v15 = vadd.f32 %v182_v12, %v75_v14 }
  0x99   :  { %v79_v17 = vmax.f32 %v76_v15, 0.0 }
  0x9b   :  { %v80_v18 = vpack.c.bf16 %v79_v17, %v78_v16 }
  0x9d   :  { %173 = vmatmul.msk.bf16.vlgmr.msra.gmra.mxu1 %vm60_vm0, %v80_v18 }
 0x11a   :  { %v129_v20 = vpop.f32.mrf.mxu1 }
 0x11b   :  { %v130_v21 = vadd.f32 %v183_v19, %v129_v20 }
 0x11d   :  { %134 = vst.msk [vmem:[%s265_s5] sm:$0xff] %vm60_vm0, %v130_v21 }
 0x122   :  { %v131_v22 = vpop.f32.mrf.mxu1 }
 0x123   :  { %v132_v23 = vadd.f32 %v183_v19, %v131_v22 }
 0x125   :  { %135 = vst.msk [vmem:[%s265_s5 + $0x8] sm:$0xff] %vm60_vm0, %v132_v23 }

// kernel: _lambda_.7
= control target key start
LH: loop header
LB: loop body
LE: loop exit
PB: predicated region body
PF: predicated region fallthrough
CT: control target
= control target key end

     0   :  { %vm69_vm0 = vcmask 523264   ;;  %s394_s1 = inlined_call_operand.vmem [shape: bf16[64,64], index: 1, kind: input, shape index: {}]   ;;  %s395_s2 = inlined_call_operand.vmem [shape: f32[1,64], index: 2, kind: input, shape index: {}]   ;;  %s396_s0 = inlined_call_operand.vmem [shape: f32[64,64], index: 0, kind: input, shape index: {}]   ;;  %s397_s4 = inlined_call_operand.vmem [shape: f32[1,64], index: 4, kind: input, shape index: {}]   ;;  %s398_s3 = inlined_call_operand.vmem [shape: bf16[64,64], index: 3, kind: input, shape index: {}]   ;;  %s399_s5 = inlined_call_operand.vmem [shape: f32[64,64], index: 5, kind: output, shape index: {}]  }
   0x1   :  { %v255_v0 = vld [vmem:[%s394_s1 + $0x18] sm:$0xff]  ;;  %v254_v1 = vld [vmem:[%s394_s1 + $0x10] sm:$0xff]  ;;  %v253_v2 = vld [vmem:[%s394_s1 + $0x8] sm:$0xff] }
   0x2   :  { %86 = vmatpush.bf16.msra.mxu0 %v255_v0  ;;  %260 = vmatpush.bf16.msra.mxu2 %v255_v0  ;;  %v252_v3 = vld [vmem:[%s394_s1] sm:$0xff]  ;;  %v22_v5 = vld [vmem:[%s396_s0 + $0x8] sm:$0xff]  ;;  %v23_v10 = vld [vmem:[%s396_s0 + $0x10] sm:$0xff] }
   0x3   :  { %v21_v4 = vld [vmem:[%s396_s0] sm:$0xff]  ;;  %v26_v7 = vld [vmem:[%s396_s0 + $0x28] sm:$0xff]  ;;  %v24_v11 = vld [vmem:[%s396_s0 + $0x18] sm:$0xff] }
   0x4   :  { %v25_v6 = vld [vmem:[%s396_s0 + $0x20] sm:$0xff]  ;;  %v29_v8 = vpack.c.bf16 %v22_v5, %v21_v4  ;;  %v27_v12 = vld [vmem:[%s396_s0 + $0x30] sm:$0xff]  ;;  %v28_v13 = vld [vmem:[%s396_s0 + $0x38] sm:$0xff]  ;;  %v30_v14 = vpack.c.bf16 %v24_v11, %v23_v10 }
   0x5   :  { %v31_v9 = vpack.c.bf16 %v26_v7, %v25_v6  ;;  %v32_v15 = vpack.c.bf16 %v28_v13, %v27_v12  ;;  %v259_v16 = vld [vmem:[%s398_s3 + $0x18] sm:$0xff]  ;;  %v258_v17 = vld [vmem:[%s398_s3 + $0x10] sm:$0xff]  ;;  %v257_v18 = vld [vmem:[%s398_s3 + $0x8] sm:$0xff] }
   0x6   :  { %87 = vmatpush.bf16.msra.mxu0 %v254_v1  ;;  %261 = vmatpush.bf16.msra.mxu2 %v254_v1  ;;  %v256_v19 = vld [vmem:[%s398_s3] sm:$0xff] }
   0x7   :  { %175 = vmatpush.bf16.msra.mxu1 %v259_v16  ;;  %264 = vmatpush.bf16.msra.mxu3 %v259_v16  ;;  %v268_v21 = vld [vmem:[%s395_s2] ss:$0 sm:$0xff] }
   0x8   :  { %v269_v49 = vld [vmem:[%s397_s4] ss:$0 sm:$0xff] }
   0xa   :  { %88 = vmatpush.bf16.msra.mxu0 %v253_v2  ;;  %262 = vmatpush.bf16.msra.mxu2 %v253_v2 }
   0xb   :  { %176 = vmatpush.bf16.msra.mxu1 %v258_v17  ;;  %265 = vmatpush.bf16.msra.mxu3 %v258_v17 }
   0xe   :  { %89 = vmatpush.bf16.msra.mxu0 %v252_v3  ;;  %263 = vmatpush.bf16.msra.mxu2 %v252_v3 }
   0xf   :  { %177 = vmatpush.bf16.msra.mxu1 %v257_v18  ;;  %266 = vmatpush.bf16.msra.mxu3 %v257_v18 }
  0x11   :  { %228 = vmatmul.msk.bf16.vlgmr.msra.gmra.mxu0 %vm69_vm0, %v29_v8  ;;  %230 = vmatmul.msk.bf16.vlgmr.msra.gmra.mxu2 %vm69_vm0, %v31_v9 }
  0x13   :  { %178 = vmatpush.bf16.msra.mxu1 %v256_v19  ;;  %267 = vmatpush.bf16.msra.mxu3 %v256_v19 }
  0x21   :  { %229 = vmatmul.msk.bf16.gmra.mxu0 %vm69_vm0, %v30_v14  ;;  %231 = vmatmul.msk.bf16.gmra.mxu2 %vm69_vm0, %v32_v15 }
  0x8e   :  { %v91_v20 = vpop.f32.mrf.mxu0 }
  0x8f   :  { %v92_v22 = vadd.f32 %v268_v21, %v91_v20 }
  0x91   :  { %v111_v25 = vmax.f32 %v92_v22, 0.0 }
  0x94   :  { %v101_v23 = vpop.f32.mrf.mxu2 }
  0x95   :  { %v102_v28 = vadd.f32 %v268_v21, %v101_v23 }
  0x96   :  { %v93_v24 = vpop.f32.mrf.mxu0 }
  0x97   :  { %v94_v26 = vadd.f32 %v268_v21, %v93_v24  ;;  %v115_v33 = vmax.f32 %v102_v28, 0.0 }
  0x99   :  { %v112_v27 = vmax.f32 %v94_v26, 0.0 }
  0x9b   :  { %v119_v29 = vpack.c.bf16 %v112_v27, %v111_v25 }
  0x9c   :  { %v103_v30 = vpop.f32.mrf.mxu2 }
  0x9d   :  { %v104_v31 = vadd.f32 %v268_v21, %v103_v30  ;;  %248 = vmatmul.msk.bf16.vlgmr.msra.gmra.mxu1 %vm69_vm0, %v119_v29 }
  0x9e   :  { %v96_v32 = vpop.f32.mrf.mxu0 }
  0x9f   :  { %v116_v34 = vmax.f32 %v104_v31, 0.0  ;;  %v97_v36 = vadd.f32 %v268_v21, %v96_v32 }
  0xa1   :  { %v121_v35 = vpack.c.bf16 %v116_v34, %v115_v33  ;;  %v113_v39 = vmax.f32 %v97_v36, 0.0 }
  0xa3   :  { %250 = vmatmul.msk.bf16.vlgmr.msra.gmra.mxu3 %vm69_vm0, %v121_v35 }
  0xa4   :  { %v106_v37 = vpop.f32.mrf.mxu2 }
  0xa5   :  { %v107_v42 = vadd.f32 %v268_v21, %v106_v37 }
  0xa6   :  { %v98_v38 = vpop.f32.mrf.mxu0 }
  0xa7   :  { %v99_v40 = vadd.f32 %v268_v21, %v98_v38  ;;  %v117_v46 = vmax.f32 %v107_v42, 0.0 }
  0xa9   :  { %v114_v41 = vmax.f32 %v99_v40, 0.0 }
  0xab   :  { %v120_v43 = vpack.c.bf16 %v114_v41, %v113_v39 }
  0xac   :  { %v108_v44 = vpop.f32.mrf.mxu2 }
  0xad   :  { %v109_v45 = vadd.f32 %v268_v21, %v108_v44  ;;  %249 = vmatmul.msk.bf16.gmra.mxu1 %vm69_vm0, %v120_v43 }
  0xaf   :  { %v118_v47 = vmax.f32 %v109_v45, 0.0 }
  0xb1   :  { %v122_v48 = vpack.c.bf16 %v118_v47, %v117_v46 }
  0xb3   :  { %251 = vmatmul.msk.bf16.gmra.mxu3 %vm69_vm0, %v122_v48 }
 0x11a   :  { %v180_v50 = vpop.f32.mrf.mxu1 }
 0x11b   :  { %v181_v51 = vadd.f32 %v269_v49, %v180_v50 }
 0x11d   :  { %200 = vst.msk [vmem:[%s399_s5] sm:$0xff] %vm69_vm0, %v181_v51 }
 0x122   :  { %v182_v52 = vpop.f32.mrf.mxu1 }
 0x123   :  { %v183_v53 = vadd.f32 %v269_v49, %v182_v52 }
 0x125   :  { %201 = vst.msk [vmem:[%s399_s5 + $0x8] sm:$0xff] %vm69_vm0, %v183_v53 }
 0x126   :  { %v190_v54 = vpop.f32.mrf.mxu3 }
 0x127   :  { %v191_v55 = vadd.f32 %v269_v49, %v190_v54 }
 0x129   :  { %204 = vst.msk [vmem:[%s399_s5 + $0x20] sm:$0xff] %vm69_vm0, %v191_v55 }
 0x12a   :  { %v185_v56 = vpop.f32.mrf.mxu1 }
 0x12b   :  { %v186_v57 = vadd.f32 %v269_v49, %v185_v56 }
 0x12d   :  { %202 = vst.msk [vmem:[%s399_s5 + $0x10] sm:$0xff] %vm69_vm0, %v186_v57 }
 0x12e   :  { %v192_v58 = vpop.f32.mrf.mxu3 }
 0x12f   :  { %v193_v59 = vadd.f32 %v269_v49, %v192_v58 }
 0x131   :  { %205 = vst.msk [vmem:[%s399_s5 + $0x28] sm:$0xff] %vm69_vm0, %v193_v59 }
 0x132   :  { %v187_v60 = vpop.f32.mrf.mxu1 }
 0x133   :  { %v188_v61 = vadd.f32 %v269_v49, %v187_v60 }
 0x135   :  { %203 = vst.msk [vmem:[%s399_s5 + $0x18] sm:$0xff] %vm69_vm0, %v188_v61 }
 0x136   :  { %v195_v62 = vpop.f32.mrf.mxu3 }
 0x137   :  { %v196_v63 = vadd.f32 %v269_v49, %v195_v62 }
 0x139   :  { %206 = vst.msk [vmem:[%s399_s5 + $0x30] sm:$0xff] %vm69_vm0, %v196_v63 }
 0x13e   :  { %v197_v0 = vpop.f32.mrf.mxu3 }
 0x13f   :  { %v198_v1 = vadd.f32 %v269_v49, %v197_v0 }
 0x141   :  { %207 = vst.msk [vmem:[%s399_s5 + $0x38] sm:$0xff] %vm69_vm0, %v198_v1 }

// kernel: _lambda_.6
= control target key start
LH: loop header
LB: loop body
LE: loop exit
PB: predicated region body
PF: predicated region fallthrough
CT: control target
= control target key end

     0   :  { %s2334_s27 = smov 0   ;;  %s2336_s28 = smov 0   ;;  %s2578_s0 = inlined_call_operand.vmem [shape: f32[2,16,64], index: 0, kind: input, shape index: {}]   ;;  %s2579_s1 = inlined_call_operand.vmem [shape: f32[1,16,64], index: 1, kind: input, shape index: {}]   ;;  %s2580_s2 = inlined_call_operand.vmem [shape: bf16[1,64,64], index: 2, kind: input, shape index: {}]   ;;  %s2581_s3 = inlined_call_operand.vmem [shape: f32[1,1,64], index: 3, kind: input, shape index: {}]   ;;  %s2582_s4 = inlined_call_operand.vmem [shape: bf16[1,64,64], index: 4, kind: input, shape index: {}]   ;;  %s2583_s5 = inlined_call_operand.vmem [shape: f32[1,1,64], index: 5, kind: input, shape index: {}]   ;;  %s2584_s6 = inlined_call_operand.vmem [shape: bf16[1,64,64], index: 6, kind: input, shape index: {}]   ;;  %s2585_s7 = inlined_call_operand.vmem [shape: f32[1,1,64], index: 7, kind: input, shape index: {}]   ;;  %s2586_s8 = inlined_call_operand.vmem [shape: bf16[1,64,64], index: 8, kind: input, shape index: {}]   ;;  %s2587_s9 = inlined_call_operand.vmem [shape: f32[1,1,64], index: 9, kind: input, shape index: {}]   ;;  %s2588_s10 = inlined_call_operand.vmem [shape: f32[1,1,64], index: 10, kind: input, shape index: {}]   ;;  %s2589_s11 = inlined_call_operand.vmem [shape: f32[1,1,64], index: 11, kind: input, shape index: {}]   ;;  %s2590_s12 = inlined_call_operand.vmem [shape: bf16[1,64,128], index: 12, kind: input, shape index: {}]   ;;  %s2591_s13 = inlined_call_operand.vmem [shape: f32[1,1,128], index: 13, kind: input, shape index: {}]   ;;  %s2592_s14 = inlined_call_operand.vmem [shape: bf16[1,128,64], index: 14, kind: input, shape index: {}]   ;;  %s2593_s15 = inlined_call_operand.vmem [shape: f32[1,1,64], index: 15, kind: input, shape index: {}]   ;;  %s2594_s16 = inlined_call_operand.vmem [shape: f32[1,1,64], index: 16, kind: input, shape index: {}]   ;;  %s2595_s17 = inlined_call_operand.vmem [shape: f32[1,1,64], index: 17, kind: input, shape index: {}]   ;;  %s2596_s18 = inlined_call_operand.vmem [shape: f32[2,16,64], index: 18, kind: output, shape index: {}]  }
   0x1   :  { %2601 = sst [smem:[#allocation4_spill]] %s2578_s0  ;;  %s2338_s29 = smov 0  }
   0x2   :  { %2602 = sst [smem:[#allocation5_spill]] %s2579_s1 }
   0x3   :  { %2603 = sst [smem:[#allocation6_spill]] %s2580_s2 }
   0x4 LB: > { %s40_s30 = sadd.s32 1, %s2226_s28  ;;  %p1948_p0 = scmp.ge.s32.totalorder %s2230_s29, 1  ;;  %s2230_s29 = sphi %s2338_s29, %s28_s29   ;;  %s2226_s28 = sphi %s2336_s28, %s2612_s28   ;;  %s2222_s27 = sphi %s2334_s27, %s2611_s27  }
   0x5   : > { %p42_p1 = scmp.ge.s32.totalorder %s40_s30, 2  ;;  %p664_p2 = scmp.lt.s32.totalorder %s2230_s29, 3 }
   0x7   : > { %s2614_s30 = smov (%p42_p1, %s40_s30), 0  ;;  %p665_p3 = pnand %p1948_p0, %p664_p2 }
   0x8   : > { %2604 = sst [smem:[#allocation3_spill]] %s2614_s30  ;;  %p778_p4 = scmp.lt.s32.totalorder (!%p665_p3), %s2222_s27, 1 }
   0x9   : > { %668 = sbr.rel (%p665_p3) target bundleno = 1962 (0x7aa), region = 92  ;;  %s2605_s1 = sld [smem:[#allocation6_spill]] (!%p665_p3) }
   0xa   : > { %s2606_s26 = sld [smem:[#allocation4_spill]] (!%p665_p3)  ;;  %s2600_s30 = smov (!%p665_p3), 96  }
   0xb   : > { %s2607_s24 = sld [smem:[#allocation5_spill]] (!%p665_p3)  ;;  %s2234_s20 = smov (!%p665_p3), 80  }
   0xc   : > { %s2236_s21 = smov (!%p665_p3), 32   ;;  %s2237_s22 = smov (!%p665_p3), 48  }
   0xe   : > { %s2616_s27 = smov (!%p778_p4, %s2222_s27), 1  ;;  %vm855_vm0 = vcmask 523264   ;;  %v2089_v6 = vld [vmem:[%s2582_s4 + $0x18] sm:$0xff]  ;;  %v2088_v12 = vld [vmem:[%s2582_s4 + $0x10] sm:$0xff]  ;;  %v2087_v15 = vld [vmem:[%s2582_s4 + $0x8] sm:$0xff]  ;;  %vm1035_vm1 = vcmask 130048  }
   0xf   : > { %v2085_v0 = vld [vmem:[%s2605_s1 + $0x18] sm:$0xff]  ;;  %v2084_v1 = vld [vmem:[%s2605_s1 + $0x10] sm:$0xff]  ;;  %v2083_v2 = vld [vmem:[%s2605_s1 + $0x8] sm:$0xff]  ;;  %s2599_s23 = sshll.u32 %s2616_s27, 4  ;;  %vm1334_vm2 = vcmask 261120   ;;  %vm1337_vm3 = vcmask 392192  }
  0x10   : > { %936 = vmatpush.bf16.msra.mxu1 %v2085_v0  ;;  %s782_s0 = scalar_lea.vmem %s2606_s26, %s2599_s23  ;;  %v2082_v5 = vld [vmem:[%s2605_s1] sm:$0xff]  ;;  %s2232_s26 = smov 112   ;;  %v2093_v30 = vld [vmem:[%s2584_s6 + $0x18] sm:$0xff]  ;;  %v2092_v31 = vld [vmem:[%s2584_s6 + $0x10] sm:$0xff] }
  0x11   : > { %v853_v3 = vld [vmem:[%s782_s0] sm:$0xff]  ;;  %v854_v4 = vld [vmem:[%s782_s0 + $0x8] sm:$0xff]  ;;  %1022 = vmatpush.bf16.msra.mxu2 %v2093_v30 }
  0x12   : > { %856 = vst.msk [vmem:[#allocation2] sm:$0xff] %vm855_vm0, %v853_v3  ;;  %v860_v7 = vld [vmem:[%s2607_s24] sm:$0xff]  ;;  %v861_v8 = vld [vmem:[%s2607_s24 + $0x8] sm:$0xff] }
  0x13   : > { %857 = vst.msk [vmem:[#allocation2 + $0x8] sm:$0xff] %vm855_vm0, %v854_v4  ;;  %v2086_v16 = vld [vmem:[%s2582_s4] sm:$0xff]  ;;  %v2091_v32 = vld [vmem:[%s2584_s6 + $0x8] sm:$0xff] }
  0x14   : > { %937 = vmatpush.bf16.msra.mxu1 %v2084_v1  ;;  %v2156_v18 = vld [vmem:[%s2581_s3] ss:$0 sm:$0xff] }
  0x15   : > { %v2157_v24 = vld [vmem:[%s2583_s5] ss:$0 sm:$0xff]  ;;  %1023 = vmatpush.bf16.msra.mxu2 %v2092_v31 }
  0x16   : > { %v2090_v33 = vld [vmem:[%s2584_s6] sm:$0xff] }
  0x17   : > { %v2158_v51 = vld [vmem:[%s2585_s7] ss:$0 sm:$0xff] }
  0x18   : > { %938 = vmatpush.bf16.msra.mxu1 %v2083_v2 }
  0x19   : > { %v2383_v9 = vld [vmem:[#allocation2] sm:$0xff]  ;;  %1024 = vmatpush.bf16.msra.mxu2 %v2091_v32 }
  0x1a   : > { %v2385_v10 = vld [vmem:[#allocation2 + $0x8] sm:$0xff]  ;;  %v862_v11 = vadd.f32 %v860_v7, %v2383_v9 }
  0x1b   : > { %v863_v13 = vadd.f32 %v861_v8, %v2385_v10  ;;  %v987_v34 = vpack.c.bf16 %v2385_v10, %v2383_v9 }
  0x1c   : > { %939 = vmatpush.bf16.msra.mxu1 %v2082_v5 }
  0x1d   : > { %v900_v14 = vpack.c.bf16 %v863_v13, %v862_v11  ;;  %1025 = vmatpush.bf16.msra.mxu2 %v2090_v33 }
  0x1f   : > { %1969 = vmatmul.msk.bf16.vlgmr.msra.gmra.mxu1 %vm855_vm0, %v900_v14 }
  0x20   : > { %977 = vmatpush.bf16.msrb.mxu1 %v2089_v6  ;;  %2003 = vmatmul.msk.bf16.vlgmr.msra.gmra.mxu2 %vm855_vm0, %v987_v34 }
  0x24   : > { %978 = vmatpush.bf16.msrb.mxu1 %v2088_v12 }
  0x28   : > { %979 = vmatpush.bf16.msrb.mxu1 %v2087_v15 }
  0x2c   : > { %980 = vmatpush.bf16.msrb.mxu1 %v2086_v16 }
  0x2f   : > { %1986 = vmatmul.msk.bf16.vlgmr.msrb.gmra.mxu1 %vm855_vm0, %v900_v14 }
  0x9c   : > { %v941_v17 = vpop.f32.mrf.mxu1 }
  0x9d   : > { %v942_v20 = vadd.f32 %v2156_v18, %v941_v17 }
  0xa3   : > { %v1027_v50 = vpop.f32.mrf.mxu2 }
  0xa4   : > { %v943_v19 = vpop.f32.mrf.mxu1  ;;  %v1028_v52 = vadd.f32 %v2158_v51, %v1027_v50 }
  0xa5   : > { %v944_v21 = vadd.f32 %v2156_v18, %v943_v19 }
  0xa7   : > { %v1032_v22 = vpack.c.bf16 %v944_v21, %v942_v20 }
  0xa9   : > { %1099 = vrot.lane.b32.xlu1 %v1032_v22, %s2232_s26 }
  0xab   : > { %v1029_v53 = vpop.f32.mrf.mxu2 }
  0xac   : > { %v982_v23 = vpop.f32.mrf.mxu1  ;;  %v1030_v54 = vadd.f32 %v2158_v51, %v1029_v53 }
  0xad   : > { %v983_v26 = vadd.f32 %v2157_v24, %v982_v23 }
  0xae   : > { %v2440_v55 = vpack.c.bf16 %v1030_v54, %v1028_v52 }
  0xb1   : > { %1170 = vrot.lane.b32.xlu1 %v1032_v22, %s2600_s30 }
  0xb4   : > { %v984_v25 = vpop.f32.mrf.mxu1 }
  0xb5   : > { %v985_v27 = vadd.f32 %v2157_v24, %v984_v25 }
  0xb7   : > { %v1033_v28 = vpack.c.bf16 %v985_v27, %v983_v26 }
  0xb9   : > { %1241 = vrot.lane.b32.xlu2 %v1033_v28, %s2234_s20  ;;  %1102 = vrot.lane.b32.xlu0 %v1033_v28, %s2232_s26  ;;  %v1040_v29 = vsel %vm1035_vm1, %v1033_v28, 0 }
  0xba   : > { %1049 = vmatpush.bf16.xpose.msra.mxu3 %v1040_v29 }
  0xc1   : > { %1172 = vrot.lane.b32.xlu0 %v1033_v28, %s2600_s30  ;;  %1239 = vrot.lane.b32.xlu2 %v1032_v22, %s2234_s20 }
  0xc2   : > { %2004 = vmatmul.msk.bf16.vlgmr.msra.gmra.mxu3 %vm1035_vm1, %v1032_v22 }
  0xc3   : > { %1091 = vmatpush.bf16.msrb.mxu3 %v2440_v55 }
 0x113   : > { %v1242_v35 = vpop.permute.xlu2 %1241 }
 0x114   : > { %v1247_v38 = vsel %vm1035_vm1, %v1242_v35, 0 }
 0x11b   : > { %v1100_v39 = vpop.permute.xlu1 %1099  ;;  %v1240_v43 = vpop.permute.xlu2 %1239 }
 0x123   : > { %v1171_v42 = vpop.permute.xlu1 %1170 }
 0x12b   : > { %v1103_v36 = vpop.permute.xlu0 %1102 }
 0x12c   : > { %v1108_v37 = vsel %vm1035_vm1, %v1103_v36, 0 }
 0x12d   : > { %1117 = vmatpush.bf16.xpose.msra.mxu0 %v1108_v37 }
 0x133   : > { %v1173_v40 = vpop.permute.xlu0 %1172 }
 0x134   : > { %2006 = vmatmul.msk.bf16.vlgmr.msra.gmra.mxu0 %vm1035_vm1, %v1100_v39  ;;  %v1178_v41 = vsel %vm1035_vm1, %v1173_v40, 0 }
 0x135   : > { %1256 = vmatpush.bf16.xpose.msrb.mxu0 %v1247_v38  ;;  %1187 = vmatpush.bf16.xpose.msrb.mxu2 %v1178_v41 }
 0x13c   : > { %2008 = vmatmul.msk.bf16.vlgmr.msrb.gmra.mxu2 %vm1035_vm1, %v1171_v42 }
 0x144   : > { %2010 = vmatmul.msk.bf16.vlgmr.msrb.gmra.mxu0 %vm1035_vm1, %v1240_v43 }
 0x145   : > { %v1051_v44 = vpop.f32.mrf.mxu3 }
 0x146   : > { %v1056_v45 = vmul.f32 0.25, %v1051_v44 }
 0x148   : > { %v1058_v46 = vsel %vm1035_vm1, %v1056_v45, -inf }
 0x149   : > { %1059 = vmax.xlane.f32.xlu0 %v1058_v46 }
 0x14d   : > { %v1053_v47 = vpop.f32.mrf.mxu3 }
 0x14e   : > { %v1057_v48 = vmul.f32 0.25, %v1053_v47 }
 0x150   : > { %v1061_v49 = vsel %vm1035_vm1, %v1057_v48, -inf }
 0x151   : > { %1062 = vmax.xlane.f32.xlu1 %v1061_v49 }
 0x1b1   : > { %v1119_v56 = vpop.f32.mrf.mxu0 }
 0x1b2   : > { %v1124_v57 = vmul.f32 0.25, %v1119_v56 }
 0x1b4   : > { %v1126_v58 = vsel %vm1035_vm1, %v1124_v57, -inf }
 0x1b5   : > { %1127 = vmax.xlane.f32.xlu2 %v1126_v58 }
 0x1b9   : > { %v1121_v59 = vpop.f32.mrf.mxu0 }
 0x1ba   : > { %v1125_v60 = vmul.f32 0.25, %v1121_v59 }
 0x1bc   : > { %v1129_v61 = vsel %vm1035_vm1, %v1125_v60, -inf  ;;  %v1060_v62 = vpop.xlane.xlu0 %1059 }
 0x1bd   : > { %1130 = vmax.xlane.f32.xlu2 %v1129_v61  ;;  %v1064_v0 = vsub.f32 %v1056_v45, %v1060_v62 }
 0x1bf   : > { %v1189_v63 = vpop.f32.mrf.mxu2  ;;  %v1066_v5 = vmul.f32 1.442695, %v1064_v0 }
 0x1c0   : > { %v1194_v1 = vmul.f32 0.25, %v1189_v63 }
 0x1c1   : > { %v1258_v2 = vpop.f32.mrf.mxu0  ;;  %2166 = vpow2.f32 %v1066_v5 }
 0x1c2   : > { %v1263_v3 = vmul.f32 0.25, %v1258_v2  ;;  %v1196_v4 = vsel %vm1035_vm1, %v1194_v1, -inf }
 0x1c3   : > { %1197 = vmax.xlane.f32.xlu0 %v1196_v4 }
 0x1c4   : > { %v1063_v6 = vpop.xlane.xlu1 %1062  ;;  %v1265_v7 = vsel %vm1035_vm1, %v1263_v3, -inf }
 0x1c5   : > { %v1065_v8 = vsub.f32 %v1057_v48, %v1063_v6  ;;  %1266 = vmax.xlane.f32.xlu2 %v1265_v7 }
 0x1c7   : > { %v1068_v11 = vmul.f32 1.442695, %v1065_v8  ;;  %v1191_v12 = vpop.f32.mrf.mxu2  ;;  %v2167_v18 = vpop.eup %2166 }
 0x1c8   : > { %v1195_v13 = vmul.f32 0.25, %v1191_v12  ;;  %v1070_v21 = vsel %vm1035_vm1, %v2167_v18, 0.0 }
 0x1c9   : > { %2168 = vpow2.f32 %v1068_v11  ;;  %v1260_v14 = vpop.f32.mrf.mxu0 }
 0x1ca   : > { %v1264_v15 = vmul.f32 0.25, %v1260_v14  ;;  %v1199_v16 = vsel %vm1035_vm1, %v1195_v13, -inf }
 0x1cb   : > { %1200 = vmax.xlane.f32.xlu1 %v1199_v16 }
 0x1cc   : > { %v1268_v17 = vsel %vm1035_vm1, %v1264_v15, -inf }
 0x1cd   : > { %1269 = vmax.xlane.f32.xlu0 %v1268_v17 }
 0x1cf   : > { %v2169_v19 = vpop.eup %2168 }
 0x1d0   : > { %v1073_v20 = vsel %vm1035_vm1, %v2169_v19, 0.0 }
 0x1d1   : > { %1074 = vadd.xlane.f32.xlu2 %v1073_v20 }
 0x1d3   : > { %1071 = vadd.xlane.f32.xlu1 %v1070_v21 }
 0x1e9   : > { %1150 = vrot.lane.b32.xlu2 %v2440_v55, %s2232_s26  ;;  %s2608_s26 = smov 96  }
 0x228   : > { %v1128_v22 = vpop.xlane.xlu2 %1127 }
 0x229   : > { %v1132_v23 = vsub.f32 %v1124_v57, %v1128_v22 }
 0x22b   : > { %v1134_v24 = vmul.f32 1.442695, %v1132_v23 }
 0x22d   : > { %2170 = vpow2.f32 %v1134_v24 }
 0x230   : > { %v1131_v25 = vpop.xlane.xlu2 %1130 }
 0x231   : > { %v1133_v26 = vsub.f32 %v1125_v60, %v1131_v25 }
 0x233   : > { %v2171_v27 = vpop.eup %2170  ;;  %v1136_v28 = vmul.f32 1.442695, %v1133_v26 }
 0x234   : > { %v1138_v29 = vsel %vm1035_vm1, %v2171_v27, 0.0 }
 0x235   : > { %2172 = vpow2.f32 %v1136_v28  ;;  %1139 = vadd.xlane.f32.xlu0 %v1138_v29 }
 0x236   : > { %v1198_v30 = vpop.xlane.xlu0 %1197 }
 0x237   : > { %v1202_v31 = vsub.f32 %v1194_v1, %v1198_v30 }
 0x238   : > { %v1267_v32 = vpop.xlane.xlu2 %1266 }
 0x239   : > { %v1204_v33 = vmul.f32 1.442695, %v1202_v31  ;;  %v1271_v34 = vsub.f32 %v1263_v3, %v1267_v32  ;;  %v2097_v32 = vld [vmem:[%s2586_s8 + $0x18] sm:$0xff] }
 0x23a   : > { %1375 = vmatpush.bf16.msra.mxu2 %v2097_v32 }
 0x23b   : > { %v2173_v35 = vpop.eup %2172  ;;  %2174 = vpow2.f32 %v1204_v33  ;;  %v1273_v37 = vmul.f32 1.442695, %v1271_v34  ;;  %v2096_v33 = vld [vmem:[%s2586_s8 + $0x10] sm:$0xff]  ;;  %v2095_v34 = vld [vmem:[%s2586_s8 + $0x8] sm:$0xff] }
 0x23c   : > { %v1141_v36 = vsel %vm1035_vm1, %v2173_v35, 0.0 }
 0x23d   : > { %1142 = vadd.xlane.f32.xlu1 %v1141_v36  ;;  %2176 = vpow2.f32 %v1273_v37 }
 0x23e   : > { %v1201_v38 = vpop.xlane.xlu1 %1200  ;;  %1376 = vmatpush.bf16.msra.mxu2 %v2096_v33 }
 0x23f   : > { %v1203_v39 = vsub.f32 %v1195_v13, %v1201_v38 }
 0x240   : > { %v1270_v40 = vpop.xlane.xlu0 %1269 }
 0x241   : > { %v2175_v41 = vpop.eup %2174  ;;  %v1206_v42 = vmul.f32 1.442695, %v1203_v39  ;;  %v1272_v43 = vsub.f32 %v1264_v15, %v1270_v40 }
 0x242   : > { %v1208_v44 = vsel %vm1035_vm1, %v2175_v41, 0.0  ;;  %1377 = vmatpush.bf16.msra.mxu2 %v2095_v34 }
 0x243   : > { %2178 = vpow2.f32 %v1206_v42  ;;  %1209 = vadd.xlane.f32.xlu0 %v1208_v44  ;;  %v1275_v46 = vmul.f32 1.442695, %v1272_v43  ;;  %v2177_v48 = vpop.eup %2176 }
 0x244   : > { %v1075_v45 = vpop.xlane.xlu2 %1074  ;;  %v1277_v50 = vsel %vm1035_vm1, %v2177_v48, 0.0 }
 0x245   : > { %2180 = vrcp.f32 %v1075_v45 }
 0x246   : > { %v1072_v47 = vpop.xlane.xlu1 %1071 }
 0x247   : > { %2182 = vrcp.f32 %v1072_v47 }
 0x248   : > { %2184 = vpow2.f32 %v1275_v46 }
 0x249   : > { %v2179_v49 = vpop.eup %2178 }
 0x24a   : > { %v1211_v51 = vsel %vm1035_vm1, %v2179_v49, 0.0 }
 0x24b   : > { %1278 = vadd.xlane.f32.xlu0 %v1277_v50  ;;  %1212 = vadd.xlane.f32.xlu1 %v1211_v51  ;;  %v2181_v52 = vpop.eup %2180 }
 0x24c   : > { %v1151_v53 = vpop.permute.xlu2 %1150  ;;  %v1079_v56 = vmul.f32 %v2181_v52, %v2169_v19  ;;  %v2159_v52 = vld [vmem:[%s2587_s9] ss:$0 sm:$0xff] }
 0x24d   : > { %v2183_v54 = vpop.eup %2182  ;;  %1163 = vmatpush.bf16.msra.mxu1 %v1151_v53 }
 0x24e   : > { %v1078_v57 = vmul.f32 %v2183_v54, %v2167_v18  ;;  %v2185_v58 = vpop.eup %2184 }
 0x24f   : > { %v1280_v60 = vsel %vm1035_vm1, %v2185_v58, 0.0 }
 0x250   : > { %v1080_v59 = vpack.c.bf16 %v1079_v56, %v1078_v57 }
 0x252   : > { %2005 = vmatmul.msk.bf16.vlgmr.msrb.gmra.mxu3 %vm1035_vm1, %v1080_v59 }
 0x253   : > { %1281 = vadd.xlane.f32.xlu1 %v1280_v60 }
 0x25f   : > { %1219 = vrot.lane.b32.xlu0 %v2440_v55, %s2608_s26  ;;  %s2609_s26 = sshll.u32 %s2616_s27, 4 }
 0x26c   : > { %1288 = vrot.lane.b32.xlu1 %v2440_v55, %s2234_s20  ;;  %s2235_s20 = smov 16  }
 0x2a8   : > { %v1140_v61 = vpop.xlane.xlu0 %1139 }
 0x2a9   : > { %2186 = vrcp.f32 %v1140_v61 }
 0x2af   : > { %v2187_v63 = vpop.eup %2186 }
 0x2b0   : > { %v1143_v62 = vpop.xlane.xlu1 %1142  ;;  %v1146_v1 = vmul.f32 %v2187_v63, %v2171_v27 }
 0x2b1   : > { %2188 = vrcp.f32 %v1143_v62  ;;  %v2238_v62 = vmov 64.0  }
 0x2b6   : > { %v1210_v4 = vpop.xlane.xlu0 %1209 }
 0x2b7   : > { %v2189_v0 = vpop.eup %2188 }
 0x2b8   : > { %v1147_v2 = vmul.f32 %v2189_v0, %v2173_v35  ;;  %v2094_v35 = vld [vmem:[%s2586_s8] sm:$0xff] }
 0x2b9   : > { %1378 = vmatpush.bf16.msra.mxu2 %v2094_v35 }
 0x2ba   : > { %v1148_v3 = vpack.c.bf16 %v1147_v2, %v1146_v1 }
 0x2bc   : > { %2007 = vmatmul.msk.bf16.vlgmr.msra.gmra.mxu1 %vm1035_vm1, %v1148_v3 }
 0x2be   : > { %v1213_v5 = vpop.xlane.xlu1 %1212  ;;  %v1279_v6 = vpop.xlane.xlu0 %1278 }
 0x2bf   : > { %2190 = vrcp.f32 %v1213_v5 }
 0x2c0   : > { %2192 = vrcp.f32 %v1210_v4 }
 0x2c5   : > { %v2191_v7 = vpop.eup %2190 }
 0x2c6   : > { %v2193_v8 = vpop.eup %2192  ;;  %v1217_v11 = vmul.f32 %v2191_v7, %v2179_v49  ;;  %v1282_v55 = vpop.xlane.xlu1 %1281 }
 0x2c7   : > { %v1216_v12 = vmul.f32 %v2193_v8, %v2175_v41  ;;  %2194 = vrcp.f32 %v1282_v55 }
 0x2c8   : > { %2196 = vrcp.f32 %v1279_v6 }
 0x2c9   : > { %v1218_v14 = vpack.c.bf16 %v1217_v11, %v1216_v12  ;;  %2198 = vrcp.f32 %v2238_v62 }
 0x2cd   : > { %v2195_v15 = vpop.eup %2194 }
 0x2ce   : > { %v2197_v16 = vpop.eup %2196  ;;  %v1286_v17 = vmul.f32 %v2195_v15, %v2185_v58  ;;  %v2100_v15 = vld [vmem:[%s2590_s12 + $0x10] sm:$0xff] }
 0x2cf   : > { %v1285_v18 = vmul.f32 %v2197_v16, %v2177_v48  ;;  %v2199_v63 = vpop.eup %2198 }
 0x2d0   : > { %v1396_v0 = vmul.f32 64.0, %v2199_v63  ;;  %vm1400_vm4 = vweird.f32 %v2199_v63 }
 0x2d1   : > { %v1220_v13 = vpop.permute.xlu0 %1219  ;;  %v1287_v20 = vpack.c.bf16 %v1286_v17, %v1285_v18  ;;  %v2099_v17 = vld [vmem:[%s2590_s12 + $0x8] sm:$0xff] }
 0x2d2   : > { %1232 = vmatpush.bf16.msra.mxu3 %v1220_v13  ;;  %v1397_v1 = vsub.f32 1.0, %v1396_v0  ;;  %v2163_v0 = vld [vmem:[%s2593_s15] ss:$0 sm:$0xff] }
 0x2d4   : > { %v1398_v2 = vmul.f32 %v2199_v63, %v1397_v1 }
 0x2d5   : > { %2009 = vmatmul.msk.bf16.vlgmr.msra.gmra.mxu3 %vm1035_vm1, %v1218_v14  ;;  %v1093_v24 = vpop.f32.mrf.mxu3  ;;  %v2101_v14 = vld [vmem:[%s2590_s12 + $0x18] sm:$0xff] }
 0x2d6   : > { %v1399_v3 = vadd.f32 %v2199_v63, %v1398_v2  ;;  %1511 = vmatpush.bf16.msrb.mxu3 %v2101_v14 }
 0x2d8   : > { %v2489_v4 = vsel %vm1400_vm4, %v2199_v63, %v1399_v3 }
 0x2da   : > { %1512 = vmatpush.bf16.msrb.mxu3 %v2100_v15 }
 0x2dd   : > { %v1095_v25 = vpop.f32.mrf.mxu3 }
 0x2de   : > { %v1289_v19 = vpop.permute.xlu1 %1288  ;;  %1513 = vmatpush.bf16.msrb.mxu3 %v2099_v17 }
 0x2df   : > { %1301 = vmatpush.bf16.msrb.mxu1 %v1289_v19 }
 0x2e2   : > { %2011 = vmatmul.msk.bf16.vlgmr.msrb.gmra.mxu1 %vm1035_vm1, %v1287_v20  ;;  %v2098_v20 = vld [vmem:[%s2590_s12] sm:$0xff] }
 0x2e3   : > { %1514 = vmatpush.bf16.msrb.mxu3 %v2098_v20 }
 0x339   : > { %v1165_v21 = vpop.f32.mrf.mxu1 }
 0x341   : > { %v1167_v22 = vpop.f32.mrf.mxu1 }
 0x342   : > { %v2141_v23 = vpack.i.bf16 %v1167_v22, %v1165_v21  ;;  %v2109_v21 = vld [vmem:[%s2592_s14 + $0x38] sm:$0xff] }
 0x343   : > { %1575 = vmatpush.bf16.msra.mxu0 %v2109_v21 }
 0x344   : > { %2142 = vrot.lane.b32.xlu2 %v2141_v23, %s2235_s20 }
 0x358   : > { %v1234_v26 = vpop.f32.mrf.mxu3 }
 0x35f   : > { %v1303_v27 = vpop.f32.mrf.mxu1 }
 0x360   : > { %v1236_v28 = vpop.f32.mrf.mxu3 }
 0x361   : > { %v2146_v29 = vpack.i.bf16 %v1236_v28, %v1234_v26  ;;  %v2107_v28 = vld [vmem:[%s2592_s14 + $0x28] sm:$0xff] }
 0x363   : > { %2147 = vrot.lane.b32.xlu2 %v2146_v29, %s2236_s21 }
 0x367   : > { %v1305_v30 = vpop.f32.mrf.mxu1 }
 0x368   : > { %v2151_v31 = vpack.i.bf16 %v1305_v30, %v1303_v27 }
 0x36a   : > { %2152 = vrot.lane.b32.xlu0 %v2151_v31, %s2237_s22  ;;  %v2106_v31 = vld [vmem:[%s2592_s14 + $0x20] sm:$0xff]  ;;  %s847_s22 = scalar_lea.vmem %s2596_s18, %s2609_s26 }
 0x39e   : > { %v2143_v36 = vpop.permute.xlu2 %2142 }
 0x39f   : > { %v2145_v38 = vunpack.i.h.bf16 %v2143_v36  ;;  %v2144_v39 = vunpack.i.l.bf16 %v2143_v36 }
 0x3a1   : > { %v1333_v43 = vsel %vm1035_vm1, %v1095_v25, %v2145_v38  ;;  %v1332_v44 = vsel %vm1035_vm1, %v1093_v24, %v2144_v39  ;;  %v2108_v24 = vld [vmem:[%s2592_s14 + $0x30] sm:$0xff] }
 0x3a2   : > { %1576 = vmatpush.bf16.msra.mxu0 %v2108_v24 }
 0x3a6   : > { %1577 = vmatpush.bf16.msra.mxu0 %v2107_v28 }
 0x3aa   : > { %1578 = vmatpush.bf16.msra.mxu0 %v2106_v31 }
 0x3bd   : > { %v2148_v37 = vpop.permute.xlu2 %2147 }
 0x3be   : > { %v2150_v40 = vunpack.i.h.bf16 %v2148_v37  ;;  %v2149_v41 = vunpack.i.l.bf16 %v2148_v37 }
 0x3c0   : > { %v1336_v47 = vsel %vm1334_vm2, %v1333_v43, %v2150_v40  ;;  %v1335_v48 = vsel %vm1334_vm2, %v1332_v44, %v2149_v41  ;;  %v2160_v40 = vld [vmem:[%s2588_s10] ss:$0 sm:$0xff] }
 0x3c1   : > { %v2161_v44 = vld [vmem:[%s2589_s11] ss:$0 sm:$0xff] }
 0x3dc   : > { %v2153_v42 = vpop.permute.xlu0 %2152 }
 0x3dd   : > { %v2155_v45 = vunpack.i.h.bf16 %v2153_v42  ;;  %v2154_v46 = vunpack.i.l.bf16 %v2153_v42 }
 0x3df   : > { %v1339_v49 = vsel %vm1337_vm3, %v1336_v47, %v2155_v45  ;;  %v1338_v50 = vsel %vm1337_vm3, %v1335_v48, %v2154_v46 }
 0x3e0   : > { %v1340_v51 = vpack.c.bf16 %v1339_v49, %v1338_v50 }
 0x3e2   : > { %2028 = vmatmul.msk.bf16.vlgmr.msra.gmra.mxu2 %vm855_vm0, %v1340_v51  ;;  %v2105_v51 = vld [vmem:[%s2592_s14 + $0x18] sm:$0xff] }
 0x3e3   : > { %1579 = vmatpush.bf16.msra.mxu0 %v2105_v51 }
 0x465   : > { %v1380_v53 = vpop.f32.mrf.mxu2 }
 0x466   : > { %v1381_v54 = vadd.f32 %v2159_v52, %v1380_v53  ;;  %v2103_v53 = vld [vmem:[%s2592_s14 + $0x8] sm:$0xff] }
 0x468   : > { %v1385_v56 = vadd.f32 %v1381_v54, %v2383_v9  ;;  %v2102_v54 = vld [vmem:[%s2592_s14] sm:$0xff] }
 0x46a   : > { %v1389_v57 = vsel %vm855_vm0, %v1385_v56, 0.0 }
 0x46b   : > { %1390 = vadd.xlane.f32.xlu2 %v1389_v57  ;;  %v2162_v57 = vld [vmem:[%s2591_s13] ss:$0 sm:$0xff] }
 0x46d   : > { %v1382_v58 = vpop.f32.mrf.mxu2 }
 0x46e   : > { %v1383_v59 = vadd.f32 %v2159_v52, %v1382_v58  ;;  %v2104_v52 = vld [vmem:[%s2592_s14 + $0x10] sm:$0xff] }
 0x46f   : > { %1580 = vmatpush.bf16.msra.mxu0 %v2104_v52 }
 0x470   : > { %v1386_v60 = vadd.f32 %v1383_v59, %v2385_v10 }
 0x472   : > { %v1392_v61 = vsel %vm855_vm0, %v1386_v60, 0.0 }
 0x473   : > { %1393 = vadd.xlane.f32.xlu1 %v1392_v61  ;;  %1581 = vmatpush.bf16.msra.mxu0 %v2103_v53 }
 0x477   : > { %1582 = vmatpush.bf16.msra.mxu0 %v2102_v54 }
 0x4de   : > { %v1391_v9 = vpop.xlane.xlu2 %1390 }
 0x4df   : > { %v1402_v5 = vmul.f32 %v2489_v4, %v1391_v9 }
 0x4e1   : > { %v1404_v6 = vsub.f32 %v1385_v56, %v1402_v5 }
 0x4e3   : > { %v1406_v7 = vmul.f32 %v1404_v6, %v1404_v6 }
 0x4e5   : > { %v1408_v10 = vsel %vm855_vm0, %v1406_v7, 0.0 }
 0x4e6   : > { %v1394_v8 = vpop.xlane.xlu1 %1393  ;;  %1409 = vadd.xlane.f32.xlu0 %v1408_v10 }
 0x4e7   : > { %v1403_v11 = vmul.f32 %v2489_v4, %v1394_v8 }
 0x4e9   : > { %v1405_v55 = vsub.f32 %v1386_v60, %v1403_v11 }
 0x4eb   : > { %v1407_v12 = vmul.f32 %v1405_v55, %v1405_v55 }
 0x4ed   : > { %v1411_v13 = vsel %vm855_vm0, %v1407_v12, 0.0 }
 0x4ee   : > { %1412 = vadd.xlane.f32.xlu2 %v1411_v13 }
 0x559   : > { %v1410_v16 = vpop.xlane.xlu0 %1409 }
 0x55a   : > { %v1414_v18 = vmul.f32 %v1410_v16, %v2489_v4 }
 0x55c   : > { %v1416_v19 = vadd.f32 1e-05, %v1414_v18 }
 0x55e   : > { %2200 = vrsqrt.f32 %v1416_v19  ;;  %vm1424_vm6 = vweird.f32 %v1416_v19 }
 0x561   : > { %v1413_v22 = vpop.xlane.xlu2 %1412 }
 0x562   : > { %v1415_v23 = vmul.f32 %v1413_v22, %v2489_v4 }
 0x564   : > { %v2201_v25 = vpop.eup %2200  ;;  %v1417_v26 = vadd.f32 1e-05, %v1415_v23 }
 0x565   : > { %v1419_v27 = vmul.f32 %v2201_v25, %v1416_v19  ;;  %vm1425_vm5 = vweird.f32 %v2201_v25 }
 0x566   : > { %2202 = vrsqrt.f32 %v1417_v26  ;;  %vm1426_vm7 = vmor %vm1424_vm6, %vm1425_vm5  ;;  %vm1434_vm9 = vweird.f32 %v1417_v26 }
 0x567   : > { %v1420_v29 = vmul.f32 %v2201_v25, %v1419_v27 }
 0x569   : > { %v1421_v30 = vmul.f32 0.5, %v1420_v29 }
 0x56b   : > { %v1422_v32 = vsub.f32 1.5, %v1421_v30 }
 0x56c   : > { %v2203_v33 = vpop.eup %2202 }
 0x56d   : > { %v1423_v34 = vmul.f32 %v2201_v25, %v1422_v32  ;;  %v1429_v35 = vmul.f32 %v2203_v33, %v1417_v26  ;;  %vm1435_vm8 = vweird.f32 %v2203_v33 }
 0x56e   : > { %vm1436_vm10 = vmor %vm1434_vm9, %vm1435_vm8 }
 0x56f   : > { %v1430_v36 = vmul.f32 %v2203_v33, %v1429_v35  ;;  %v1427_v37 = vsel %vm1426_vm7, %v2201_v25, %v1423_v34  ;;  %v2165_v35 = vld [vmem:[%s2595_s17] ss:$0 sm:$0xff] }
 0x570   : > { %v1438_v41 = vmul.f32 %v1427_v37, %v1404_v6 }
 0x571   : > { %v1431_v38 = vmul.f32 0.5, %v1430_v36 }
 0x572   : > { %v1443_v45 = vmul.f32 %v2160_v40, %v1438_v41 }
 0x573   : > { %v1432_v39 = vsub.f32 1.5, %v1431_v38 }
 0x574   : > { %v1448_v48 = vadd.f32 %v2161_v44, %v1443_v45 }
 0x575   : > { %v1433_v42 = vmul.f32 %v2203_v33, %v1432_v39 }
 0x577   : > { %v1437_v43 = vsel %vm1436_vm10, %v2203_v33, %v1433_v42  ;;  %v2164_v33 = vld [vmem:[%s2594_s16] ss:$0 sm:$0xff] }
 0x578   : > { %v1439_v46 = vmul.f32 %v1437_v43, %v1405_v55 }
 0x57a   : > { %v1444_v47 = vmul.f32 %v2160_v40, %v1439_v46 }
 0x57c   : > { %v1449_v49 = vadd.f32 %v2161_v44, %v1444_v47 }
 0x57e   : > { %v1476_v50 = vpack.c.bf16 %v1449_v49, %v1448_v48 }
 0x580   : > { %2045 = vmatmul.msk.bf16.vlgmr.msrb.gmra.mxu3 %vm855_vm0, %v1476_v50 }
 0x603   : > { %v1516_v56 = vpop.f32.mrf.mxu3 }
 0x604   : > { %v1517_v58 = vadd.f32 %v2162_v57, %v1516_v56 }
 0x606   : > { %v1521_v61 = vmax.f32 %v1517_v58, 0.0 }
 0x60b   : > { %v1518_v59 = vpop.f32.mrf.mxu3 }
 0x60c   : > { %v1519_v60 = vadd.f32 %v2162_v57, %v1518_v59 }
 0x60e   : > { %v1522_v62 = vmax.f32 %v1519_v60, 0.0 }
 0x610   : > { %v1523_v63 = vpack.c.bf16 %v1522_v62, %v1521_v61 }
 0x612   : > { %1583 = vmatmul.bf16.vlgmr.msra.gmra.mxu0 %v1523_v63 }
 0x68f   : > { %v1584_v1 = vpop.f32.mrf.mxu0 }
 0x690   : > { %v1585_v2 = vadd.f32 %v2163_v0, %v1584_v1 }
 0x692   : > { %v1589_v3 = vadd.f32 %v1585_v2, %v1448_v48 }
 0x694   : > { %v1593_v9 = vsel %vm855_vm0, %v1589_v3, 0.0 }
 0x695   : > { %1594 = vadd.xlane.f32.xlu1 %v1593_v9 }
 0x697   : > { %v1586_v5 = vpop.f32.mrf.mxu0 }
 0x698   : > { %v1587_v6 = vadd.f32 %v2163_v0, %v1586_v5 }
 0x69a   : > { %v1590_v7 = vadd.f32 %v1587_v6, %v1449_v49 }
 0x69c   : > { %v1596_v10 = vsel %vm855_vm0, %v1590_v7, 0.0 }
 0x69d   : > { %1597 = vadd.xlane.f32.xlu0 %v1596_v10 }
 0x708   : > { %v1595_v8 = vpop.xlane.xlu1 %1594 }
 0x709   : > { %v1599_v11 = vmul.f32 %v1595_v8, %v2489_v4 }
 0x70b   : > { %v1601_v55 = vsub.f32 %v1589_v3, %v1599_v11 }
 0x70d   : > { %v1603_v12 = vmul.f32 %v1601_v55, %v1601_v55 }
 0x70f   : > { %v1605_v13 = vsel %vm855_vm0, %v1603_v12, 0.0 }
 0x710   : > { %v1598_v14 = vpop.xlane.xlu0 %1597  ;;  %1606 = vadd.xlane.f32.xlu2 %v1605_v13 }
 0x711   : > { %v1600_v15 = vmul.f32 %v1598_v14, %v2489_v4 }
 0x713   : > { %v1602_v16 = vsub.f32 %v1590_v7, %v1600_v15 }
 0x715   : > { %v1604_v17 = vmul.f32 %v1602_v16, %v1602_v16 }
 0x717   : > { %v1608_v18 = vsel %vm855_vm0, %v1604_v17, 0.0 }
 0x718   : > { %1609 = vadd.xlane.f32.xlu1 %v1608_v18 }
 0x783   : > { %v1607_v19 = vpop.xlane.xlu2 %1606 }
 0x784   : > { %v1611_v20 = vmul.f32 %v1607_v19, %v2489_v4 }
 0x786   : > { %v1613_v21 = vadd.f32 1e-05, %v1611_v20 }
 0x788   : > { %2204 = vrsqrt.f32 %v1613_v21  ;;  %vm1621_vm12 = vweird.f32 %v1613_v21 }
 0x78b   : > { %v1610_v22 = vpop.xlane.xlu1 %1609 }
 0x78c   : > { %v1612_v23 = vmul.f32 %v1610_v22, %v2489_v4 }
 0x78e   : > { %v2205_v24 = vpop.eup %2204  ;;  %v1614_v25 = vadd.f32 1e-05, %v1612_v23 }
 0x78f   : > { %v1616_v26 = vmul.f32 %v2205_v24, %v1613_v21  ;;  %vm1622_vm11 = vweird.f32 %v2205_v24 }
 0x790   : > { %2206 = vrsqrt.f32 %v1614_v25  ;;  %vm1623_vm13 = vmor %vm1621_vm12, %vm1622_vm11  ;;  %vm1631_vm15 = vweird.f32 %v1614_v25 }
 0x791   : > { %v1617_v27 = vmul.f32 %v2205_v24, %v1616_v26 }
 0x793   : > { %v1618_v28 = vmul.f32 0.5, %v1617_v27 }
 0x795   : > { %v1619_v29 = vsub.f32 1.5, %v1618_v28 }
 0x796   : > { %v2207_v30 = vpop.eup %2206 }
 0x797   : > { %v1620_v31 = vmul.f32 %v2205_v24, %v1619_v29  ;;  %v1626_v32 = vmul.f32 %v2207_v30, %v1614_v25  ;;  %vm1632_vm14 = vweird.f32 %v2207_v30 }
 0x798   : > { %vm1633_vm1 = vmor %vm1631_vm15, %vm1632_vm14 }
 0x799   : > { %v1624_v34 = vsel %vm1623_vm13, %v2205_v24, %v1620_v31  ;;  %v1627_v4 = vmul.f32 %v2207_v30, %v1626_v32 }
 0x79a   : > { %v1635_v36 = vmul.f32 %v1624_v34, %v1601_v55 }
 0x79b   : > { %v1628_v37 = vmul.f32 0.5, %v1627_v4 }
 0x79c   : > { %v1640_v38 = vmul.f32 %v2164_v33, %v1635_v36 }
 0x79d   : > { %v1629_v39 = vsub.f32 1.5, %v1628_v37 }
 0x79e   : > { %v1645_v40 = vadd.f32 %v2165_v35, %v1640_v38 }
 0x79f   : > { %v1630_v41 = vmul.f32 %v2207_v30, %v1629_v39 }
 0x7a0   : > { %1647 = vst.msk [vmem:[#allocation2] sm:$0xff] %vm855_vm0, %v1645_v40 }
 0x7a1   : > { %1652 = vst.msk [vmem:[%s847_s22] sm:$0xff] %vm855_vm0, %v1645_v40  ;;  %v1634_v42 = vsel %vm1633_vm1, %v2207_v30, %v1630_v41 }
 0x7a2   : > { %v1636_v43 = vmul.f32 %v1634_v42, %v1602_v16 }
 0x7a4   : > { %v1641_v44 = vmul.f32 %v2164_v33, %v1636_v43 }
 0x7a6   : > { %v1646_v45 = vadd.f32 %v2165_v35, %v1641_v44 }
 0x7a8   : > { %1648 = vst.msk [vmem:[#allocation2 + $0x8] sm:$0xff] %vm855_vm0, %v1646_v45 }
 0x7a9   : > { %1653 = vst.msk [vmem:[%s847_s22 + $0x8] sm:$0xff] %vm855_vm0, %v1646_v45 }
 0x7aa PF: > { %s28_s29 = sadd.s32 1, %s2230_s29   ;;  %s2610_s2 = sld [smem:[#allocation3_spill]] }
 0x7ab   : > { %p25_p5 = scmp.ge.s32.totalorder %s28_s29, 4   ;;  %s2611_s27 = smov %s2226_s28 }
 0x7ad   :  { %27 = sbr.rel (!%p25_p5) target bundleno = 4 (0x4), region = 178 }
 0x7b0   : > { %s2612_s28 = smov %s2610_s2 }

// kernel: _lambda_.9
= control target key start
LH: loop header
LB: loop body
LE: loop exit
PB: predicated region body
PF: predicated region fallthrough
CT: control target
= control target key end

     0   :  { %s4590_s6 = smov 1   ;;  %s4591_s10 = smov 2   ;;  %s5386_s0 = inlined_call_operand.smem [shape: u32[41], index: -1, kind: input, shape index: {}] }
   0x1   :  { %s4645_s5 = sld [smem:[%s5386_s0]]   ;;  %s4592_s14 = smov 3  }
   0x2   :  { %s4650_s9 = sld [smem:[%s5386_s0 + %s4590_s6]]   ;;  %s4593_s18 = smov 4  }
   0x3   :  { %s4655_s13 = sld [smem:[%s5386_s0 + %s4591_s10]]   ;;  %s4594_s22 = smov 5  }
   0x4   :  { %s4660_s17 = sld [smem:[%s5386_s0 + %s4592_s14]]   ;;  %s4595_s26 = smov 6  }
   0x5   :  { %s4665_s21 = sld [smem:[%s5386_s0 + %s4593_s18]]   ;;  %s4596_s30 = smov 7  }
   0x6   :  { %s4670_s25 = sld [smem:[%s5386_s0 + %s4594_s22]]   ;;  %s4597_s4 = smov 8  }
   0x7   :  { %5408 = sst [smem:[#allocation3_spill]] %s4645_s5  ;;  %s4598_s10 = smov 9  }
   0x8   :  { %5409 = sst [smem:[#allocation4_spill]] %s4650_s9  ;;  %s4599_s15 = smov 10  }
   0x9   :  { %5410 = sst [smem:[#allocation5_spill]] %s4655_s13  ;;  %s4600_s20 = smov 11  }
   0xa   :  { %5411 = sst [smem:[#allocation6_spill]] %s4660_s17  ;;  %s4602_s1 = smov 13  }
   0xb   :  { %5412 = sst [smem:[#allocation7_spill]] %s4665_s21  ;;  %s4603_s7 = smov 14  }
   0xc   :  { %5413 = sst [smem:[#allocation8_spill]] %s4670_s25  ;;  %s4605_s22 = smov 16  }
   0xd   :  { %s4675_s29 = sld [smem:[%s5386_s0 + %s4595_s26]]   ;;  %s4601_s26 = smov 12  }
   0xe   :  { %s4680_s3 = sld [smem:[%s5386_s0 + %s4596_s30]]   ;;  %s4606_s28 = smov 17  }
   0xf   :  { %s4685_s8 = sld [smem:[%s5386_s0 + %s4597_s4]]   ;;  %s4851_s2 = smov 0  }
  0x10   :  { %s4690_s14 = sld [smem:[%s5386_s0 + %s4598_s10]]   ;;  %s4855_s10 = smov 0  }
  0x11   :  { %s4695_s19 = sld [smem:[%s5386_s0 + %s4599_s15]]   ;;  %s4604_s15 = smov 15  }
  0x12   :  { %s4700_s24 = sld [smem:[%s5386_s0 + %s4600_s20]]  }
  0x13   :  { %5414 = sst [smem:[#allocation9_spill]] %s4675_s29 }
  0x14   :  { %5415 = sst [smem:[#allocation10_spill]] %s4680_s3 }
  0x15   :  { %5416 = sst [smem:[#allocation11_spill]] %s4685_s8 }
  0x16   :  { %5417 = sst [smem:[#allocation12_spill]] %s4690_s14 }
  0x17   :  { %5418 = sst [smem:[#allocation13_spill]] %s4695_s19 }
  0x18   :  { %5419 = sst [smem:[#allocation14_spill]] %s4700_s24 }
  0x19   :  { %s4705_s30 = sld [smem:[%s5386_s0 + %s4601_s26]]  }
  0x1a   :  { %s4710_s6 = sld [smem:[%s5386_s0 + %s4602_s1]]   ;;  %s4849_s1 = smov 0  }
  0x1b   :  { %s4715_s12 = sld [smem:[%s5386_s0 + %s4603_s7]]   ;;  %s4607_s7 = smov 18  }
  0x1c   :  { %s4720_s20 = sld [smem:[%s5386_s0 + %s4604_s15]]   ;;  %s4608_s15 = smov 19  }
  0x1d   :  { %s4725_s27 = sld [smem:[%s5386_s0 + %s4605_s22]]   ;;  %s4609_s22 = smov 20  }
  0x1e   :  { %s4730_s4 = sld [smem:[%s5386_s0 + %s4606_s28]]   ;;  %s4610_s28 = smov 21  }
  0x1f   :  { %5420 = sst [smem:[#allocation15_spill]] %s4705_s30 }
  0x20   :  { %5421 = sst [smem:[#allocation16_spill]] %s4710_s6 }
  0x21   :  { %5422 = sst [smem:[#allocation17_spill]] %s4715_s12 }
  0x22   :  { %5423 = sst [smem:[#allocation18_spill]] %s4720_s20 }
  0x23   :  { %5424 = sst [smem:[#allocation19_spill]] %s4725_s27 }
  0x24   :  { %5425 = sst [smem:[#allocation20_spill]] %s4730_s4 }
  0x25   :  { %s4735_s21 = sld [smem:[%s5386_s0 + %s4607_s7]]   ;;  %s4611_s7 = smov 22  }
  0x26   :  { %s4740_s17 = sld [smem:[%s5386_s0 + %s4608_s15]]   ;;  %s4612_s15 = smov 23  }
  0x27   :  { %s4745_s9 = sld [smem:[%s5386_s0 + %s4609_s22]]   ;;  %s4613_s22 = smov 24  }
  0x28   :  { %s4750_s4 = sld [smem:[%s5386_s0 + %s4610_s28]]   ;;  %s4614_s28 = smov 25  }
  0x2b   :  { %5426 = sst [smem:[#allocation21_spill]] %s4735_s21 }
  0x2c   :  { %5427 = sst [smem:[#allocation22_spill]] %s4740_s17 }
  0x2d   :  { %5428 = sst [smem:[#allocation23_spill]] %s4745_s9 }
  0x2e   :  { %5429 = sst [smem:[#allocation24_spill]] %s4750_s4 }
  0x2f   :  { %s4755_s21 = sld [smem:[%s5386_s0 + %s4611_s7]]   ;;  %s4615_s7 = smov 26  }
  0x30   :  { %s4760_s17 = sld [smem:[%s5386_s0 + %s4612_s15]]   ;;  %s4616_s15 = smov 27  }
  0x31   :  { %s4765_s9 = sld [smem:[%s5386_s0 + %s4613_s22]]   ;;  %s4617_s22 = smov 28  }
  0x32   :  { %s4770_s4 = sld [smem:[%s5386_s0 + %s4614_s28]]   ;;  %s4618_s28 = smov 29  }
  0x35   :  { %5430 = sst [smem:[#allocation25_spill]] %s4755_s21 }
  0x36   :  { %5431 = sst [smem:[#allocation26_spill]] %s4760_s17 }
  0x37   :  { %5432 = sst [smem:[#allocation27_spill]] %s4765_s9 }
  0x38   :  { %5433 = sst [smem:[#allocation28_spill]] %s4770_s4 }
  0x39   :  { %s4775_s21 = sld [smem:[%s5386_s0 + %s4615_s7]]   ;;  %s4619_s7 = smov 30  }
  0x3a   :  { %s4780_s17 = sld [smem:[%s5386_s0 + %s4616_s15]]   ;;  %s4620_s15 = smov 31  }
  0x3b   :  { %s4785_s9 = sld [smem:[%s5386_s0 + %s4617_s22]]   ;;  %s4621_s22 = smov 32  }
  0x3c   :  { %s4790_s4 = sld [smem:[%s5386_s0 + %s4618_s28]]   ;;  %s4622_s28 = smov 33  }
  0x3f   :  { %5434 = sst [smem:[#allocation29_spill]] %s4775_s21 }
  0x40   :  { %5435 = sst [smem:[#allocation30_spill]] %s4780_s17 }
  0x41   :  { %5436 = sst [smem:[#allocation31_spill]] %s4785_s9 }
  0x42   :  { %5437 = sst [smem:[#allocation32_spill]] %s4790_s4 }
  0x43   :  { %s4795_s21 = sld [smem:[%s5386_s0 + %s4619_s7]]   ;;  %s4623_s7 = smov 34  }
  0x44   :  { %s4800_s17 = sld [smem:[%s5386_s0 + %s4620_s15]]   ;;  %s4624_s15 = smov 35  }
  0x45   :  { %s4805_s9 = sld [smem:[%s5386_s0 + %s4621_s22]]   ;;  %s4625_s22 = smov 36  }
  0x46   :  { %s4810_s4 = sld [smem:[%s5386_s0 + %s4622_s28]]   ;;  %s4626_s28 = smov 37  }
  0x49   :  { %5438 = sst [smem:[#allocation33_spill]] %s4795_s21 }
  0x4a   :  { %5439 = sst [smem:[#allocation34_spill]] %s4800_s17 }
  0x4b   :  { %5440 = sst [smem:[#allocation35_spill]] %s4805_s9 }
  0x4c   :  { %5441 = sst [smem:[#allocation36_spill]] %s4810_s4 }
  0x4d   :  { %s4815_s21 = sld [smem:[%s5386_s0 + %s4623_s7]]   ;;  %s4627_s7 = smov 38  }
  0x4e   :  { %s4820_s17 = sld [smem:[%s5386_s0 + %s4624_s15]]   ;;  %s4628_s15 = smov 39  }
  0x4f   :  { %s4825_s9 = sld [smem:[%s5386_s0 + %s4625_s22]]   ;;  %s4629_s22 = smov 40  }
  0x50   :  { %s4830_s4 = sld [smem:[%s5386_s0 + %s4626_s28]]   ;;  %s4847_s28 = smov 0  }
  0x53   :  { %5442 = sst [smem:[#allocation37_spill]] %s4815_s21 }
  0x54   :  { %5443 = sst [smem:[#allocation38_spill]] %s4820_s17 }
  0x55   :  { %5444 = sst [smem:[#allocation39_spill]] %s4825_s9 }
  0x56   :  { %5445 = sst [smem:[#allocation40_spill]] %s4830_s4 }
  0x57   :  { %s4835_s21 = sld [smem:[%s5386_s0 + %s4627_s7]]   ;;  %s4853_s7 = smov 0  }
  0x58   :  { %s4840_s17 = sld [smem:[%s5386_s0 + %s4628_s15]]  }
  0x59   :  { %s4845_s9 = sld [smem:[%s5386_s0 + %s4629_s22]]  }
  0x5d   :  { %5446 = sst [smem:[#allocation41_spill]] %s4835_s21 }
  0x5e   :  { %5447 = sst [smem:[#allocation42_spill]] %s4840_s17 }
  0x5f   :  { %5448 = sst [smem:[#allocation43_spill]] %s4845_s9 }
  0x60 LB: > { %5449 = sst [smem:[#allocation44_spill]] %s4572_s28  ;;  %s101_s0 = sadd.s32 1, %s4580_s2  ;;  %s4588_s10 = sphi %s4855_s10, %s92_s10   ;;  %s4584_s7 = sphi %s4853_s7, %s5548_s7   ;;  %s4580_s2 = sphi %s4851_s2, %s5547_s2   ;;  %s4576_s1 = sphi %s4849_s1, %s5546_s1   ;;  %s4572_s28 = sphi %s4847_s28, %s5545_s28  }
  0x61   : > { %5450 = sst [smem:[#allocation45_spill]] %s4580_s2  ;;  %s104_s11 = sadd.s32 1, %s4584_s7 }
  0x62   : > { %5451 = sst [smem:[#allocation46_spill]] %s4584_s7  ;;  %p102_p0 = scmp.ge.s32.totalorder %s101_s0, 2 }
  0x63   : > { %5452 = sst [smem:[#allocation47_spill]] %s4588_s10  ;;  %p3946_p1 = scmp.ge.s32.totalorder %s4588_s10, 1 }
  0x64   : > { %p1360_p2 = scmp.lt.s32.totalorder %s4588_s10, 5  ;;  %s5550_s0 = smov (%p102_p0, %s101_s0), 0 }
  0x65   : > { %5453 = sst [smem:[#allocation48_spill]] %s5550_s0  ;;  %s5552_s11 = smov (!%p102_p0, %s104_s11), %s4584_s7 }
  0x66   : > { %p1361_p3 = pnand %p3946_p1, %p1360_p2  ;;  %p106_p4 = scmp.ge.s32.totalorder %s5552_s11, 2 }
  0x68   : > { %s5554_s11 = smov (%p106_p4, %s5552_s11), 0  ;;  %1364 = sbr.rel (%p1361_p3) target bundleno = 4333 (0x10ed), region = 176 }
  0x69   : > { %5454 = sst [smem:[#allocation49_spill]] %s5554_s11 }
  0x6d   : > { %p1574_p5 = scmp.lt.s32.totalorder %s4576_s1, 1  ;;  %s5455_s5 = sld [smem:[#allocation3_spill]] }
  0x6e   : > { %s5456_s13 = sld [smem:[#allocation5_spill]]  ;;  %p1584_p6 = scmp.lt.s32.totalorder %s4572_s28, 1 }
  0x6f   : > { %s5458_s25 = sld [smem:[#allocation8_spill]]  ;;  %s5556_s1 = smov (!%p1574_p5, %s4576_s1), 1 }
  0x70   : > { %s5459_s3 = sld [smem:[#allocation10_spill]]  ;;  %s4255_s16 = sshll.u32 %s5556_s1, 4 }
  0x71   : > { %s5461_s14 = sld [smem:[#allocation12_spill]]  ;;  %s4256_s18 = sshll.u32 %s5556_s1, 6 }
  0x72   : > { %s5463_s24 = sld [smem:[#allocation14_spill]] }
  0x73   : > { %5466 = sst [smem:[#allocation50_spill]] %s5556_s1  ;;  %s4888_s23 = scalar_lea.vmem %s5455_s5, %s4255_s16 }
  0x74   : > { %s4883_s15 = scalar_select %p1584_p6, %s4572_s28, 1 }
  0x75   : > { %s5468_s20 = sld [smem:[#allocation18_spill]]  ;;  %s4891_s11 = scalar_lea.vmem %s5456_s13, %s4256_s18 }
  0x76   : > { %s5470_s22 = sld [smem:[#allocation20_spill]]  ;;  %s4257_s7 = sshll.u32 %s4883_s15, 5 }
  0x77   : > { %5471 = sst [smem:[#allocation51_spill]] %s4888_s23  ;;  %s4897_s4 = scalar_lea.vmem %s5458_s25, %s4257_s7 }
  0x78   : > { %5473 = sst [smem:[#allocation52_spill]] %s4891_s11  ;;  %s4900_s9 = scalar_lea.vmem %s5459_s3, %s4257_s7 }
  0x79   : > { %s5474_s0 = sld [smem:[#allocation22_spill]]  ;;  %s4905_s23 = scalar_lea.vmem %s5461_s14, %s4257_s7 }
  0x7a   : > { %s5476_s21 = sld [smem:[#allocation24_spill]]  ;;  %s4910_s1 = scalar_lea.vmem %s5463_s24, %s4257_s7 }
  0x7b   : > { %5477 = sst [smem:[#allocation53_spill]] %s4897_s4  ;;  %s4919_s16 = scalar_lea.vmem %s5468_s20, %s4257_s7 }
  0x7c   : > { %s5478_s28 = sld [smem:[#allocation25_spill]]  ;;  %s4924_s13 = scalar_lea.vmem %s5470_s22, %s4257_s7 }
  0x7d   : > { %5479 = sst [smem:[#allocation54_spill]] %s4900_s9 }
  0x7e   : > { %s5480_s17 = sld [smem:[#allocation26_spill]] }
  0x7f   : > { %s5481_s5 = sld [smem:[#allocation27_spill]] }
  0x80   : > { %5482 = sst [smem:[#allocation55_spill]] %s4905_s23  ;;  %s4934_s29 = scalar_lea.vmem %s5476_s21, %s4257_s7 }
  0x81   : > { %s5483_s18 = sld [smem:[#allocation28_spill]]  ;;  %s4266_s23 = sshll.u32 %s4883_s15, 6 }
  0x82   : > { %s5484_s11 = sld [smem:[#allocation29_spill]]  ;;  %s1653_s9 = scalar_lea.vmem %s5478_s28, %s4883_s15 }
  0x83   : > { %5485 = sst [smem:[#allocation56_spill]] %s4910_s1  ;;  %s4929_s1 = scalar_lea.vmem %s5474_s0, %s4257_s7 }
  0x84   : > { %s5486_s25 = sld [smem:[#allocation30_spill]]  ;;  %s1656_s12 = scalar_lea.vmem %s5480_s17, %s4883_s15 }
  0x85   : > { %s5487_s3 = sld [smem:[#allocation31_spill]]  ;;  %s1659_s19 = scalar_lea.vmem %s5481_s5, %s4883_s15 }
  0x86   : > { %s5488_s4 = sld [smem:[#allocation32_spill]]  ;;  %s3972_s0 = sshll.u32 %s4883_s15, 2 }
  0x87   : > { %5489 = sst [smem:[#allocation57_spill]] %s4919_s16  ;;  %s4943_s20 = scalar_lea.vmem %s5483_s18, %s4257_s7 }
  0x88   : > { %s5490_s14 = sld [smem:[#allocation33_spill]]  ;;  %s1667_s16 = scalar_lea.vmem %s5484_s11, %s4883_s15 }
  0x89   : > { %s5491_s8 = sld [smem:[#allocation50_spill]] }
  0x8a   : > { %5492 = sst [smem:[#allocation50_spill]] %s4924_s13  ;;  %s4949_s27 = scalar_lea.vmem %s5486_s25, %s4266_s23 }
  0x8b   : > { %5493 = sst [smem:[#allocation58_spill]] %s4929_s1  ;;  %s1675_s22 = scalar_lea.vmem %s5487_s3, %s4883_s15 }
  0x8c   : > { %s5494_s30 = sld [smem:[#allocation42_spill]]  ;;  %s1678_s13 = scalar_lea.vmem %s5488_s4, %s4883_s15 }
  0x8d   : > { %s5495_s6 = sld [smem:[#allocation43_spill]] }
  0x8e   : > { %s1681_s24 = scalar_lea.vmem %s5490_s14, %s4883_s15  ;;  %s5496_s28 = sld [smem:[#allocation44_spill]] }
  0x8f   : > { %s3971_s26 = sshll.u32 %s5491_s8, 1 }
  0x90   : > { %s1688_s1 = sadd.s32 %s3972_s0, %s3971_s26 }
  0x91   : > { %s3973_s2 = sshll.u32 %s1688_s1, 3 }
  0x92   : > { %s4960_s10 = scalar_lea.vmem %s5494_s30, %s3973_s2 }
  0x93   : > { %s4963_s21 = scalar_lea.vmem %s5495_s6, %s3973_s2 }
  0x94   : > { %p3977_p7 = scmp.ne.s32.totalorder %s5496_s28, 0 }
  0x95   : > { %s5497_s5 = sld [smem:[#allocation51_spill]] (!%p3977_p7) }
  0x96   : > { %1704 = sbr.rel (%p3977_p7) target bundleno = 158 (0x9e), region = 180 }
  0x9b   : > { %v1705_v0 = vld [vmem:[%s5497_s5] sm:$0xff]  ;;  %vm1707_vm0 = vcmask 523264   ;;  %v1706_v1 = vld [vmem:[%s5497_s5 + $0x8] sm:$0xff] }
  0x9c   : > { %1708 = vst.msk [vmem:[#allocation2] sm:$0xff] %vm1707_vm0, %v1705_v0 }
  0x9d   : > { %1709 = vst.msk [vmem:[#allocation2 + $0x8] sm:$0xff] %vm1707_vm0, %v1706_v1 }
  0x9e PF: > { %s5498_s17 = sld [smem:[#allocation53_spill]]  ;;  %vm1796_vm1 = vcmask 523264   ;;  %vm1903_vm2 = vcmask 130048   ;;  %s4630_s1 = smov 80   ;;  %vm2202_vm3 = vcmask 261120   ;;  %vm2205_vm4 = vcmask 392192  }
  0x9f   : > { %s5499_s25 = sld [smem:[#allocation54_spill]]  ;;  %s4631_s7 = smov 112  }
  0xa0   : > { %s5500_s3 = sld [smem:[#allocation4_spill]]  ;;  %s4632_s11 = smov 96  }
  0xa1   : > { %s5501_s8 = sld [smem:[#allocation9_spill]]  ;;  %s4633_s0 = smov 16  }
  0xa2   : > { %s5502_s14 = sld [smem:[#allocation11_spill]]  ;;  %s4634_s2 = smov 32  }
  0xa3   : > { %v4974_v8 = vld [vmem:[#allocation2] sm:$0xff]  ;;  %s5505_s4 = sld [smem:[#allocation55_spill]]  ;;  %s4635_s28 = smov 48  }
  0xa4   : > { %v4270_v2 = vld [vmem:[%s5498_s17 + $0x18] sm:$0xff]  ;;  %v4269_v4 = vld [vmem:[%s5498_s17 + $0x10] sm:$0xff]  ;;  %v4268_v6 = vld [vmem:[%s5498_s17 + $0x8] sm:$0xff]  ;;  %s5506_s23 = sld [smem:[#allocation13_spill]] }
  0xa5   : > { %v4274_v3 = vld [vmem:[%s5499_s25 + $0x18] sm:$0xff]  ;;  %1804 = vmatpush.bf16.msra.mxu0 %v4270_v2  ;;  %v4273_v5 = vld [vmem:[%s5499_s25 + $0x10] sm:$0xff]  ;;  %v4272_v7 = vld [vmem:[%s5499_s25 + $0x8] sm:$0xff]  ;;  %s5508_s26 = sld [smem:[#allocation56_spill]] }
  0xa6   : > { %1845 = vmatpush.bf16.msra.mxu1 %v4274_v3  ;;  %v4976_v9 = vld [vmem:[#allocation2 + $0x8] sm:$0xff]  ;;  %v4979_v10 = vld [vmem:[%s5500_s3] sm:$0xff]  ;;  %s5509_s5 = sld [smem:[#allocation50_spill]] }
  0xa7   : > { %v4982_v11 = vld [vmem:[%s5500_s3 + $0x8] sm:$0xff]  ;;  %v4267_v12 = vld [vmem:[%s5498_s17] sm:$0xff]  ;;  %v1730_v14 = vadd.f32 %v4979_v10, %v4974_v8  ;;  %s5503_s30 = scalar_lea.vmem %s5501_s8, %s4883_s15  ;;  %v1855_v34 = vpack.c.bf16 %v4976_v9, %v4974_v8  ;;  %s5510_s17 = sld [smem:[#allocation15_spill]] }
  0xa8   : > { %v4271_v13 = vld [vmem:[%s5499_s25] sm:$0xff]  ;;  %v1731_v15 = vadd.f32 %v4982_v11, %v4976_v9  ;;  %s5504_s6 = scalar_lea.vmem %s5502_s14, %s4883_s15  ;;  %s5512_s8 = sld [smem:[#allocation52_spill]] }
  0xa9   : > { %1805 = vmatpush.bf16.msra.mxu0 %v4269_v4  ;;  %v4444_v19 = vld [vmem:[%s5503_s30] ss:$0 sm:$0xff]  ;;  %v4278_v30 = vld [vmem:[%s5505_s4 + $0x18] sm:$0xff]  ;;  %v4277_v31 = vld [vmem:[%s5505_s4 + $0x10] sm:$0xff]  ;;  %s5513_s14 = sld [smem:[#allocation6_spill]] }
  0xaa   : > { %1846 = vmatpush.bf16.msra.mxu1 %v4273_v5  ;;  %v1768_v16 = vpack.c.bf16 %v1731_v15, %v1730_v14  ;;  %v4445_v20 = vld [vmem:[%s5504_s6] ss:$0 sm:$0xff]  ;;  %1890 = vmatpush.bf16.msra.mxu2 %v4278_v30  ;;  %v4276_v32 = vld [vmem:[%s5505_s4 + $0x8] sm:$0xff]  ;;  %s5507_s18 = scalar_lea.vmem %s5506_s23, %s4883_s15  ;;  %s5514_s30 = sld [smem:[#allocation58_spill]] }
  0xab   : > { %v4275_v33 = vld [vmem:[%s5505_s4] sm:$0xff]  ;;  %s5515_s6 = sld [smem:[#allocation57_spill]] }
  0xac   : > { %v4446_v51 = vld [vmem:[%s5507_s18] ss:$0 sm:$0xff]  ;;  %s5516_s4 = sld [smem:[#allocation21_spill]] }
  0xad   : > { %1806 = vmatpush.bf16.msra.mxu0 %v4268_v6  ;;  %s5511_s25 = scalar_lea.vmem %s5510_s17, %s4883_s15  ;;  %s5518_s18 = sld [smem:[#allocation16_spill]] }
  0xae   : > { %1847 = vmatpush.bf16.msra.mxu1 %v4272_v7  ;;  %1891 = vmatpush.bf16.msra.mxu2 %v4277_v31 }
  0xb1   : > { %1807 = vmatpush.bf16.msra.mxu0 %v4267_v12 }
  0xb2   : > { %1848 = vmatpush.bf16.msra.mxu1 %v4271_v13  ;;  %1892 = vmatpush.bf16.msra.mxu2 %v4276_v32  ;;  %s5517_s23 = scalar_lea.vmem %s5516_s4, %s4883_s15 }
  0xb4   : > { %3994 = vmatmul.msk.bf16.vlgmr.msra.gmra.mxu0 %vm1796_vm1, %v1768_v16 }
  0xb5   : > { %4011 = vmatmul.msk.bf16.vlgmr.msra.gmra.mxu1 %vm1796_vm1, %v1768_v16 }
  0xb6   : > { %1893 = vmatpush.bf16.msra.mxu2 %v4275_v33 }
  0xb9   : > { %4028 = vmatmul.msk.bf16.vlgmr.msra.gmra.mxu2 %vm1796_vm1, %v1855_v34 }
 0x131   : > { %v1809_v17 = vpop.f32.mrf.mxu0 }
 0x132   : > { %v1850_v18 = vpop.f32.mrf.mxu1  ;;  %v1810_v21 = vadd.f32 %v4444_v19, %v1809_v17 }
 0x133   : > { %v1851_v24 = vadd.f32 %v4445_v20, %v1850_v18 }
 0x139   : > { %v1811_v22 = vpop.f32.mrf.mxu0 }
 0x13a   : > { %v1852_v23 = vpop.f32.mrf.mxu1  ;;  %v1812_v25 = vadd.f32 %v4444_v19, %v1811_v22 }
 0x13b   : > { %v1853_v26 = vadd.f32 %v4445_v20, %v1852_v23 }
 0x13c   : > { %v1900_v27 = vpack.c.bf16 %v1812_v25, %v1810_v21  ;;  %v1895_v50 = vpop.f32.mrf.mxu2 }
 0x13d   : > { %v1901_v28 = vpack.c.bf16 %v1853_v26, %v1851_v24  ;;  %v1896_v52 = vadd.f32 %v4446_v51, %v1895_v50 }
 0x13e   : > { %1967 = vrot.lane.b32.xlu1 %v1900_v27, %s4631_s7 }
 0x13f   : > { %2109 = vrot.lane.b32.xlu2 %v1901_v28, %s4630_s1  ;;  %1970 = vrot.lane.b32.xlu0 %v1901_v28, %s4631_s7  ;;  %v1908_v29 = vsel %vm1903_vm2, %v1901_v28, 0 }
 0x140   : > { %1917 = vmatpush.bf16.xpose.msra.mxu3 %v1908_v29 }
 0x144   : > { %v1897_v53 = vpop.f32.mrf.mxu2 }
 0x145   : > { %v1898_v54 = vadd.f32 %v4446_v51, %v1897_v53 }
 0x146   : > { %2038 = vrot.lane.b32.xlu1 %v1900_v27, %s4632_s11 }
 0x147   : > { %2040 = vrot.lane.b32.xlu0 %v1901_v28, %s4632_s11  ;;  %2107 = vrot.lane.b32.xlu2 %v1900_v27, %s4630_s1  ;;  %v5024_v55 = vpack.c.bf16 %v1898_v54, %v1896_v52 }
 0x148   : > { %4029 = vmatmul.msk.bf16.vlgmr.msra.gmra.mxu3 %vm1903_vm2, %v1900_v27 }
 0x149   : > { %1959 = vmatpush.bf16.msrb.mxu3 %v5024_v55 }
 0x199   : > { %v2110_v35 = vpop.permute.xlu2 %2109 }
 0x19a   : > { %v2115_v38 = vsel %vm1903_vm2, %v2110_v35, 0 }
 0x1a1   : > { %v2108_v43 = vpop.permute.xlu2 %2107 }
 0x1b0   : > { %v1968_v39 = vpop.permute.xlu1 %1967 }
 0x1b1   : > { %v1971_v36 = vpop.permute.xlu0 %1970 }
 0x1b2   : > { %v1976_v37 = vsel %vm1903_vm2, %v1971_v36, 0 }
 0x1b3   : > { %1985 = vmatpush.bf16.xpose.msrb.mxu0 %v1976_v37 }
 0x1b8   : > { %v2039_v42 = vpop.permute.xlu1 %2038 }
 0x1b9   : > { %v2041_v40 = vpop.permute.xlu0 %2040 }
 0x1ba   : > { %4031 = vmatmul.msk.bf16.vlgmr.msrb.gmra.mxu0 %vm1903_vm2, %v1968_v39  ;;  %v2046_v41 = vsel %vm1903_vm2, %v2041_v40, 0 }
 0x1bb   : > { %2124 = vmatpush.bf16.xpose.msra.mxu0 %v2115_v38  ;;  %2055 = vmatpush.bf16.xpose.msrb.mxu2 %v2046_v41 }
 0x1c2   : > { %4033 = vmatmul.msk.bf16.vlgmr.msrb.gmra.mxu2 %vm1903_vm2, %v2039_v42 }
 0x1ca   : > { %4035 = vmatmul.msk.bf16.vlgmr.msra.gmra.mxu0 %vm1903_vm2, %v2108_v43 }
 0x1cb   : > { %v1919_v44 = vpop.f32.mrf.mxu3 }
 0x1cc   : > { %v1924_v45 = vmul.f32 0.25, %v1919_v44 }
 0x1ce   : > { %v1926_v46 = vsel %vm1903_vm2, %v1924_v45, -inf }
 0x1cf   : > { %1927 = vmax.xlane.f32.xlu0 %v1926_v46 }
 0x1d3   : > { %v1921_v47 = vpop.f32.mrf.mxu3 }
 0x1d4   : > { %v1925_v48 = vmul.f32 0.25, %v1921_v47 }
 0x1d6   : > { %v1929_v49 = vsel %vm1903_vm2, %v1925_v48, -inf }
 0x1d7   : > { %1930 = vmax.xlane.f32.xlu1 %v1929_v49 }
 0x237   : > { %v1987_v56 = vpop.f32.mrf.mxu0 }
 0x238   : > { %v1992_v57 = vmul.f32 0.25, %v1987_v56 }
 0x23a   : > { %v1994_v58 = vsel %vm1903_vm2, %v1992_v57, -inf }
 0x23b   : > { %1995 = vmax.xlane.f32.xlu2 %v1994_v58 }
 0x23f   : > { %v1989_v59 = vpop.f32.mrf.mxu0 }
 0x240   : > { %v1993_v60 = vmul.f32 0.25, %v1989_v59 }
 0x242   : > { %v1997_v61 = vsel %vm1903_vm2, %v1993_v60, -inf  ;;  %v1928_v62 = vpop.xlane.xlu0 %1927 }
 0x243   : > { %1998 = vmax.xlane.f32.xlu2 %v1997_v61  ;;  %v1932_v0 = vsub.f32 %v1924_v45, %v1928_v62 }
 0x245   : > { %v2057_v63 = vpop.f32.mrf.mxu2  ;;  %v1934_v5 = vmul.f32 1.442695, %v1932_v0 }
 0x246   : > { %v2062_v1 = vmul.f32 0.25, %v2057_v63 }
 0x247   : > { %v2126_v2 = vpop.f32.mrf.mxu0  ;;  %4464 = vpow2.f32 %v1934_v5 }
 0x248   : > { %v2131_v3 = vmul.f32 0.25, %v2126_v2  ;;  %v2064_v4 = vsel %vm1903_vm2, %v2062_v1, -inf }
 0x249   : > { %2065 = vmax.xlane.f32.xlu0 %v2064_v4 }
 0x24a   : > { %v1931_v6 = vpop.xlane.xlu1 %1930  ;;  %v2133_v7 = vsel %vm1903_vm2, %v2131_v3, -inf }
 0x24b   : > { %v1933_v12 = vsub.f32 %v1925_v48, %v1931_v6  ;;  %2134 = vmax.xlane.f32.xlu2 %v2133_v7 }
 0x24d   : > { %v1936_v13 = vmul.f32 1.442695, %v1933_v12  ;;  %v2059_v14 = vpop.f32.mrf.mxu2  ;;  %v4465_v20 = vpop.eup %4464 }
 0x24e   : > { %v2063_v15 = vmul.f32 0.25, %v2059_v14  ;;  %v1938_v23 = vsel %vm1903_vm2, %v4465_v20, 0.0 }
 0x24f   : > { %4466 = vpow2.f32 %v1936_v13  ;;  %v2128_v16 = vpop.f32.mrf.mxu0 }
 0x250   : > { %v2132_v17 = vmul.f32 0.25, %v2128_v16  ;;  %v2067_v18 = vsel %vm1903_vm2, %v2063_v15, -inf }
 0x251   : > { %2068 = vmax.xlane.f32.xlu1 %v2067_v18 }
 0x252   : > { %v2136_v19 = vsel %vm1903_vm2, %v2132_v17, -inf }
 0x253   : > { %2137 = vmax.xlane.f32.xlu0 %v2136_v19 }
 0x255   : > { %v4467_v21 = vpop.eup %4466 }
 0x256   : > { %v1941_v22 = vsel %vm1903_vm2, %v4467_v21, 0.0 }
 0x257   : > { %1942 = vadd.xlane.f32.xlu2 %v1941_v22 }
 0x259   : > { %1939 = vadd.xlane.f32.xlu1 %v1938_v23 }
 0x26f   : > { %2018 = vrot.lane.b32.xlu2 %v5024_v55, %s4631_s7 }
 0x2ae   : > { %v1996_v24 = vpop.xlane.xlu2 %1995 }
 0x2af   : > { %v2000_v25 = vsub.f32 %v1992_v57, %v1996_v24 }
 0x2b1   : > { %v2002_v26 = vmul.f32 1.442695, %v2000_v25 }
 0x2b3   : > { %4468 = vpow2.f32 %v2002_v26 }
 0x2b6   : > { %v1999_v27 = vpop.xlane.xlu2 %1998 }
 0x2b7   : > { %v2001_v28 = vsub.f32 %v1993_v60, %v1999_v27 }
 0x2b9   : > { %v4469_v29 = vpop.eup %4468  ;;  %v2004_v30 = vmul.f32 1.442695, %v2001_v28 }
 0x2ba   : > { %v2006_v31 = vsel %vm1903_vm2, %v4469_v29, 0.0 }
 0x2bb   : > { %4470 = vpow2.f32 %v2004_v30  ;;  %2007 = vadd.xlane.f32.xlu0 %v2006_v31 }
 0x2bc   : > { %v2066_v32 = vpop.xlane.xlu0 %2065 }
 0x2bd   : > { %v2070_v33 = vsub.f32 %v2062_v1, %v2066_v32 }
 0x2be   : > { %v2135_v34 = vpop.xlane.xlu2 %2134 }
 0x2bf   : > { %v2072_v35 = vmul.f32 1.442695, %v2070_v33  ;;  %v2139_v36 = vsub.f32 %v2131_v3, %v2135_v34 }
 0x2c1   : > { %v4471_v37 = vpop.eup %4470  ;;  %4472 = vpow2.f32 %v2072_v35  ;;  %v2141_v39 = vmul.f32 1.442695, %v2139_v36  ;;  %v4282_v36 = vld [vmem:[%s5508_s26 + $0x18] sm:$0xff] }
 0x2c2   : > { %v2009_v38 = vsel %vm1903_vm2, %v4471_v37, 0.0  ;;  %2243 = vmatpush.bf16.msra.mxu2 %v4282_v36 }
 0x2c3   : > { %2010 = vadd.xlane.f32.xlu1 %v2009_v38  ;;  %4474 = vpow2.f32 %v2141_v39  ;;  %v4280_v38 = vld [vmem:[%s5508_s26 + $0x8] sm:$0xff]  ;;  %v4279_v39 = vld [vmem:[%s5508_s26] sm:$0xff] }
 0x2c4   : > { %v2069_v40 = vpop.xlane.xlu1 %2068 }
 0x2c5   : > { %v2071_v41 = vsub.f32 %v2063_v15, %v2069_v40 }
 0x2c6   : > { %v2138_v42 = vpop.xlane.xlu0 %2137 }
 0x2c7   : > { %v4473_v43 = vpop.eup %4472  ;;  %v2074_v44 = vmul.f32 1.442695, %v2071_v41  ;;  %v2140_v45 = vsub.f32 %v2132_v17, %v2138_v42 }
 0x2c8   : > { %v2076_v46 = vsel %vm1903_vm2, %v4473_v43, 0.0 }
 0x2c9   : > { %4476 = vpow2.f32 %v2074_v44  ;;  %2077 = vadd.xlane.f32.xlu0 %v2076_v46  ;;  %v2143_v48 = vmul.f32 1.442695, %v2140_v45  ;;  %v4475_v50 = vpop.eup %4474 }
 0x2ca   : > { %v1943_v47 = vpop.xlane.xlu2 %1942  ;;  %v2145_v52 = vsel %vm1903_vm2, %v4475_v50, 0.0 }
 0x2cb   : > { %4478 = vrcp.f32 %v1943_v47 }
 0x2cc   : > { %v1940_v49 = vpop.xlane.xlu1 %1939 }
 0x2cd   : > { %4480 = vrcp.f32 %v1940_v49 }
 0x2ce   : > { %4482 = vpow2.f32 %v2143_v48 }
 0x2cf   : > { %v4477_v51 = vpop.eup %4476 }
 0x2d0   : > { %v2079_v53 = vsel %vm1903_vm2, %v4477_v51, 0.0 }
 0x2d1   : > { %2146 = vadd.xlane.f32.xlu0 %v2145_v52  ;;  %2080 = vadd.xlane.f32.xlu1 %v2079_v53  ;;  %v4479_v54 = vpop.eup %4478 }
 0x2d2   : > { %v2019_v56 = vpop.permute.xlu2 %2018  ;;  %v1947_v58 = vmul.f32 %v4479_v54, %v4467_v21 }
 0x2d3   : > { %v4481_v57 = vpop.eup %4480  ;;  %2031 = vmatpush.bf16.msrb.mxu1 %v2019_v56 }
 0x2d4   : > { %v1946_v59 = vmul.f32 %v4481_v57, %v4465_v20  ;;  %v4483_v60 = vpop.eup %4482  ;;  %v4290_v57 = vld [vmem:[%s5509_s5 + $0x18] sm:$0xff] }
 0x2d5   : > { %v2148_v62 = vsel %vm1903_vm2, %v4483_v60, 0.0  ;;  %2456 = vmatpush.bf16.msrb.mxu0 %v4290_v57 }
 0x2d6   : > { %v1948_v61 = vpack.c.bf16 %v1947_v58, %v1946_v59  ;;  %v4289_v58 = vld [vmem:[%s5509_s5 + $0x10] sm:$0xff]  ;;  %v4447_v59 = vld [vmem:[%s5511_s25] ss:$0 sm:$0xff]  ;;  %s5522_s25 = sld [smem:[#allocation23_spill]] }
 0x2d8   : > { %4030 = vmatmul.msk.bf16.vlgmr.msrb.gmra.mxu3 %vm1903_vm2, %v1948_v61 }
 0x2d9   : > { %2149 = vadd.xlane.f32.xlu1 %v2148_v62  ;;  %2457 = vmatpush.bf16.msrb.mxu0 %v4289_v58 }
 0x2e5   : > { %2087 = vrot.lane.b32.xlu0 %v5024_v55, %s4632_s11 }
 0x2f2   : > { %2156 = vrot.lane.b32.xlu1 %v5024_v55, %s4630_s1 }
 0x32e   : > { %v2008_v63 = vpop.xlane.xlu0 %2007 }
 0x32f   : > { %4484 = vrcp.f32 %v2008_v63 }
 0x335   : > { %v4485_v1 = vpop.eup %4484 }
 0x336   : > { %v2011_v0 = vpop.xlane.xlu1 %2010  ;;  %v2014_v3 = vmul.f32 %v4485_v1, %v4469_v29 }
 0x337   : > { %4486 = vrcp.f32 %v2011_v0 }
 0x33c   : > { %v2078_v6 = vpop.xlane.xlu0 %2077 }
 0x33d   : > { %v4487_v2 = vpop.eup %4486 }
 0x33e   : > { %v2015_v4 = vmul.f32 %v4487_v2, %v4471_v37  ;;  %v4281_v37 = vld [vmem:[%s5508_s26 + $0x10] sm:$0xff]  ;;  %s5519_s26 = sld [smem:[#allocation17_spill]] }
 0x33f   : > { %2244 = vmatpush.bf16.msra.mxu2 %v4281_v37  ;;  %v4292_v37 = vld [vmem:[%s5514_s30 + $0x8] sm:$0xff] }
 0x340   : > { %v2016_v5 = vpack.c.bf16 %v2015_v4, %v2014_v3  ;;  %v4288_v4 = vld [vmem:[%s5509_s5 + $0x8] sm:$0xff] }
 0x341   : > { %2458 = vmatpush.bf16.msrb.mxu0 %v4288_v4 }
 0x342   : > { %4032 = vmatmul.msk.bf16.vlgmr.msrb.gmra.mxu1 %vm1903_vm2, %v2016_v5  ;;  %v4636_v5 = vmov 64.0  }
 0x343   : > { %2245 = vmatpush.bf16.msra.mxu2 %v4280_v38 }
 0x344   : > { %v2081_v7 = vpop.xlane.xlu1 %2080  ;;  %v2147_v12 = vpop.xlane.xlu0 %2146  ;;  %s5521_s17 = scalar_lea.vmem %s5519_s26, %s4883_s15 }
 0x345   : > { %4488 = vrcp.f32 %v2081_v7  ;;  %v1715_v7 = vld [vmem:[%s5512_s8 + $0x8] sm:$0xff] }
 0x346   : > { %4490 = vrcp.f32 %v2078_v6  ;;  %v4287_v6 = vld [vmem:[%s5509_s5] sm:$0xff]  ;;  %s5520_s5 = scalar_lea.vmem %s5518_s18, %s4883_s15 }
 0x347   : > { %2246 = vmatpush.bf16.msra.mxu2 %v4279_v39  ;;  %2459 = vmatpush.bf16.msrb.mxu0 %v4287_v6  ;;  %v4283_v6 = vld [vmem:[%s5515_s6] sm:$0xff] }
 0x34b   : > { %v4489_v13 = vpop.eup %4488 }
 0x34c   : > { %v4491_v14 = vpop.eup %4490  ;;  %v2085_v15 = vmul.f32 %v4489_v13, %v4477_v51  ;;  %v2150_v55 = vpop.xlane.xlu1 %2149  ;;  %v1723_v13 = vld [vmem:[%s5513_s14 + $0x8] sm:$0xff] }
 0x34d   : > { %v2084_v16 = vmul.f32 %v4491_v14, %v4473_v43  ;;  %4492 = vrcp.f32 %v2150_v55 }
 0x34e   : > { %4494 = vrcp.f32 %v2147_v12  ;;  %v1722_v12 = vld [vmem:[%s5513_s14] sm:$0xff] }
 0x34f   : > { %v2086_v18 = vpack.c.bf16 %v2085_v15, %v2084_v16  ;;  %4496 = vrcp.f32 %v4636_v5  ;;  %v2321_v15 = vadd.f32 %v1723_v13, %v1715_v7  ;;  %v4450_v5 = vld [vmem:[%s5517_s23] ss:$0 sm:$0xff] }
 0x353   : > { %v4493_v19 = vpop.eup %4492 }
 0x354   : > { %v4495_v20 = vpop.eup %4494  ;;  %v2154_v21 = vmul.f32 %v4493_v19, %v4483_v60  ;;  %v1717_v19 = vld [vmem:[%s5512_s8 + $0x18] sm:$0xff] }
 0x355   : > { %v2153_v22 = vmul.f32 %v4495_v20, %v4475_v50  ;;  %v1724_v20 = vld [vmem:[%s5513_s14 + $0x10] sm:$0xff] }
 0x357   : > { %v2088_v17 = vpop.permute.xlu0 %2087  ;;  %v2155_v24 = vpack.c.bf16 %v2154_v21, %v2153_v22  ;;  %v1725_v21 = vld [vmem:[%s5513_s14 + $0x18] sm:$0xff] }
 0x358   : > { %2100 = vmatpush.bf16.msra.mxu3 %v2088_v17  ;;  %v1716_v17 = vld [vmem:[%s5512_s8 + $0x10] sm:$0xff] }
 0x359   : > { %v2322_v22 = vadd.f32 %v1724_v20, %v1716_v17  ;;  %v2482_v58 = vpack.c.bf16 %v1717_v19, %v1716_v17 }
 0x35b   : > { %4034 = vmatmul.msk.bf16.vlgmr.msra.gmra.mxu3 %vm1903_vm2, %v2086_v18  ;;  %v1961_v28 = vpop.f32.mrf.mxu3 }
 0x363   : > { %v1963_v29 = vpop.f32.mrf.mxu3 }
 0x364   : > { %v2157_v23 = vpop.permute.xlu1 %2156 }
 0x365   : > { %2169 = vmatpush.bf16.msra.mxu1 %v2157_v23  ;;  %v2323_v23 = vadd.f32 %v1725_v21, %v1717_v19 }
 0x368   : > { %4036 = vmatmul.msk.bf16.vlgmr.msra.gmra.mxu1 %vm1903_vm2, %v2155_v24 }
 0x3bf   : > { %v2033_v25 = vpop.f32.mrf.mxu1 }
 0x3c7   : > { %v2035_v26 = vpop.f32.mrf.mxu1 }
 0x3c8   : > { %v4414_v27 = vpack.i.bf16 %v2035_v26, %v2033_v25  ;;  %v2410_v25 = vpack.c.bf16 %v2323_v23, %v2322_v22 }
 0x3ca   : > { %4415 = vrot.lane.b32.xlu2 %v4414_v27, %s4633_s0  ;;  %v4294_v27 = vld [vmem:[%s5514_s30 + $0x18] sm:$0xff] }
 0x3cb   : > { %2528 = vmatpush.bf16.msrb.mxu1 %v4294_v27 }
 0x3de   : > { %v2102_v30 = vpop.f32.mrf.mxu3 }
 0x3e5   : > { %v2171_v31 = vpop.f32.mrf.mxu1 }
 0x3e6   : > { %v2104_v32 = vpop.f32.mrf.mxu3 }
 0x3e7   : > { %v4419_v33 = vpack.i.bf16 %v2104_v32, %v2102_v30  ;;  %v1718_v32 = vld [vmem:[%s5512_s8 + $0x20] sm:$0xff] }
 0x3e9   : > { %4420 = vrot.lane.b32.xlu2 %v4419_v33, %s4634_s2  ;;  %v1719_v33 = vld [vmem:[%s5512_s8 + $0x28] sm:$0xff] }
 0x3ed   : > { %v2173_v34 = vpop.f32.mrf.mxu1 }
 0x3ee   : > { %v4424_v35 = vpack.i.bf16 %v2173_v34, %v2171_v31  ;;  %v1726_v34 = vld [vmem:[%s5513_s14 + $0x20] sm:$0xff] }
 0x3ef   : > { %v2324_v39 = vadd.f32 %v1726_v34, %v1718_v32 }
 0x3f0   : > { %4425 = vrot.lane.b32.xlu0 %v4424_v35, %s4635_s28  ;;  %v1727_v35 = vld [vmem:[%s5513_s14 + $0x28] sm:$0xff] }
 0x424   : > { %v4416_v40 = vpop.permute.xlu2 %4415 }
 0x425   : > { %v4418_v42 = vunpack.i.h.bf16 %v4416_v40  ;;  %v4417_v43 = vunpack.i.l.bf16 %v4416_v40  ;;  %v2325_v40 = vadd.f32 %v1727_v35, %v1719_v33  ;;  %v4448_v35 = vld [vmem:[%s5520_s5] ss:$0 sm:$0xff] }
 0x427   : > { %v2201_v47 = vsel %vm1903_vm2, %v1963_v29, %v4418_v42  ;;  %v2200_v48 = vsel %vm1903_vm2, %v1961_v28, %v4417_v43  ;;  %v4293_v29 = vld [vmem:[%s5514_s30 + $0x10] sm:$0xff]  ;;  %v4291_v42 = vld [vmem:[%s5514_s30] sm:$0xff]  ;;  %s5524_s30 = sld [smem:[#allocation19_spill]] }
 0x428   : > { %2529 = vmatpush.bf16.msrb.mxu1 %v4293_v29 }
 0x42c   : > { %2530 = vmatpush.bf16.msrb.mxu1 %v4292_v37 }
 0x430   : > { %2531 = vmatpush.bf16.msrb.mxu1 %v4291_v42 }
 0x443   : > { %v4421_v41 = vpop.permute.xlu2 %4420 }
 0x444   : > { %v4423_v44 = vunpack.i.h.bf16 %v4421_v41  ;;  %v4422_v45 = vunpack.i.l.bf16 %v4421_v41 }
 0x446   : > { %v2204_v51 = vsel %vm2202_vm3, %v2201_v47, %v4423_v44  ;;  %v2203_v52 = vsel %vm2202_vm3, %v2200_v48, %v4422_v45  ;;  %v2411_v45 = vpack.c.bf16 %v2325_v40, %v2324_v39 }
 0x462   : > { %v4426_v46 = vpop.permute.xlu0 %4425 }
 0x463   : > { %v4428_v49 = vunpack.i.h.bf16 %v4426_v46  ;;  %v4427_v50 = vunpack.i.l.bf16 %v4426_v46 }
 0x465   : > { %v2207_v53 = vsel %vm2205_vm4, %v2204_v51, %v4428_v49  ;;  %v2206_v54 = vsel %vm2205_vm4, %v2203_v52, %v4427_v50  ;;  %v1720_v50 = vld [vmem:[%s5512_s8 + $0x30] sm:$0xff]  ;;  %v1721_v51 = vld [vmem:[%s5512_s8 + $0x38] sm:$0xff] }
 0x466   : > { %v2208_v56 = vpack.c.bf16 %v2207_v53, %v2206_v54  ;;  %v1728_v52 = vld [vmem:[%s5513_s14 + $0x30] sm:$0xff]  ;;  %v1729_v53 = vld [vmem:[%s5513_s14 + $0x38] sm:$0xff] }
 0x467   : > { %v2326_v54 = vadd.f32 %v1728_v52, %v1720_v50 }
 0x468   : > { %4053 = vmatmul.msk.bf16.vlgmr.msra.gmra.mxu2 %vm1796_vm1, %v2208_v56  ;;  %v2327_v56 = vadd.f32 %v1729_v53, %v1721_v51 }
 0x46a   : > { %v2412_v57 = vpack.c.bf16 %v2327_v56, %v2326_v54 }
 0x4eb   : > { %v2248_v60 = vpop.f32.mrf.mxu2 }
 0x4ec   : > { %v2249_v61 = vadd.f32 %v4447_v59, %v2248_v60  ;;  %v2483_v60 = vpack.c.bf16 %v1719_v33, %v1718_v32 }
 0x4ee   : > { %v2253_v62 = vadd.f32 %v2249_v61, %v4974_v8  ;;  %v1714_v8 = vld [vmem:[%s5512_s8] sm:$0xff]  ;;  %s5523_s8 = scalar_lea.vmem %s5522_s25, %s4883_s15 }
 0x4ef   : > { %v2320_v14 = vadd.f32 %v1722_v12, %v1714_v8  ;;  %v2481_v46 = vpack.c.bf16 %v1715_v7, %v1714_v8  ;;  %v2484_v8 = vpack.c.bf16 %v1721_v51, %v1720_v50 }
 0x4f0   : > { %v2257_v63 = vsel %vm1796_vm1, %v2253_v62, 0.0 }
 0x4f1   : > { %2258 = vadd.xlane.f32.xlu2 %v2257_v63  ;;  %v2409_v55 = vpack.c.bf16 %v2321_v15, %v2320_v14  ;;  %4107 = vmatmul.msk.bf16.vlgmr.msrb.gmra.mxu1 %vm1796_vm1, %v2481_v46  ;;  %v4285_v63 = vld [vmem:[%s5515_s6 + $0x10] sm:$0xff] }
 0x4f3   : > { %v2250_v0 = vpop.f32.mrf.mxu2  ;;  %4087 = vmatmul.msk.bf16.vlgmr.msrb.gmra.mxu0 %vm1796_vm1, %v2409_v55 }
 0x4f4   : > { %v2251_v1 = vadd.f32 %v4447_v59, %v2250_v0 }
 0x4f6   : > { %v2254_v2 = vadd.f32 %v2251_v1, %v4976_v9  ;;  %v4497_v9 = vpop.eup %4496 }
 0x4f7   : > { %v2264_v16 = vmul.f32 64.0, %v4497_v9  ;;  %vm2268_vm5 = vweird.f32 %v4497_v9 }
 0x4f8   : > { %v2260_v3 = vsel %vm1796_vm1, %v2254_v2, 0.0 }
 0x4f9   : > { %2261 = vadd.xlane.f32.xlu1 %v2260_v3  ;;  %v2265_v18 = vsub.f32 1.0, %v2264_v16  ;;  %v4284_v3 = vld [vmem:[%s5515_s6 + $0x8] sm:$0xff] }
 0x4fb   : > { %v2266_v24 = vmul.f32 %v4497_v9, %v2265_v18 }
 0x4fd   : > { %v2267_v26 = vadd.f32 %v4497_v9, %v2266_v24 }
 0x4ff   : > { %v5087_v28 = vsel %vm2268_vm5, %v4497_v9, %v2267_v26 }
 0x501   : > { %4108 = vmatmul.msk.bf16.gmra.mxu1 %vm1796_vm1, %v2482_v58 }
 0x503   : > { %4088 = vmatmul.msk.bf16.gmra.mxu0 %vm1796_vm1, %v2410_v25 }
 0x511   : > { %4109 = vmatmul.msk.bf16.gmra.mxu1 %vm1796_vm1, %v2483_v60 }
 0x513   : > { %4089 = vmatmul.msk.bf16.gmra.mxu0 %vm1796_vm1, %v2411_v45 }
 0x521   : > { %4110 = vmatmul.msk.bf16.gmra.mxu1 %vm1796_vm1, %v2484_v8 }
 0x523   : > { %4090 = vmatmul.msk.bf16.gmra.mxu0 %vm1796_vm1, %v2412_v57 }
 0x564   : > { %v2259_v30 = vpop.xlane.xlu2 %2258 }
 0x565   : > { %v2270_v31 = vmul.f32 %v5087_v28, %v2259_v30 }
 0x567   : > { %v5095_v36 = vsub.f32 %v2253_v62, %v2270_v31  ;;  %v4286_v62 = vld [vmem:[%s5515_s6 + $0x18] sm:$0xff]  ;;  %s5525_s6 = scalar_lea.vmem %s5524_s30, %s4883_s15  ;;  %s5539_s15 = sld [smem:[#allocation40_spill]] }
 0x568   : > { %2399 = vmatpush.bf16.msrb.mxu3 %v4286_v62 }
 0x569   : > { %v2274_v38 = vmul.f32 %v5095_v36, %v5095_v36 }
 0x56b   : > { %v2276_v41 = vsel %vm1796_vm1, %v2274_v38, 0.0 }
 0x56c   : > { %v2262_v43 = vpop.xlane.xlu1 %2261  ;;  %2277 = vadd.xlane.f32.xlu0 %v2276_v41  ;;  %2400 = vmatpush.bf16.msrb.mxu3 %v4285_v63  ;;  %v4449_v41 = vld [vmem:[%s5521_s17] ss:$0 sm:$0xff] }
 0x56d   : > { %v2271_v44 = vmul.f32 %v5087_v28, %v2262_v43 }
 0x56e   : > { %v2533_v58 = vpop.f32.mrf.mxu1 }
 0x56f   : > { %v5103_v47 = vsub.f32 %v2254_v2, %v2271_v44 }
 0x570   : > { %v2461_v59 = vpop.f32.mrf.mxu0  ;;  %2401 = vmatpush.bf16.msrb.mxu3 %v4284_v3 }
 0x571   : > { %v2275_v48 = vmul.f32 %v5103_v47, %v5103_v47  ;;  %v2462_v18 = vadd.f32 %v4450_v5, %v2461_v59 }
 0x573   : > { %v2279_v49 = vsel %vm1796_vm1, %v2275_v48, 0.0 }
 0x574   : > { %2280 = vadd.xlane.f32.xlu2 %v2279_v49  ;;  %2402 = vmatpush.bf16.msrb.mxu3 %v4283_v6 }
 0x576   : > { %v2535_v59 = vpop.f32.mrf.mxu1 }
 0x578   : > { %v2463_v61 = vpop.f32.mrf.mxu0 }
 0x579   : > { %v2464_v19 = vadd.f32 %v4450_v5, %v2463_v61 }
 0x57b   : > { %v5131_v23 = vpack.c.bf16 %v2464_v19, %v2462_v18 }
 0x57e   : > { %v2538_v60 = vpop.f32.mrf.mxu1 }
 0x580   : > { %v2466_v0 = vpop.f32.mrf.mxu0 }
 0x581   : > { %v2467_v7 = vadd.f32 %v4450_v5, %v2466_v0 }
 0x586   : > { %v2540_v61 = vpop.f32.mrf.mxu1 }
 0x588   : > { %v2468_v12 = vpop.f32.mrf.mxu0 }
 0x589   : > { %v2469_v14 = vadd.f32 %v4450_v5, %v2468_v12 }
 0x58b   : > { %v5127_v9 = vpack.c.bf16 %v2469_v14, %v2467_v7 }
 0x58d   : > { %2642 = vrot.lane.b32.xlu0 %v5127_v9, %s4631_s7 }
 0x58e   : > { %v2543_v62 = vpop.f32.mrf.mxu1 }
 0x590   : > { %v2471_v21 = vpop.f32.mrf.mxu0 }
 0x591   : > { %v2472_v31 = vadd.f32 %v4450_v5, %v2471_v21 }
 0x595   : > { %2640 = vrot.lane.b32.xlu0 %v5131_v23, %s4631_s7 }
 0x596   : > { %v2545_v63 = vpop.f32.mrf.mxu1 }
 0x598   : > { %v2473_v32 = vpop.f32.mrf.mxu0 }
 0x599   : > { %v2474_v34 = vadd.f32 %v4450_v5, %v2473_v32 }
 0x59b   : > { %v5139_v39 = vpack.c.bf16 %v2474_v34, %v2472_v31  ;;  %v4452_v34 = vld [vmem:[%s5525_s6] ss:$0 sm:$0xff] }
 0x59d   : > { %2644 = vrot.lane.b32.xlu1 %v5139_v39, %s4631_s7  ;;  %v2572_v57 = vsel %vm1903_vm2, %v5139_v39, 0 }
 0x59e   : > { %v2548_v0 = vpop.f32.mrf.mxu1 }
 0x5a0   : > { %v2476_v45 = vpop.f32.mrf.mxu0 }
 0x5a1   : > { %v2477_v51 = vadd.f32 %v4450_v5, %v2476_v45 }
 0x5a8   : > { %v2478_v53 = vpop.f32.mrf.mxu0 }
 0x5a9   : > { %v2479_v54 = vadd.f32 %v4450_v5, %v2478_v53 }
 0x5ab   : > { %v2557_v56 = vpack.c.bf16 %v2479_v54, %v2477_v51 }
 0x5ad   : > { %2646 = vrot.lane.b32.xlu2 %v2557_v56, %s4631_s7 }
 0x5b5   : > { %2743 = vrot.lane.b32.xlu2 %v2557_v56, %s4632_s11 }
 0x5bd   : > { %2836 = vrot.lane.b32.xlu2 %v2557_v56, %s4630_s1 }
 0x5c5   : > { %2834 = vrot.lane.b32.xlu2 %v5139_v39, %s4630_s1 }
 0x5cd   : > { %2832 = vrot.lane.b32.xlu2 %v5127_v9, %s4630_s1 }
 0x5df   : > { %v2278_v1 = vpop.xlane.xlu0 %2277 }
 0x5e0   : > { %v2282_v2 = vmul.f32 %v2278_v1, %v5087_v28 }
 0x5e2   : > { %v2284_v4 = vadd.f32 1e-05, %v2282_v2  ;;  %v4451_v2 = vld [vmem:[%s5523_s8] ss:$0 sm:$0xff] }
 0x5e3   : > { %v2549_v3 = vadd.f32 %v4451_v2, %v2548_v0  ;;  %v2544_v5 = vadd.f32 %v4451_v2, %v2543_v62  ;;  %v2546_v6 = vadd.f32 %v4451_v2, %v2545_v63  ;;  %v2539_v14 = vadd.f32 %v4451_v2, %v2538_v60 }
 0x5e4   : > { %4498 = vrsqrt.f32 %v2284_v4  ;;  %vm2292_vm7 = vweird.f32 %v2284_v4 }
 0x5e7   : > { %v2281_v13 = vpop.xlane.xlu2 %2280 }
 0x5e8   : > { %v2283_v15 = vmul.f32 %v2281_v13, %v5087_v28 }
 0x5ea   : > { %v4499_v55 = vpop.eup %4498  ;;  %v2285_v16 = vadd.f32 1e-05, %v2283_v15  ;;  %v2541_v15 = vadd.f32 %v4451_v2, %v2540_v61 }
 0x5eb   : > { %v2287_v17 = vmul.f32 %v4499_v55, %v2284_v4  ;;  %vm2293_vm6 = vweird.f32 %v4499_v55  ;;  %v2550_v4 = vpop.f32.mrf.mxu1 }
 0x5ec   : > { %4500 = vrsqrt.f32 %v2285_v16  ;;  %vm2294_vm8 = vmor %vm2292_vm7, %vm2293_vm6  ;;  %vm2302_vm10 = vweird.f32 %v2285_v16  ;;  %v2551_v8 = vadd.f32 %v4451_v2, %v2550_v4  ;;  %v5179_v18 = vpack.c.bf16 %v2541_v15, %v2539_v14 }
 0x5ed   : > { %v2288_v20 = vmul.f32 %v4499_v55, %v2287_v17  ;;  %v2536_v17 = vadd.f32 %v4451_v2, %v2535_v59 }
 0x5ee   : > { %v5174_v13 = vpack.c.bf16 %v2551_v8, %v2549_v3 }
 0x5ef   : > { %v2289_v22 = vmul.f32 0.5, %v2288_v20 }
 0x5f0   : > { %2623 = vmatpush.bf16.msra.mxu3 %v5174_v13 }
 0x5f1   : > { %v2290_v24 = vsub.f32 1.5, %v2289_v22 }
 0x5f2   : > { %v4501_v25 = vpop.eup %4500 }
 0x5f3   : > { %v2291_v26 = vmul.f32 %v4499_v55, %v2290_v24  ;;  %v2297_v27 = vmul.f32 %v4501_v25, %v2285_v16  ;;  %vm2303_vm9 = vweird.f32 %v4501_v25  ;;  %v2534_v16 = vadd.f32 %v4451_v2, %v2533_v58 }
 0x5f4   : > { %vm2304_vm11 = vmor %vm2302_vm10, %vm2303_vm9 }
 0x5f5   : > { %v2295_v29 = vsel %vm2294_vm8, %v4499_v55, %v2291_v26  ;;  %v2298_v30 = vmul.f32 %v4501_v25, %v2297_v27  ;;  %v5176_v55 = vpack.c.bf16 %v2546_v6, %v2544_v5  ;;  %v5182_v20 = vpack.c.bf16 %v2536_v17, %v2534_v16 }
 0x5f6   : > { %v2306_v37 = vmul.f32 %v2295_v29, %v5095_v36 }
 0x5f7   : > { %v2299_v33 = vmul.f32 0.5, %v2298_v30  ;;  %2624 = vmatpush.bf16.msra.mxu3 %v5176_v55 }
 0x5f8   : > { %v2311_v42 = vmul.f32 %v4448_v35, %v2306_v37 }
 0x5f9   : > { %v2300_v38 = vsub.f32 1.5, %v2299_v33 }
 0x5fa   : > { %v5147_v46 = vadd.f32 %v4449_v41, %v2311_v42 }
 0x5fb   : > { %v2301_v40 = vmul.f32 %v4501_v25, %v2300_v38  ;;  %2625 = vmatpush.bf16.msra.mxu3 %v5179_v18 }
 0x5fc   : > { %v2318_v49 = vadd.f32 %v5147_v46, %v4979_v10  ;;  %v2569_v10 = vsel %vm1903_vm2, %v5127_v9, 0 }
 0x5fd   : > { %v2305_v43 = vsel %vm2304_vm11, %v4501_v25, %v2301_v40 }
 0x5fe   : > { %v2307_v44 = vmul.f32 %v2305_v43, %v5103_v47  ;;  %v2575_v47 = vsel %vm1903_vm2, %v2557_v56, 0 }
 0x5ff   : > { %2581 = vmatpush.bf16.xpose.msrb.mxu2 %v2575_v47  ;;  %2626 = vmatpush.bf16.msra.mxu3 %v5182_v20  ;;  %v2643_v29 = vpop.permute.xlu0 %2642 }
 0x600   : > { %v2312_v36 = vmul.f32 %v4448_v35, %v2307_v44  ;;  %v2655_v33 = vsel %vm1903_vm2, %v2643_v29, 0 }
 0x602   : > { %v5149_v48 = vadd.f32 %v4449_v41, %v2312_v36 }
 0x604   : > { %v2319_v50 = vadd.f32 %v5149_v48, %v4982_v11  ;;  %v2566_v11 = vsel %vm1903_vm2, %v5131_v23, 0 }
 0x606   : > { %v2364_v52 = vpack.c.bf16 %v2319_v50, %v2318_v49 }
 0x607   : > { %2582 = vmatpush.bf16.xpose.msrb.mxu2 %v2572_v57  ;;  %v2647_v1 = vpop.permute.xlu2 %2646  ;;  %v2641_v35 = vpop.permute.xlu0 %2640 }
 0x608   : > { %4070 = vmatmul.msk.bf16.vlgmr.msrb.gmra.mxu3 %vm1796_vm1, %v2364_v52  ;;  %v2661_v22 = vsel %vm1903_vm2, %v2647_v1, 0  ;;  %v2652_v38 = vsel %vm1903_vm2, %v2641_v35, 0 }
 0x609   : > { %2667 = vmatpush.bf16.xpose.msrb.mxu3 %v2661_v22 }
 0x60f   : > { %2583 = vmatpush.bf16.xpose.msrb.mxu2 %v2569_v10  ;;  %v2744_v7 = vpop.permute.xlu2 %2743  ;;  %v2645_v24 = vpop.permute.xlu1 %2644 }
 0x610   : > { %v2758_v12 = vsel %vm1903_vm2, %v2744_v7, 0  ;;  %v2658_v27 = vsel %vm1903_vm2, %v2645_v24, 0 }
 0x611   : > { %2764 = vmatpush.bf16.xpose.msra.mxu0 %v2758_v12  ;;  %2668 = vmatpush.bf16.xpose.msrb.mxu3 %v2658_v27 }
 0x617   : > { %2584 = vmatpush.bf16.xpose.msrb.mxu2 %v2566_v11  ;;  %v2837_v19 = vpop.permute.xlu2 %2836 }
 0x618   : > { %v2851_v21 = vsel %vm1903_vm2, %v2837_v19, 0 }
 0x619   : > { %2857 = vmatpush.bf16.xpose.msra.mxu1 %v2851_v21  ;;  %2669 = vmatpush.bf16.xpose.msrb.mxu3 %v2655_v33 }
 0x61f   : > { %v2835_v25 = vpop.permute.xlu2 %2834 }
 0x620   : > { %v2848_v26 = vsel %vm1903_vm2, %v2835_v25, 0 }
 0x621   : > { %2858 = vmatpush.bf16.xpose.msra.mxu1 %v2848_v26  ;;  %2670 = vmatpush.bf16.xpose.msrb.mxu3 %v2652_v38 }
 0x627   : > { %v2833_v30 = vpop.permute.xlu2 %2832 }
 0x628   : > { %v2845_v31 = vsel %vm1903_vm2, %v2833_v30, 0 }
 0x629   : > { %2859 = vmatpush.bf16.xpose.msra.mxu1 %v2845_v31 }
 0x68b   : > { %v2404_v32 = vpop.f32.mrf.mxu3 }
 0x68c   : > { %v2405_v40 = vadd.f32 %v4452_v34, %v2404_v32 }
 0x693   : > { %v2406_v37 = vpop.f32.mrf.mxu3 }
 0x694   : > { %v2407_v41 = vadd.f32 %v4452_v34, %v2406_v37 }
 0x696   : > { %v2553_v42 = vpack.c.bf16 %v2407_v41, %v2405_v40 }
 0x698   : > { %2735 = vrot.lane.b32.xlu2 %v2553_v42, %s4632_s11  ;;  %4111 = vmatmul.msk.bf16.vlgmr.msrb.gmra.mxu2 %vm1903_vm2, %v2553_v42 }
 0x6f2   : > { %v2736_v7 = vpop.permute.xlu2 %2735 }
 0x71b   : > { %v2586_v43 = vpop.f32.mrf.mxu2 }
 0x71c   : > { %v2591_v44 = vmul.f32 0.25, %v2586_v43 }
 0x71e   : > { %v2593_v45 = vsel %vm1796_vm1, %v2591_v44, -inf }
 0x71f   : > { %2594 = vmax.xlane.f32.xlu1 %v2593_v45 }
 0x723   : > { %v2588_v36 = vpop.f32.mrf.mxu2 }
 0x724   : > { %v2592_v49 = vmul.f32 0.25, %v2588_v36 }
 0x726   : > { %v2596_v50 = vsel %vm1796_vm1, %v2592_v49, -inf }
 0x727   : > { %2597 = vmax.xlane.f32.xlu0 %v2596_v50 }
 0x738   : > { %2741 = vrot.lane.b32.xlu1 %v5139_v39, %s4632_s11 }
 0x73b   : > { %2634 = vrot.lane.b32.xlu0 %v2553_v42, %s4631_s7 }
 0x792   : > { %v2595_v51 = vpop.xlane.xlu1 %2594 }
 0x793   : > { %v2599_v52 = vsub.f32 %v2591_v44, %v2595_v51 }
 0x795   : > { %v2601_v53 = vmul.f32 1.442695, %v2599_v52 }
 0x797   : > { %4502 = vpow2.f32 %v2601_v53 }
 0x79a   : > { %v2598_v54 = vpop.xlane.xlu0 %2597 }
 0x79b   : > { %v2600_v56 = vsub.f32 %v2592_v49, %v2598_v54 }
 0x79d   : > { %v4503_v47 = vpop.eup %4502  ;;  %v2603_v57 = vmul.f32 1.442695, %v2600_v56 }
 0x79e   : > { %v2605_v10 = vsel %vm1796_vm1, %v4503_v47, 0.0 }
 0x79f   : > { %4504 = vpow2.f32 %v2603_v57  ;;  %2606 = vadd.xlane.f32.xlu1 %v2605_v10 }
 0x7a5   : > { %v4505_v11 = vpop.eup %4504 }
 0x7a6   : > { %v2608_v58 = vsel %vm1796_vm1, %v4505_v11, 0.0 }
 0x7a7   : > { %2609 = vadd.xlane.f32.xlu0 %v2608_v58 }
 0x7aa   : > { %v2742_v59 = vpop.permute.xlu1 %2741 }
 0x7ab   : > { %v2755_v39 = vsel %vm1903_vm2, %v2742_v59, 0 }
 0x7ac   : > { %2765 = vmatpush.bf16.xpose.msra.mxu0 %v2755_v39 }
 0x7ad   : > { %v2635_v60 = vpop.permute.xlu0 %2634 }
 0x7b8   : > { %2739 = vrot.lane.b32.xlu1 %v5127_v9, %s4632_s11 }
 0x7bb   : > { %2737 = vrot.lane.b32.xlu0 %v5131_v23, %s4632_s11 }
 0x7c0   : > { %2830 = vrot.lane.b32.xlu1 %v5131_v23, %s4630_s1 }
 0x7c3   : > { %2828 = vrot.lane.b32.xlu0 %v2553_v42, %s4630_s1 }
 0x812   : > { %v2607_v61 = vpop.xlane.xlu1 %2606 }
 0x813   : > { %4506 = vrcp.f32 %v2607_v61 }
 0x819   : > { %v4507_v63 = vpop.eup %4506 }
 0x81a   : > { %v2610_v62 = vpop.xlane.xlu0 %2609  ;;  %v2613_v1 = vmul.f32 %v4507_v63, %v4503_v47 }
 0x81b   : > { %4508 = vrcp.f32 %v2610_v62 }
 0x821   : > { %v4509_v0 = vpop.eup %4508 }
 0x822   : > { %v2614_v2 = vmul.f32 %v4509_v0, %v4505_v11 }
 0x824   : > { %v2615_v3 = vpack.c.bf16 %v2614_v2, %v2613_v1 }
 0x826   : > { %4112 = vmatmul.msk.bf16.vlgmr.msra.gmra.mxu3 %vm1796_vm1, %v2615_v3 }
 0x82a   : > { %v2740_v9 = vpop.permute.xlu1 %2739 }
 0x82b   : > { %v2752_v4 = vsel %vm1903_vm2, %v2740_v9, 0 }
 0x82c   : > { %2766 = vmatpush.bf16.xpose.msra.mxu0 %v2752_v4 }
 0x82d   : > { %v2738_v5 = vpop.permute.xlu0 %2737 }
 0x82e   : > { %v2749_v6 = vsel %vm1903_vm2, %v2738_v5, 0 }
 0x832   : > { %v2831_v23 = vpop.permute.xlu1 %2830 }
 0x833   : > { %v2842_v8 = vsel %vm1903_vm2, %v2831_v23, 0 }
 0x834   : > { %2767 = vmatpush.bf16.xpose.msra.mxu0 %v2749_v6  ;;  %2860 = vmatpush.bf16.xpose.msra.mxu1 %v2842_v8 }
 0x835   : > { %v2829_v12 = vpop.permute.xlu0 %2828 }
 0x836   : > { %4113 = vmatmul.msk.bf16.vlgmr.msrb.gmra.mxu3 %vm1903_vm2, %v2635_v60 }
 0x83b   : > { %4115 = vmatmul.msk.bf16.vlgmr.msra.gmra.mxu0 %vm1903_vm2, %v2736_v7  ;;  %4117 = vmatmul.msk.bf16.vlgmr.msra.gmra.mxu1 %vm1903_vm2, %v2829_v12 }
 0x8a9   : > { %v5236_v30 = vpop.f32.mrf.mxu3 }
 0x8b1   : > { %v5238_v31 = vpop.f32.mrf.mxu3 }
 0x8b8   : > { %v2769_v14 = vpop.f32.mrf.mxu0  ;;  %v2862_v15 = vpop.f32.mrf.mxu1 }
 0x8b9   : > { %v2774_v16 = vmul.f32 0.25, %v2769_v14  ;;  %v2867_v17 = vmul.f32 0.25, %v2862_v15  ;;  %v2672_v32 = vpop.f32.mrf.mxu3 }
 0x8ba   : > { %v2677_v33 = vmul.f32 0.25, %v2672_v32 }
 0x8bb   : > { %v2776_v19 = vsel %vm1796_vm1, %v2774_v16, -inf  ;;  %v2869_v21 = vsel %vm1796_vm1, %v2867_v17, -inf }
 0x8bc   : > { %2777 = vmax.xlane.f32.xlu0 %v2776_v19  ;;  %2870 = vmax.xlane.f32.xlu2 %v2869_v21  ;;  %v2679_v34 = vsel %vm1796_vm1, %v2677_v33, -inf }
 0x8c0   : > { %v2771_v22 = vpop.f32.mrf.mxu0  ;;  %v2864_v24 = vpop.f32.mrf.mxu1 }
 0x8c1   : > { %v2775_v25 = vmul.f32 0.25, %v2771_v22  ;;  %v2868_v26 = vmul.f32 0.25, %v2864_v24  ;;  %v2674_v47 = vpop.f32.mrf.mxu3 }
 0x8c2   : > { %v2678_v57 = vmul.f32 0.25, %v2674_v47  ;;  %v4296_v47 = vld [vmem:[%s4934_s29 + $0x8] sm:$0xff] }
 0x8c3   : > { %v2779_v27 = vsel %vm1796_vm1, %v2775_v25, -inf  ;;  %v2872_v29 = vsel %vm1796_vm1, %v2868_v26, -inf }
 0x8c4   : > { %2780 = vmax.xlane.f32.xlu1 %v2779_v27  ;;  %2873 = vmax.xlane.f32.xlu0 %v2872_v29  ;;  %v2682_v11 = vsel %vm1796_vm1, %v2678_v57, -inf }
 0x8d4   : > { %2710 = vrot.lane.b32.xlu2 %v5176_v55, %s4631_s7 }
 0x8d8   : > { %2708 = vrot.lane.b32.xlu0 %v5179_v18, %s4631_s7 }
 0x8dd   : > { %2712 = vrot.lane.b32.xlu1 %v5174_v13, %s4631_s7 }
 0x8e0   : > { %2898 = vrot.lane.b32.xlu0 %v5174_v13, %s4630_s1 }
 0x8e5   : > { %2706 = vrot.lane.b32.xlu1 %v5182_v20, %s4631_s7  ;;  %s5535_s7 = sld [smem:[#allocation38_spill]] }
 0x8e8   : > { %2803 = vrot.lane.b32.xlu0 %v5176_v55, %s4632_s11 }
 0x90f   : > { %2680 = vmax.xlane.f32.xlu1 %v2679_v34 }
 0x928   : > { %2805 = vrot.lane.b32.xlu1 %v5174_v13, %s4632_s11 }
 0x92f   : > { %v2778_v35 = vpop.xlane.xlu0 %2777  ;;  %v2871_v37 = vpop.xlane.xlu2 %2870 }
 0x930   : > { %v2782_v38 = vsub.f32 %v2774_v16, %v2778_v35  ;;  %v2875_v40 = vsub.f32 %v2867_v17, %v2871_v37 }
 0x932   : > { %v2784_v41 = vmul.f32 1.442695, %v2782_v38  ;;  %v2877_v42 = vmul.f32 1.442695, %v2875_v40 }
 0x934   : > { %4510 = vpow2.f32 %v2784_v41 }
 0x935   : > { %4512 = vpow2.f32 %v2877_v42 }
 0x937   : > { %v2874_v43 = vpop.xlane.xlu0 %2873  ;;  %v2781_v51 = vpop.xlane.xlu1 %2780 }
 0x938   : > { %v2876_v44 = vsub.f32 %v2868_v26, %v2874_v43  ;;  %v2783_v52 = vsub.f32 %v2775_v25, %v2781_v51  ;;  %v2711_v61 = vpop.permute.xlu2 %2710 }
 0x93a   : > { %v4511_v45 = vpop.eup %4510  ;;  %v2879_v36 = vmul.f32 1.442695, %v2876_v44  ;;  %v2786_v54 = vmul.f32 1.442695, %v2783_v52 }
 0x93b   : > { %v5243_v49 = vpop.eup %4512  ;;  %v2788_v50 = vsel %vm1796_vm1, %v4511_v45, 0.0 }
 0x93c   : > { %2789 = vadd.xlane.f32.xlu2 %v2788_v50  ;;  %v2881_v13 = vsel %vm1796_vm1, %v5243_v49, 0.0  ;;  %4514 = vpow2.f32 %v2879_v36 }
 0x93d   : > { %2882 = vadd.xlane.f32.xlu0 %v2881_v13  ;;  %4516 = vpow2.f32 %v2786_v54  ;;  %v4298_v54 = vld [vmem:[%s4934_s29 + $0x18] sm:$0xff] }
 0x942   : > { %v5248_v53 = vpop.eup %4514 }
 0x943   : > { %v2884_v56 = vsel %vm1796_vm1, %v5248_v53, 0.0  ;;  %v4517_v58 = vpop.eup %4516 }
 0x944   : > { %2885 = vadd.xlane.f32.xlu2 %v2884_v56  ;;  %v2791_v39 = vsel %vm1796_vm1, %v4517_v58, 0.0  ;;  %v4297_v56 = vld [vmem:[%s4934_s29 + $0x10] sm:$0xff] }
 0x94a   : > { %v2709_v10 = vpop.permute.xlu0 %2708 }
 0x94c   : > { %2683 = vmax.xlane.f32.xlu2 %v2682_v11 }
 0x94f   : > { %v2713_v59 = vpop.permute.xlu1 %2712 }
 0x950   : > { %2725 = vmatpush.bf16.msra.mxu2 %v2713_v59 }
 0x952   : > { %v2899_v60 = vpop.permute.xlu0 %2898  ;;  %2792 = vadd.xlane.f32.xlu1 %v2791_v39 }
 0x953   : > { %2911 = vmatpush.bf16.msra.mxu3 %v2899_v60 }
 0x954   : > { %2726 = vmatpush.bf16.msra.mxu2 %v2711_v61 }
 0x957   : > { %v2707_v62 = vpop.permute.xlu1 %2706 }
 0x958   : > { %2727 = vmatpush.bf16.msra.mxu2 %v2709_v10 }
 0x95a   : > { %v2804_v4 = vpop.permute.xlu0 %2803 }
 0x95c   : > { %2728 = vmatpush.bf16.msra.mxu2 %v2707_v62 }
 0x964   : > { %2801 = vrot.lane.b32.xlu2 %v5179_v18, %s4632_s11 }
 0x96b   : > { %2896 = vrot.lane.b32.xlu1 %v5176_v55, %s4630_s1 }
 0x973   : > { %2799 = vrot.lane.b32.xlu1 %v5182_v20, %s4632_s11  ;;  %s5536_s11 = smov %s5535_s7 }
 0x982   : > { %v2681_v63 = vpop.xlane.xlu1 %2680 }
 0x983   : > { %v2685_v0 = vsub.f32 %v2677_v33, %v2681_v63 }
 0x985   : > { %v2687_v1 = vmul.f32 1.442695, %v2685_v0 }
 0x987   : > { %4518 = vpow2.f32 %v2687_v1 }
 0x98d   : > { %v4519_v2 = vpop.eup %4518 }
 0x98e   : > { %v2691_v3 = vsel %vm1796_vm1, %v4519_v2, 0.0 }
 0x98f   : > { %2692 = vadd.xlane.f32.xlu2 %v2691_v3 }
 0x99a   : > { %v2806_v9 = vpop.permute.xlu1 %2805 }
 0x99b   : > { %2818 = vmatpush.bf16.msrb.mxu2 %v2806_v9 }
 0x99f   : > { %2819 = vmatpush.bf16.msrb.mxu2 %v2804_v4 }
 0x9a7   : > { %2892 = vrot.lane.b32.xlu2 %v5182_v20, %s4630_s1 }
 0x9af   : > { %v2790_v5 = vpop.xlane.xlu2 %2789 }
 0x9b0   : > { %4520 = vrcp.f32 %v2790_v5  ;;  %v2883_v25 = vpop.xlane.xlu0 %2882 }
 0x9b6   : > { %v4521_v14 = vpop.eup %4520 }
 0x9b7   : > { %v2886_v55 = vpop.xlane.xlu2 %2885  ;;  %v2796_v19 = vmul.f32 %v4521_v14, %v4511_v45 }
 0x9bf   : > { %v2684_v23 = vpop.xlane.xlu2 %2683 }
 0x9c0   : > { %v2686_v6 = vsub.f32 %v2678_v57, %v2684_v23  ;;  %v4295_v57 = vld [vmem:[%s4934_s29] sm:$0xff] }
 0x9c2   : > { %v2689_v8 = vmul.f32 1.442695, %v2686_v6 }
 0x9c4   : > { %4522 = vpow2.f32 %v2689_v8 }
 0x9c5   : > { %v2793_v7 = vpop.xlane.xlu1 %2792 }
 0x9c6   : > { %4524 = vrcp.f32 %v2793_v7 }
 0x9c7   : > { %v2802_v12 = vpop.permute.xlu2 %2801 }
 0x9c8   : > { %2820 = vmatpush.bf16.msrb.mxu2 %v2802_v12 }
 0x9ca   : > { %v4523_v15 = vpop.eup %4522 }
 0x9cb   : > { %v2694_v17 = vsel %vm1796_vm1, %v4523_v15, 0.0 }
 0x9cc   : > { %v4525_v16 = vpop.eup %4524  ;;  %2695 = vadd.xlane.f32.xlu0 %v2694_v17 }
 0x9cd   : > { %v2797_v21 = vmul.f32 %v4525_v16, %v4517_v58 }
 0x9cf   : > { %v2798_v20 = vpack.c.bf16 %v2797_v21, %v2796_v19 }
 0x9dd   : > { %v2897_v22 = vpop.permute.xlu1 %2896 }
 0x9de   : > { %2912 = vmatpush.bf16.msra.mxu3 %v2897_v22 }
 0x9e0   : > { %2894 = vrot.lane.b32.xlu0 %v5179_v18, %s4630_s1 }
 0x9e5   : > { %v2800_v24 = vpop.permute.xlu1 %2799 }
 0x9e6   : > { %2821 = vmatpush.bf16.msrb.mxu2 %v2800_v24 }
 0xa02   : > { %v2693_v26 = vpop.xlane.xlu2 %2692 }
 0xa03   : > { %4526 = vrcp.f32 %v2693_v26  ;;  %v4301_v26 = vld [vmem:[%s4943_s20 + $0x10] sm:$0xff] }
 0xa09   : > { %v4527_v29 = vpop.eup %4526 }
 0xa0a   : > { %v2699_v33 = vmul.f32 %v4527_v29, %v4519_v2  ;;  %v2893_v42 = vpop.permute.xlu2 %2892 }
 0xa3f   : > { %v2696_v27 = vpop.xlane.xlu0 %2695 }
 0xa40   : > { %4528 = vrcp.f32 %v2696_v27  ;;  %v4300_v27 = vld [vmem:[%s4943_s20 + $0x8] sm:$0xff] }
 0xa41   : > { %4530 = vrcp.f32 %v2886_v55  ;;  %v4453_v55 = vld [vmem:[%s1653_s9] ss:$0 sm:$0xff] }
 0xa42   : > { %4532 = vrcp.f32 %v2883_v25  ;;  %v4302_v25 = vld [vmem:[%s4943_s20 + $0x18] sm:$0xff] }
 0xa46   : > { %v4529_v32 = vpop.eup %4528 }
 0xa47   : > { %v2700_v34 = vmul.f32 %v4529_v32, %v4523_v15  ;;  %v4531_v37 = vpop.eup %4530 }
 0xa48   : > { %v4533_v40 = vpop.eup %4532  ;;  %v2890_v18 = vmul.f32 %v4531_v37, %v5248_v53 }
 0xa49   : > { %v2701_v35 = vpack.c.bf16 %v2700_v34, %v2699_v33  ;;  %v2889_v41 = vmul.f32 %v4533_v40, %v5243_v49  ;;  %v4299_v34 = vld [vmem:[%s4943_s20] sm:$0xff]  ;;  %v4309_v40 = vld [vmem:[%s4949_s27 + $0x30] sm:$0xff] }
 0xa4b   : > { %4114 = vmatmul.msk.bf16.vlgmr.msra.gmra.mxu2 %vm1796_vm1, %v2701_v35  ;;  %v2891_v43 = vpack.c.bf16 %v2890_v18, %v2889_v41  ;;  %v4310_v35 = vld [vmem:[%s4949_s27 + $0x38] sm:$0xff] }
 0xa4c   : > { %2986 = vmatpush.bf16.msra.mxu2 %v4298_v54  ;;  %3179 = vmatpush.bf16.msrb.mxu0 %v4310_v35 }
 0xa50   : > { %2987 = vmatpush.bf16.msra.mxu2 %v4297_v56  ;;  %3180 = vmatpush.bf16.msrb.mxu0 %v4309_v40 }
 0xa52   : > { %v2895_v38 = vpop.permute.xlu0 %2894 }
 0xa53   : > { %2913 = vmatpush.bf16.msra.mxu3 %v2895_v38 }
 0xa54   : > { %2988 = vmatpush.bf16.msra.mxu2 %v4296_v47  ;;  %v4454_v47 = vld [vmem:[%s1656_s12] ss:$0 sm:$0xff] }
 0xa57   : > { %2914 = vmatpush.bf16.msra.mxu3 %v2893_v42 }
 0xa58   : > { %2989 = vmatpush.bf16.msra.mxu2 %v4295_v57 }
 0xa5a   : > { %4118 = vmatmul.msk.bf16.vlgmr.msra.gmra.mxu3 %vm1796_vm1, %v2891_v43  ;;  %v4308_v43 = vld [vmem:[%s4949_s27 + $0x28] sm:$0xff] }
 0xa5b   : > { %4116 = vmatmul.msk.bf16.vlgmr.msrb.gmra.mxu2 %vm1796_vm1, %v2798_v20  ;;  %3115 = vmatpush.bf16.msrb.mxu3 %v4302_v25 }
 0xa5c   : > { %3181 = vmatpush.bf16.msrb.mxu0 %v4308_v43 }
 0xa5f   : > { %3116 = vmatpush.bf16.msrb.mxu3 %v4301_v26 }
 0xa63   : > { %3117 = vmatpush.bf16.msrb.mxu3 %v4300_v27 }
 0xa67   : > { %3118 = vmatpush.bf16.msrb.mxu3 %v4299_v34 }
 0xace   : > { %v2730_v44 = vpop.f32.mrf.mxu2 }
 0xad6   : > { %v2732_v45 = vpop.f32.mrf.mxu2 }
 0xad7   : > { %v4429_v36 = vpack.i.bf16 %v2732_v45, %v2730_v44 }
 0xad9   : > { %4430 = vrot.lane.b32.xlu0 %v4429_v36, %s4633_s0  ;;  %v4307_v36 = vld [vmem:[%s4949_s27 + $0x20] sm:$0xff]  ;;  %s5540_s0 = sld [smem:[#allocation39_spill]] }
 0xada   : > { %3182 = vmatpush.bf16.msrb.mxu0 %v4307_v36 }
 0xadd   : > { %v2916_v50 = vpop.f32.mrf.mxu3 }
 0xade   : > { %v2823_v13 = vpop.f32.mrf.mxu2 }
 0xae5   : > { %v2918_v51 = vpop.f32.mrf.mxu3 }
 0xae6   : > { %v4439_v49 = vpack.i.bf16 %v2918_v51, %v2916_v50  ;;  %v2825_v52 = vpop.f32.mrf.mxu2 }
 0xae7   : > { %v4434_v53 = vpack.i.bf16 %v2825_v52, %v2823_v13 }
 0xae8   : > { %4440 = vrot.lane.b32.xlu2 %v4439_v49, %s4635_s28  ;;  %s5542_s28 = sld [smem:[#allocation7_spill]] }
 0xae9   : > { %4435 = vrot.lane.b32.xlu1 %v4434_v53, %s4634_s2  ;;  %s5541_s2 = sld [smem:[#allocation41_spill]] }
 0xaee   : > { %s5543_s4 = smov %s5542_s28 }
 0xb42   : > { %v4441_v59 = vpop.permute.xlu2 %4440 }
 0xb43   : > { %v4443_v62 = vunpack.i.h.bf16 %v4441_v59  ;;  %v4442_v63 = vunpack.i.l.bf16 %v4441_v59 }
 0xb4b   : > { %v4431_v10 = vpop.permute.xlu0 %4430 }
 0xb4c   : > { %v4433_v11 = vunpack.i.h.bf16 %v4431_v10  ;;  %v4432_v58 = vunpack.i.l.bf16 %v4431_v10 }
 0xb4e   : > { %v2946_v0 = vsel %vm1903_vm2, %v5238_v31, %v4433_v11  ;;  %v2945_v1 = vsel %vm1903_vm2, %v5236_v30, %v4432_v58  ;;  %v4455_v58 = vld [vmem:[%s1659_s19] ss:$0 sm:$0xff]  ;;  %s5531_s19 = sld [smem:[#allocation34_spill]] }
 0xb54   : > { %v4313_v35 = vld [vmem:[%s5531_s19 + $0x10] sm:$0xff]  ;;  %v4311_v43 = vld [vmem:[%s5531_s19] sm:$0xff] }
 0xb5b   : > { %v4436_v39 = vpop.permute.xlu1 %4435 }
 0xb5c   : > { %v4438_v60 = vunpack.i.h.bf16 %v4436_v39  ;;  %v4437_v61 = vunpack.i.l.bf16 %v4436_v39 }
 0xb5e   : > { %v2948_v2 = vsel %vm2202_vm3, %v2946_v0, %v4438_v60  ;;  %v2947_v3 = vsel %vm2202_vm3, %v2945_v1, %v4437_v61  ;;  %v4306_v0 = vld [vmem:[%s4949_s27 + $0x18] sm:$0xff]  ;;  %v4305_v1 = vld [vmem:[%s4949_s27 + $0x10] sm:$0xff] }
 0xb5f   : > { %v2949_v9 = vsel %vm2205_vm4, %v2947_v3, %v4442_v63  ;;  %v2950_v4 = vsel %vm2205_vm4, %v2948_v2, %v4443_v62  ;;  %3183 = vmatpush.bf16.msrb.mxu0 %v4306_v0  ;;  %v4304_v2 = vld [vmem:[%s4949_s27 + $0x8] sm:$0xff]  ;;  %v4303_v3 = vld [vmem:[%s4949_s27] sm:$0xff]  ;;  %s5532_s27 = sld [smem:[#allocation36_spill]] }
 0xb60   : > { %v2951_v5 = vpack.c.bf16 %v2950_v4, %v2949_v9  ;;  %v4456_v4 = vld [vmem:[%s1667_s16] ss:$0 sm:$0xff] }
 0xb62   : > { %4135 = vmatmul.msk.bf16.vlgmr.msra.gmra.mxu2 %vm1796_vm1, %v2951_v5 }
 0xb63   : > { %3184 = vmatpush.bf16.msrb.mxu0 %v4305_v1 }
 0xb65   : > { %v4318_v34 = vld [vmem:[%s5532_s27 + $0x18] sm:$0xff]  ;;  %v4316_v40 = vld [vmem:[%s5532_s27 + $0x8] sm:$0xff] }
 0xb66   : > { %3349 = vmatpush.bf16.msrb.mxu2 %v4318_v34 }
 0xb67   : > { %3185 = vmatpush.bf16.msrb.mxu0 %v4304_v2 }
 0xb6b   : > { %3186 = vmatpush.bf16.msrb.mxu0 %v4303_v3 }
 0xbe5   : > { %v2991_v23 = vpop.f32.mrf.mxu2 }
 0xbe6   : > { %v2992_v6 = vadd.f32 %v4453_v55, %v2991_v23 }
 0xbe8   : > { %v2996_v31 = vadd.f32 %v2992_v6, %v5147_v46 }
 0xbea   : > { %v3000_v8 = vsel %vm1796_vm1, %v2996_v31, 0.0 }
 0xbeb   : > { %3001 = vadd.xlane.f32.xlu0 %v3000_v8 }
 0xbed   : > { %v2993_v30 = vpop.f32.mrf.mxu2 }
 0xbee   : > { %v2994_v7 = vadd.f32 %v4453_v55, %v2993_v30  ;;  %v4457_v30 = vld [vmem:[%s1675_s22] ss:$0 sm:$0xff] }
 0xbf0   : > { %v2997_v12 = vadd.f32 %v2994_v7, %v5149_v48 }
 0xbf2   : > { %v3003_v14 = vsel %vm1796_vm1, %v2997_v12, 0.0 }
 0xbf3   : > { %3004 = vadd.xlane.f32.xlu1 %v3003_v14 }
 0xc5e   : > { %v3002_v15 = vpop.xlane.xlu0 %3001 }
 0xc5f   : > { %v3006_v16 = vmul.f32 %v3002_v15, %v5087_v28 }
 0xc61   : > { %v3008_v17 = vsub.f32 %v2996_v31, %v3006_v16 }
 0xc63   : > { %v3010_v19 = vmul.f32 %v3008_v17, %v3008_v17 }
 0xc65   : > { %v3012_v46 = vsel %vm1796_vm1, %v3010_v19, 0.0 }
 0xc66   : > { %v3005_v21 = vpop.xlane.xlu1 %3004  ;;  %3013 = vadd.xlane.f32.xlu2 %v3012_v46 }
 0xc67   : > { %v3007_v20 = vmul.f32 %v3005_v21, %v5087_v28 }
 0xc69   : > { %v3009_v22 = vsub.f32 %v2997_v12, %v3007_v20 }
 0xc6b   : > { %v3011_v48 = vmul.f32 %v3009_v22, %v3009_v22 }
 0xc6d   : > { %v3015_v24 = vsel %vm1796_vm1, %v3011_v48, 0.0 }
 0xc6e   : > { %3016 = vadd.xlane.f32.xlu0 %v3015_v24 }
 0xcd9   : > { %v3014_v29 = vpop.xlane.xlu2 %3013 }
 0xcda   : > { %v3018_v32 = vmul.f32 %v3014_v29, %v5087_v28 }
 0xcdc   : > { %v3020_v33 = vadd.f32 1e-05, %v3018_v32 }
 0xcde   : > { %4534 = vrsqrt.f32 %v3020_v33  ;;  %vm3028_vm13 = vweird.f32 %v3020_v33 }
 0xce1   : > { %v3017_v37 = vpop.xlane.xlu0 %3016 }
 0xce2   : > { %v3019_v38 = vmul.f32 %v3017_v37, %v5087_v28  ;;  %v4317_v37 = vld [vmem:[%s5532_s27 + $0x10] sm:$0xff] }
 0xce3   : > { %3350 = vmatpush.bf16.msrb.mxu2 %v4317_v37 }
 0xce4   : > { %v4535_v18 = vpop.eup %4534  ;;  %v3021_v41 = vadd.f32 1e-05, %v3019_v38  ;;  %v4312_v38 = vld [vmem:[%s5531_s19 + $0x8] sm:$0xff] }
 0xce5   : > { %v3023_v42 = vmul.f32 %v4535_v18, %v3020_v33  ;;  %vm3029_vm12 = vweird.f32 %v4535_v18  ;;  %v4314_v33 = vld [vmem:[%s5531_s19 + $0x18] sm:$0xff] }
 0xce6   : > { %4536 = vrsqrt.f32 %v3021_v41  ;;  %vm3030_vm14 = vmor %vm3028_vm13, %vm3029_vm12  ;;  %vm3038_vm0 = vweird.f32 %v3021_v41  ;;  %3297 = vmatpush.bf16.msrb.mxu1 %v4314_v33 }
 0xce7   : > { %v3024_v44 = vmul.f32 %v4535_v18, %v3023_v42  ;;  %3351 = vmatpush.bf16.msrb.mxu2 %v4316_v40 }
 0xce9   : > { %v3025_v45 = vmul.f32 0.5, %v3024_v44  ;;  %v4315_v44 = vld [vmem:[%s5532_s27] sm:$0xff] }
 0xcea   : > { %3298 = vmatpush.bf16.msrb.mxu1 %v4313_v35  ;;  %v4463_v35 = vld [vmem:[%s5541_s2] ss:$0 sm:$0xff] }
 0xceb   : > { %v3026_v50 = vsub.f32 1.5, %v3025_v45  ;;  %3352 = vmatpush.bf16.msrb.mxu2 %v4315_v44  ;;  %v3472_v44 = vld [vmem:[%s5543_s4 + $0x8] sm:$0xff] }
 0xcec   : > { %v4537_v13 = vpop.eup %4536 }
 0xced   : > { %v3027_v51 = vmul.f32 %v4535_v18, %v3026_v50  ;;  %v3033_v49 = vmul.f32 %v4537_v13, %v3021_v41  ;;  %vm3039_vm15 = vweird.f32 %v4537_v13 }
 0xcee   : > { %vm3040_vm2 = vmor %vm3038_vm0, %vm3039_vm15  ;;  %3299 = vmatpush.bf16.msrb.mxu1 %v4312_v38  ;;  %v3471_v38 = vld [vmem:[%s5542_s28] sm:$0xff] }
 0xcef   : > { %v3034_v52 = vmul.f32 %v4537_v13, %v3033_v49  ;;  %v3031_v53 = vsel %vm3030_vm14, %v4535_v18, %v3027_v51 }
 0xcf0   : > { %v3042_v57 = vmul.f32 %v3031_v53, %v3008_v17 }
 0xcf1   : > { %v3035_v54 = vmul.f32 0.5, %v3034_v52 }
 0xcf2   : > { %v3047_v59 = vmul.f32 %v4454_v47, %v3042_v57  ;;  %3300 = vmatpush.bf16.msrb.mxu1 %v4311_v43  ;;  %v4458_v57 = vld [vmem:[%s1678_s13] ss:$0 sm:$0xff]  ;;  %s5537_s13 = sld [smem:[#allocation35_spill]] }
 0xcf3   : > { %v3036_v56 = vsub.f32 1.5, %v3035_v54 }
 0xcf4   : > { %v3052_v61 = vadd.f32 %v4455_v58, %v3047_v59 }
 0xcf5   : > { %v3037_v10 = vmul.f32 %v4537_v13, %v3036_v56 }
 0xcf7   : > { %v3041_v11 = vsel %vm3040_vm2, %v4537_v13, %v3037_v10 }
 0xcf8   : > { %v3043_v39 = vmul.f32 %v3041_v11, %v3009_v22 }
 0xcfa   : > { %v3048_v60 = vmul.f32 %v4454_v47, %v3043_v39 }
 0xcfc   : > { %v3053_v62 = vadd.f32 %v4455_v58, %v3048_v60 }
 0xcfe   : > { %v3080_v63 = vpack.c.bf16 %v3053_v62, %v3052_v61 }
 0xd00   : > { %4152 = vmatmul.msk.bf16.vlgmr.msrb.gmra.mxu3 %vm1796_vm1, %v3080_v63 }
 0xd83   : > { %v3120_v9 = vpop.f32.mrf.mxu3 }
 0xd84   : > { %v3121_v5 = vadd.f32 %v4456_v4, %v3120_v9  ;;  %v4322_v9 = vld [vmem:[%s5535_s7 + $0x18] sm:$0xff] }
 0xd85   : > { %3405 = vmatpush.bf16.msra.mxu3 %v4322_v9 }
 0xd86   : > { %v3125_v6 = vmax.f32 %v3121_v5, 0.0  ;;  %v4320_v5 = vld [vmem:[%s5536_s11 + $0x8] sm:$0xff] }
 0xd8b   : > { %v3122_v55 = vpop.f32.mrf.mxu3 }
 0xd8c   : > { %v3123_v23 = vadd.f32 %v4456_v4, %v3122_v55  ;;  %v4321_v4 = vld [vmem:[%s5536_s11 + $0x10] sm:$0xff]  ;;  %v4319_v55 = vld [vmem:[%s5536_s11] sm:$0xff] }
 0xd8d   : > { %3406 = vmatpush.bf16.msra.mxu3 %v4321_v4 }
 0xd8e   : > { %v3126_v31 = vmax.f32 %v3123_v23, 0.0  ;;  %v4460_v23 = vld [vmem:[%s5537_s13] ss:$0 sm:$0xff] }
 0xd90   : > { %v3127_v8 = vpack.c.bf16 %v3126_v31, %v3125_v6 }
 0xd91   : > { %3407 = vmatpush.bf16.msra.mxu3 %v4320_v5 }
 0xd92   : > { %3187 = vmatmul.bf16.vlgmr.msrb.gmra.mxu0 %v3127_v8 }
 0xd95   : > { %3408 = vmatpush.bf16.msra.mxu3 %v4319_v55 }
 0xe0f   : > { %v3188_v7 = vpop.f32.mrf.mxu0 }
 0xe10   : > { %v3189_v12 = vadd.f32 %v4457_v30, %v3188_v7 }
 0xe12   : > { %v3193_v14 = vadd.f32 %v3189_v12, %v3052_v61 }
 0xe14   : > { %v3197_v15 = vsel %vm1796_vm1, %v3193_v14, 0.0 }
 0xe15   : > { %3198 = vadd.xlane.f32.xlu2 %v3197_v15 }
 0xe17   : > { %v3190_v16 = vpop.f32.mrf.mxu0 }
 0xe18   : > { %v3191_v17 = vadd.f32 %v4457_v30, %v3190_v16 }
 0xe1a   : > { %v3194_v19 = vadd.f32 %v3191_v17, %v3053_v62 }
 0xe1c   : > { %v3200_v46 = vsel %vm1796_vm1, %v3194_v19, 0.0 }
 0xe1d   : > { %3201 = vadd.xlane.f32.xlu1 %v3200_v46 }
 0xe88   : > { %v3199_v21 = vpop.xlane.xlu2 %3198 }
 0xe89   : > { %v3203_v20 = vmul.f32 %v3199_v21, %v5087_v28  ;;  %v4326_v21 = vld [vmem:[%s5539_s15 + $0x18] sm:$0xff] }
 0xe8a   : > { %3461 = vmatpush.bf16.msra.mxu1 %v4326_v21 }
 0xe8b   : > { %v3205_v22 = vsub.f32 %v3193_v14, %v3203_v20  ;;  %v4325_v20 = vld [vmem:[%s5539_s15 + $0x10] sm:$0xff] }
 0xe8d   : > { %v3207_v48 = vmul.f32 %v3205_v22, %v3205_v22 }
 0xe8e   : > { %3462 = vmatpush.bf16.msra.mxu1 %v4325_v20 }
 0xe8f   : > { %v3209_v24 = vsel %vm1796_vm1, %v3207_v48, 0.0  ;;  %v4323_v48 = vld [vmem:[%s5539_s15] sm:$0xff] }
 0xe90   : > { %v3202_v25 = vpop.xlane.xlu1 %3201  ;;  %3210 = vadd.xlane.f32.xlu0 %v3209_v24 }
 0xe91   : > { %v3204_v26 = vmul.f32 %v3202_v25, %v5087_v28  ;;  %v4462_v25 = vld [vmem:[%s5540_s0] ss:$0 sm:$0xff] }
 0xe93   : > { %v3206_v27 = vsub.f32 %v3194_v19, %v3204_v26 }
 0xe95   : > { %v3208_v29 = vmul.f32 %v3206_v27, %v3206_v27 }
 0xe97   : > { %v3212_v32 = vsel %vm1796_vm1, %v3208_v29, 0.0 }
 0xe98   : > { %3213 = vadd.xlane.f32.xlu2 %v3212_v32 }
 0xf03   : > { %v3211_v18 = vpop.xlane.xlu0 %3210 }
 0xf04   : > { %v3215_v41 = vmul.f32 %v3211_v18, %v5087_v28 }
 0xf06   : > { %v3217_v42 = vadd.f32 1e-05, %v3215_v41 }
 0xf08   : > { %4538 = vrsqrt.f32 %v3217_v42  ;;  %vm3225_vm4 = vweird.f32 %v3217_v42 }
 0xf0b   : > { %v3214_v45 = vpop.xlane.xlu2 %3213 }
 0xf0c   : > { %v3216_v36 = vmul.f32 %v3214_v45, %v5087_v28  ;;  %v4459_v28 = vld [vmem:[%s1681_s24] ss:$0 sm:$0xff]  ;;  %s5538_s24 = sld [smem:[#allocation37_spill]] }
 0xf0e   : > { %v4539_v50 = vpop.eup %4538  ;;  %v3218_v13 = vadd.f32 1e-05, %v3216_v36 }
 0xf0f   : > { %v3220_v51 = vmul.f32 %v4539_v50, %v3217_v42  ;;  %vm3226_vm3 = vweird.f32 %v4539_v50 }
 0xf10   : > { %4540 = vrsqrt.f32 %v3218_v13  ;;  %vm3227_vm5 = vmor %vm3225_vm4, %vm3226_vm3  ;;  %vm3235_vm7 = vweird.f32 %v3218_v13 }
 0xf11   : > { %v3221_v49 = vmul.f32 %v4539_v50, %v3220_v51 }
 0xf12   : > { %v4461_v7 = vld [vmem:[%s5538_s24] ss:$0 sm:$0xff] }
 0xf13   : > { %v3222_v52 = vmul.f32 0.5, %v3221_v49 }
 0xf15   : > { %v3223_v53 = vsub.f32 1.5, %v3222_v52 }
 0xf16   : > { %v4541_v54 = vpop.eup %4540 }
 0xf17   : > { %v3224_v56 = vmul.f32 %v4539_v50, %v3223_v53  ;;  %v3230_v47 = vmul.f32 %v4541_v54, %v3218_v13  ;;  %vm3236_vm6 = vweird.f32 %v4541_v54 }
 0xf18   : > { %vm3237_vm8 = vmor %vm3235_vm7, %vm3236_vm6 }
 0xf19   : > { %v3228_v10 = vsel %vm3227_vm5, %v4539_v50, %v3224_v56  ;;  %v3231_v11 = vmul.f32 %v4541_v54, %v3230_v47 }
 0xf1a   : > { %v3239_v58 = vmul.f32 %v3228_v10, %v3205_v22  ;;  %v4324_v22 = vld [vmem:[%s5539_s15 + $0x8] sm:$0xff] }
 0xf1b   : > { %v3232_v59 = vmul.f32 0.5, %v3231_v11  ;;  %3463 = vmatpush.bf16.msra.mxu1 %v4324_v22 }
 0xf1c   : > { %v3244_v39 = vmul.f32 %v4458_v57, %v3239_v58 }
 0xf1d   : > { %v3233_v60 = vsub.f32 1.5, %v3232_v59 }
 0xf1e   : > { %v3249_v61 = vadd.f32 %v4459_v28, %v3244_v39 }
 0xf1f   : > { %v3234_v62 = vmul.f32 %v4541_v54, %v3233_v60  ;;  %3464 = vmatpush.bf16.msra.mxu1 %v4323_v48 }
 0xf20   : > { %3251 = vst.msk [vmem:[#allocation2] sm:$0xff] %vm1796_vm1, %v3249_v61 }
 0xf21   : > { %v3238_v63 = vsel %vm3237_vm8, %v4541_v54, %v3234_v62 }
 0xf22   : > { %v3240_v0 = vmul.f32 %v3238_v63, %v3206_v27 }
 0xf24   : > { %v3245_v1 = vmul.f32 %v4458_v57, %v3240_v0 }
 0xf26   : > { %v3250_v2 = vadd.f32 %v4459_v28, %v3245_v1 }
 0xf28   : > { %3252 = vst.msk [vmem:[#allocation2 + $0x8] sm:$0xff] %vm1796_vm1, %v3250_v2  ;;  %v3253_v3 = vpack.c.bf16 %v3250_v2, %v3249_v61 }
 0xf2a   : > { %4201 = vmatmul.msk.bf16.vlgmr.msrb.gmra.mxu1 %vm1796_vm1, %v3253_v3  ;;  %4218 = vmatmul.msk.bf16.vlgmr.msrb.gmra.mxu2 %vm1796_vm1, %v3253_v3 }
 0xfa7   : > { %v3302_v6 = vpop.f32.mrf.mxu1 }
 0xfa8   : > { %v3303_v31 = vadd.f32 %v4460_v23, %v3302_v6 }
 0xfaa   : > { %3307 = vst [vmem:[%s4960_s10] sm:$0xff] %v3303_v31 }
 0xfad   : > { %v3354_v8 = vpop.f32.mrf.mxu2 }
 0xfae   : > { %v3355_v14 = vadd.f32 %v4461_v7, %v3354_v8 }
 0xfaf   : > { %v3304_v30 = vpop.f32.mrf.mxu1 }
 0xfb0   : > { %v3305_v12 = vadd.f32 %v4460_v23, %v3304_v30  ;;  %v3359_v17 = vmax.f32 %v3355_v14, 0.0 }
 0xfb2   : > { %3308 = vst [vmem:[%s4960_s10 + $0x8] sm:$0xff] %v3305_v12 }
 0xfb5   : > { %v3356_v15 = vpop.f32.mrf.mxu2 }
 0xfb6   : > { %v3357_v16 = vadd.f32 %v4461_v7, %v3356_v15 }
 0xfb8   : > { %v3360_v19 = vmax.f32 %v3357_v16, 0.0 }
 0xfba   : > { %v3361_v46 = vpack.c.bf16 %v3360_v19, %v3359_v17 }
 0xfbc   : > { %4235 = vmatmul.msk.bf16.vlgmr.msra.gmra.mxu3 %vm1796_vm1, %v3361_v46 }
0x103f   : > { %v3410_v24 = vpop.f32.mrf.mxu3 }
0x1040   : > { %v3411_v26 = vadd.f32 %v4462_v25, %v3410_v24 }
0x1042   : > { %v3415_v32 = vmax.f32 %v3411_v26, 0.0 }
0x1047   : > { %v3412_v27 = vpop.f32.mrf.mxu3 }
0x1048   : > { %v3413_v29 = vadd.f32 %v4462_v25, %v3412_v27 }
0x104a   : > { %v3416_v33 = vmax.f32 %v3413_v29, 0.0 }
0x104c   : > { %v3417_v34 = vpack.c.bf16 %v3416_v33, %v3415_v32 }
0x104e   : > { %4252 = vmatmul.msk.bf16.vlgmr.msra.gmra.mxu1 %vm1796_vm1, %v3417_v34 }
0x10cb   : > { %v3466_v37 = vpop.f32.mrf.mxu1 }
0x10cc   : > { %v3467_v40 = vadd.f32 %v4463_v35, %v3466_v37 }
0x10ce   : > { %v3473_v18 = vadd.f32 %v3471_v38, %v3467_v40 }
0x10d0   : > { %v3475_v41 = vsub.f32 0.0, %v3473_v18 }
0x10d2   : > { %v3477_v42 = vmul.f32 1.442695, %v3475_v41 }
0x10d3   : > { %v3468_v43 = vpop.f32.mrf.mxu1 }
0x10d4   : > { %4542 = vpow2.f32 %v3477_v42  ;;  %v3469_v45 = vadd.f32 %v4463_v35, %v3468_v43 }
0x10d6   : > { %v3474_v36 = vadd.f32 %v3472_v44, %v3469_v45 }
0x10d8   : > { %v3476_v50 = vsub.f32 0.0, %v3474_v36 }
0x10da   : > { %v4543_v13 = vpop.eup %4542  ;;  %v3479_v51 = vmul.f32 1.442695, %v3476_v50 }
0x10db   : > { %v3481_v49 = vadd.f32 1.0, %v4543_v13 }
0x10dc   : > { %4544 = vpow2.f32 %v3479_v51 }
0x10dd   : > { %4546 = vrcp.f32 %v3481_v49 }
0x10e2   : > { %v4545_v52 = vpop.eup %4544 }
0x10e3   : > { %v4547_v53 = vpop.eup %4546  ;;  %v3482_v54 = vadd.f32 1.0, %v4545_v52 }
0x10e4   : > { %3485 = vst [vmem:[%s4963_s21] sm:$0xff] %v4547_v53 }
0x10e5   : > { %4548 = vrcp.f32 %v3482_v54 }
0x10eb   : > { %v4549_v56 = vpop.eup %4548 }
0x10ec   : > { %3486 = vst [vmem:[%s4963_s21 + $0x8] sm:$0xff] %v4549_v56 }
0x10ed PF: > { %s5544_s10 = sld [smem:[#allocation47_spill]] }
0x10ee   : > { %s5545_s28 = sld [smem:[#allocation45_spill]] }
0x10ef   : > { %s5546_s1 = sld [smem:[#allocation46_spill]] }
0x10f0   : > { %s5547_s2 = sld [smem:[#allocation48_spill]] }
0x10f1   : > { %s5548_s7 = sld [smem:[#allocation49_spill]] }
0x10f3   : > { %s92_s10 = sadd.s32 1, %s5544_s10  }
0x10f4   : > { %p89_p8 = scmp.ge.s32.totalorder %s92_s10, 6  }
0x10f6   :  { %91 = sbr.rel (!%p89_p8) target bundleno = 96 (0x60), region = 343 }

</bundles_post_ra>
